<compile_context>
chip_gen: v7x
topology: tpu7x:2x2x1
jax: 0.10.0
libtpu: 0.0.40
codegen_flags: <defaults>
</compile_context>

<pallas_src>
import jax
import jax.numpy as jnp
from jax.experimental import pallas as pl
from jax.experimental.pallas import tpu as pltpu


def _rup(x, m):
    return ((x + m - 1) // m) * m


def _pad_last2(a, rows, cols):
    """Zero-pad the last two dims of `a` up to (rows, cols); no-op when aligned."""
    r, c = a.shape[-2], a.shape[-1]
    if r == rows and c == cols:
        return a
    pad = [(0, 0)] * (a.ndim - 2) + [(0, rows - r), (0, cols - c)]
    return jnp.pad(a, pad)


def _pick_tm(m):
    """Row tile for the [M, K] @ [K, C] matmuls (>=2 grid steps for sizable layers)."""
    if m >= 2048:
        return 512
    if m >= 512:
        return 256
    return 128


# ---------------------------------------------------------------------------
# Pallas kernels
# ---------------------------------------------------------------------------
def _mm_stats_kernel(a_ref, b_ref, o_ref, stats_ref):
    # a: (1, TM, K) bf16 ; b: (1, K, Cp) bf16 ; o: (1, TM, Cp) f32 ;
    # stats: (1, 8, Cp) f32  (row 0 = per-column sum, row 1 = per-column sum of squares)
    acc = jnp.dot(a_ref[0], b_ref[0], preferred_element_type=jnp.float32)
    o_ref[0] = acc
    s1 = jnp.sum(acc, axis=0, keepdims=True)
    s2 = jnp.sum(acc * acc, axis=0, keepdims=True)
    fill = jnp.zeros((6, acc.shape[1]), jnp.float32)
    stats_ref[0] = jnp.concatenate([s1, s2, fill], axis=0)


def _mm_bias_tanh_kernel(a_ref, b_ref, bias_ref, o_ref):
    # Last layer: bias + tanh fused into the matmul epilogue (no second pass).
    acc = jnp.dot(a_ref[0], b_ref[0], preferred_element_type=jnp.float32)
    o_ref[0] = jnp.tanh(acc + bias_ref[...])


def _scale_shift_relu_kernel(x_ref, scale_ref, shift_ref, o_ref):
    o_ref[...] = jnp.maximum(x_ref[...] * scale_ref[...] + shift_ref[...], 0.0)


# ---------------------------------------------------------------------------
# Pallas wrappers
# ---------------------------------------------------------------------------
def matmul_stats(a, b, tm):
    """a: [P, Mp, K] bf16, b: [P, K, Cp] bf16 -> (out [P, Mp, Cp] f32,
    per-column sum [Cp], per-column sum-of-squares [Cp])."""
    P, Mp, K = a.shape
    Cp = b.shape[-1]
    nmt = Mp // tm
    out, stats = pl.pallas_call(
        _mm_stats_kernel,
        out_shape=(
            jax.ShapeDtypeStruct((P, Mp, Cp), jnp.float32),
            jax.ShapeDtypeStruct((P * nmt, 8, Cp), jnp.float32),
        ),
        grid=(P, nmt),
        in_specs=[
            pl.BlockSpec((1, tm, K), lambda p, i: (p, i, 0)),
            pl.BlockSpec((1, K, Cp), lambda p, i: (p, 0, 0)),
        ],
        out_specs=(
            pl.BlockSpec((1, tm, Cp), lambda p, i: (p, i, 0)),
            pl.BlockSpec((1, 8, Cp), lambda p, i, n=nmt: (p * n + i, 0, 0)),
        ),
        compiler_params=pltpu.CompilerParams(
            dimension_semantics=("parallel", "parallel")),
    )(a, b)
    col_sum = jnp.sum(stats[:, 0, :], axis=0)
    col_sumsq = jnp.sum(stats[:, 1, :], axis=0)
    return out, col_sum, col_sumsq


def matmul_bias_tanh(a, b, bias, tm):
    """a: [P, Mp, K] bf16, b: [P, K, Cp] bf16, bias: [1, Cp] f32 -> tanh(a@b + bias)."""
    P, Mp, K = a.shape
    Cp = b.shape[-1]
    nmt = Mp // tm
    return pl.pallas_call(
        _mm_bias_tanh_kernel,
        out_shape=jax.ShapeDtypeStruct((P, Mp, Cp), jnp.float32),
        grid=(P, nmt),
        in_specs=[
            pl.BlockSpec((1, tm, K), lambda p, i: (p, i, 0)),
            pl.BlockSpec((1, K, Cp), lambda p, i: (p, 0, 0)),
            pl.BlockSpec((1, Cp), lambda p, i: (0, 0)),
        ],
        out_specs=pl.BlockSpec((1, tm, Cp), lambda p, i: (p, i, 0)),
        compiler_params=pltpu.CompilerParams(
            dimension_semantics=("parallel", "parallel")),
    )(a, b, bias)


def scale_shift_relu(x, scale, shift):
    """x: [R, Cp] f32 (R, Cp multiples of 128); scale/shift: [1, Cp] f32."""
    R, Cp = x.shape
    if R >= 2048 and R % 512 == 0:
        te = 512
    elif R >= 512 and R % 256 == 0:
        te = 256
    else:
        te = 128
    return pl.pallas_call(
        _scale_shift_relu_kernel,
        out_shape=jax.ShapeDtypeStruct((R, Cp), jnp.float32),
        grid=(R // te,),
        in_specs=[
            pl.BlockSpec((te, Cp), lambda i: (i, 0)),
            pl.BlockSpec((1, Cp), lambda i: (0, 0)),
            pl.BlockSpec((1, Cp), lambda i: (0, 0)),
        ],
        out_specs=pl.BlockSpec((te, Cp), lambda i: (i, 0)),
        compiler_params=pltpu.CompilerParams(dimension_semantics=("parallel",)),
    )(x, scale, shift)


# ---------------------------------------------------------------------------
# ConvTranspose2d (k=4, s=2, p=1) sub-pixel decomposition helpers
# ---------------------------------------------------------------------------
def _subpixel_patches(x):
    """x: [N, H, W, Cin] f32 -> patches [4, N*H*W, 4*Cin] bf16.
    Phase p = 2*r + c produces output pixels (2i+r, 2j+c); K ordered (dy, dx, ci)."""
    N, H, W, C = x.shape
    xp = jnp.pad(x, ((0, 0), (1, 1), (1, 1), (0, 0)))
    phases = []
    for r in range(2):
        for c in range(2):
            slabs = [xp[:, r + dy:r + dy + H, c + dx:c + dx + W, :]
                     for dy in range(2) for dx in range(2)]
            phases.append(jnp.concatenate(slabs, axis=-1).reshape(N * H * W, 4 * C))
    return jnp.stack(phases, axis=0).astype(jnp.bfloat16)


def _subpixel_weights(w):
    """w: [Cin, Cout, 4, 4] (PyTorch ConvTranspose2d layout) -> [4, 4*Cin, Cout]
    phase weights for k=4, s=2, p=1 matching _subpixel_patches' K order."""
    cin, cout = int(w.shape[0]), int(w.shape[1])
    taps = {0: jnp.array([3, 1]), 1: jnp.array([2, 0])}
    phases = []
    for r in range(2):
        for c in range(2):
            wsub = jnp.take(jnp.take(w, taps[r], axis=2), taps[c], axis=3)  # [ci,co,dy,dx]
            wsub = jnp.transpose(wsub, (2, 3, 0, 1)).reshape(4 * cin, cout)  # (dy,dx,ci)
            phases.append(wsub)
    return jnp.stack(phases, axis=0)


# ---------------------------------------------------------------------------
# Parameter prep (done once): flip/reorder/pad weights, cast to bf16
# ---------------------------------------------------------------------------
def prepare_params(params):
    layers = []
    for layer in params["layers"]:
        w = layer["w"].astype(jnp.float32)
        b = layer["b"].astype(jnp.float32)
        cin, cout = int(w.shape[0]), int(w.shape[1])
        entry = {"stride": layer["stride"], "cin": cin, "cout": cout}
        if layer["stride"] == 1:
            # 1x1-spatial-input projection: [Cin, 4*4*Cout], columns ordered (ky, kx, co)
            wf = jnp.transpose(w, (0, 2, 3, 1)).reshape(cin, 16 * cout)
            kp, cp = _rup(cin, 128), _rup(16 * cout, 128)
            entry["w"] = _pad_last2(wf, kp, cp).astype(jnp.bfloat16)[None]   # [1, kp, cp]
        else:
            wph = _subpixel_weights(w)                                       # [4, 4*cin, cout]
            kp, cp = _rup(4 * cin, 128), _rup(cout, 128)
            entry["w"] = _pad_last2(wph, kp, cp).astype(jnp.bfloat16)        # [4, kp, cp]
        entry["kp"], entry["cp"] = kp, cp
        if layer["bn"] is not None:
            gamma, beta = layer["bn"]
            entry["bn"] = (gamma.astype(jnp.float32), beta.astype(jnp.float32))
            entry["bias"] = None  # conv bias is exactly cancelled by BN mean subtraction
        else:
            entry["bn"] = None
            entry["bias"] = _pad_last2(b[None, :], 1, cp)                    # [1, cp] f32
        layers.append(entry)
    return layers


# ---------------------------------------------------------------------------
# Generator256 forward
# ---------------------------------------------------------------------------
def make_generator256(params, eps=1e-5):
    layers = prepare_params(params)

    @jax.jit
    def forward(x_nchw):
        n = x_nchw.shape[0]
        x = jnp.transpose(x_nchw, (0, 2, 3, 1)).astype(jnp.float32)  # NHWC
        for layer in layers:
            cin, cout = layer["cin"], layer["cout"]
            kp, cp = layer["kp"], layer["cp"]
            if layer["stride"] == 1:
                # ConvTranspose2d(k=4, s=1, p=0) on a 1x1 input == projection matmul.
                m = n
                tm = _pick_tm(m)
                mp = _rup(m, tm)
                a = _pad_last2(x.reshape(n, cin), mp, kp).astype(jnp.bfloat16)[None]
                out, s1, s2 = matmul_stats(a, layer["w"], tm)
                gamma, beta = layer["bn"]
                cnt = float(n * 16)  # BN stats over (N, 4, 4)
                ssum = s1[:16 * cout].reshape(16, cout).sum(axis=0)
                ssq = s2[:16 * cout].reshape(16, cout).sum(axis=0)
                mean = ssum / cnt
                var = jnp.maximum(ssq / cnt - mean * mean, 0.0)  # biased (training-mode)
                scale = gamma * jax.lax.rsqrt(var + eps)
                shift = beta - mean * scale
                sc = _pad_last2(jnp.tile(scale, 16)[None], 1, cp)
                sh = _pad_last2(jnp.tile(shift, 16)[None], 1, cp)
                y = scale_shift_relu(out.reshape(mp, cp), sc, sh)
                x = y[:n, :16 * cout].reshape(n, 4, 4, cout)
            else:
                nb, h, ww, _ = x.shape
                m = nb * h * ww
                tm = _pick_tm(m)
                mp = _rup(m, tm)
                patches = _pad_last2(_subpixel_patches(x), mp, kp)   # [4, mp, kp] bf16
                if layer["bn"] is not None:
                    out, s1, s2 = matmul_stats(patches, layer["w"], tm)
                    gamma, beta = layer["bn"]
                    cnt = float(4 * m)  # BN stats over (N, 2H, 2W)
                    mean = s1[:cout] / cnt
                    var = jnp.maximum(s2[:cout] / cnt - mean * mean, 0.0)
                    scale = gamma * jax.lax.rsqrt(var + eps)
                    shift = beta - mean * scale
                    sc = _pad_last2(scale[None], 1, cp)
                    sh = _pad_last2(shift[None], 1, cp)
                    y = scale_shift_relu(out.reshape(4 * mp, cp), sc, sh).reshape(4, mp, cp)
                else:
                    y = matmul_bias_tanh(patches, layer["w"], layer["bias"], tm)
                # sub-pixel reassembly: phase p = 2r + c -> out[n, 2i+r, 2j+c, co]
                y = y[:, :m, :cout].reshape(2, 2, nb, h, ww, cout)
                x = jnp.transpose(y, (2, 3, 0, 4, 1, 5)).reshape(nb, 2 * h, 2 * ww, cout)
        return jnp.transpose(x, (0, 3, 1, 2))  # back to NCHW

    return forward


# ---------------------------------------------------------------------------
# Deterministic parameter initialization (shapes from Generator256.__init__)
# ---------------------------------------------------------------------------
def init_params(key, channels_noise, channels_img, features_g):
    specs = [
        # (cin, cout, stride, padding, has_bn)
        (channels_noise, features_g * 16, 1, 0, True),
        (features_g * 16, features_g * 8, 2, 1, True),
        (features_g * 8, features_g * 4, 2, 1, True),
        (features_g * 4, features_g * 2, 2, 1, True),
        (features_g * 2, channels_img, 2, 1, False),
    ]
    layers = []
    for cin, cout, s, p, has_bn in specs:
        key, k1, k2, k3, k4 = jax.random.split(key, 5)
        w = 0.05 * jax.random.normal(k1, (cin, cout, 4, 4), jnp.float32)
        b = 0.05 * jax.random.normal(k2, (cout,), jnp.float32)
        bn = None
        if has_bn:
            gamma = 1.0 + 0.1 * jax.random.normal(k3, (cout,), jnp.float32)
            beta = 0.1 * jax.random.normal(k4, (cout,), jnp.float32)
            bn = (gamma, beta)
        layers.append(dict(w=w, b=b, bn=bn, stride=s, padding=p))
    return {"layers": layers}


if __name__ == "__main__":
    channels_noise, channels_img, features_g = 8, 3, 4
    key = jax.random.PRNGKey(0)
    pkey, xkey = jax.random.split(key)

    params = init_params(pkey, channels_noise, channels_img, features_g)
    # DCGAN generator input: noise at 1x1 spatial resolution (NCHW).
    x = jax.random.normal(xkey, (2, channels_noise, 1, 1), jnp.float32)

    forward = make_generator256(params)
    out = jax.block_until_ready(forward(x))

    assert out.shape == (2, channels_img, 64, 64), out.shape
    assert bool(jnp.all(jnp.isfinite(out)))
    assert bool(jnp.max(jnp.abs(out)) <= 1.0 + 1e-6)  # tanh output range
    print("KERNEL_OK")
</pallas_src>

<mosaic_0001>
module attributes {stable_mosaic.version = 11 : i64} {
  func.func @_mm_stats_kernel(%arg0: i32, %arg1: i32, %arg2: memref<1x128x128xbf16, #tpu.memory_space<vmem>>, %arg3: memref<1x128x1024xbf16, #tpu.memory_space<vmem>>, %arg4: memref<1x128x1024xf32, #tpu.memory_space<vmem>>, %arg5: memref<1x8x1024xf32, #tpu.memory_space<vmem>>) attributes {dimension_semantics = [#tpu.dimension_semantics<parallel>, #tpu.dimension_semantics<parallel>], iteration_bounds = array<i64: 1, 1>, scalar_prefetch = 0 : i64, scratch_operands = 0 : i64, tpu.core_type = #tpu.core_type<tc>, window_params = [{transform_indices = @transform_0, window_bounds = array<i64: 1, 128, 128>}, {transform_indices = @transform_1, window_bounds = array<i64: 1, 128, 1024>}, {transform_indices = @transform_2, window_bounds = array<i64: 1, 128, 1024>}, {transform_indices = @transform_3, window_bounds = array<i64: 1, 8, 1024>}]} {
    %c0 = arith.constant 0 : index
    %c0_0 = arith.constant 0 : index
    %c0_1 = arith.constant 0 : index
    %0 = vector.load %arg2[%c0, %c0_0, %c0_1] : memref<1x128x128xbf16, #tpu.memory_space<vmem>>, vector<1x128x128xbf16>
    %1 = vector.shape_cast %0 : vector<1x128x128xbf16> to vector<128x128xbf16>
    %c0_2 = arith.constant 0 : index
    %c0_3 = arith.constant 0 : index
    %c0_4 = arith.constant 0 : index
    %2 = vector.load %arg3[%c0_2, %c0_3, %c0_4] : memref<1x128x1024xbf16, #tpu.memory_space<vmem>>, vector<1x128x1024xbf16>
    %3 = vector.shape_cast %2 : vector<1x128x1024xbf16> to vector<128x1024xbf16>
    %cst = arith.constant dense<0.000000e+00> : vector<128x1024xf32>
    %4 = tpu.matmul %1, %3, %cst {dimension_numbers = #tpu.dot_dimension_numbers<[1], [0], [0], [1], [0, 0, 1, 1], [], []>} : vector<128x128xbf16>, vector<128x1024xbf16>, vector<128x1024xf32> -> vector<128x1024xf32>
    %c0_5 = arith.constant 0 : index
    %c0_6 = arith.constant 0 : index
    %c0_7 = arith.constant 0 : index
    %5 = vector.load %arg4[%c0_5, %c0_6, %c0_7] : memref<1x128x1024xf32, #tpu.memory_space<vmem>>, vector<1x128x1024xf32>
    %6 = vector.shape_cast %5 : vector<1x128x1024xf32> to vector<128x1024xf32>
    %7 = vector.shape_cast %4 : vector<128x1024xf32> to vector<1x128x1024xf32>
    tpu.vector_store %arg4[%c0_5, %c0_6, %c0_7], %7 {strides = array<i32>} : memref<1x128x1024xf32, #tpu.memory_space<vmem>>, vector<1x128x1024xf32>,
    %cst_8 = arith.constant dense<0.000000e+00> : vector<1024xf32>
    %8 = vector.multi_reduction <add>, %4, %cst_8 [0] : vector<128x1024xf32> to vector<1024xf32>
    %9 = vector.shape_cast %8 : vector<1024xf32> to vector<1x1024xf32>
    %10 = arith.mulf %4, %4 : vector<128x1024xf32>
    %cst_9 = arith.constant dense<0.000000e+00> : vector<1024xf32>
    %11 = vector.multi_reduction <add>, %10, %cst_9 [0] : vector<128x1024xf32> to vector<1024xf32>
    %12 = vector.shape_cast %11 : vector<1024xf32> to vector<1x1024xf32>
    %cst_10 = arith.constant 0.000000e+00 : f32
    %13 = vector.broadcast %cst_10 : f32 to vector<6x1024xf32>
    %14 = tpu.concatenate %9, %12, %13 in 0 : vector<1x1024xf32>, vector<1x1024xf32>, vector<6x1024xf32> -> vector<8x1024xf32>
    %c0_11 = arith.constant 0 : index
    %c0_12 = arith.constant 0 : index
    %c0_13 = arith.constant 0 : index
    %15 = vector.load %arg5[%c0_11, %c0_12, %c0_13] : memref<1x8x1024xf32, #tpu.memory_space<vmem>>, vector<1x8x1024xf32>
    %16 = vector.shape_cast %15 : vector<1x8x1024xf32> to vector<8x1024xf32>
    %17 = vector.shape_cast %14 : vector<8x1024xf32> to vector<1x8x1024xf32>
    tpu.vector_store %arg5[%c0_11, %c0_12, %c0_13], %17 {strides = array<i32>} : memref<1x8x1024xf32, #tpu.memory_space<vmem>>, vector<1x8x1024xf32>,
    return
  }
  func.func @transform_0(%arg0: i32, %arg1: i32) -> (i32, i32, i32) {
    %c0_i32 = arith.constant 0 : i32
    %c0_i32_0 = arith.constant 0 : i32
    return %arg0, %arg1, %c0_i32 : i32, i32, i32
  }
  func.func @transform_1(%arg0: i32, %arg1: i32) -> (i32, i32, i32) {
    %c0_i32 = arith.constant 0 : i32
    %c0_i32_0 = arith.constant 0 : i32
    %c0_i32_1 = arith.constant 0 : i32
    return %arg0, %c0_i32, %c0_i32_0 : i32, i32, i32
  }
  func.func @transform_2(%arg0: i32, %arg1: i32) -> (i32, i32, i32) {
    %c0_i32 = arith.constant 0 : i32
    %c0_i32_0 = arith.constant 0 : i32
    return %arg0, %arg1, %c0_i32 : i32, i32, i32
  }
  func.func @transform_3(%arg0: i32, %arg1: i32) -> (i32, i32, i32) {
    %c1_i32 = arith.constant 1 : i32
    %0 = arith.muli %arg0, %c1_i32 : i32
    %1 = arith.addi %0, %arg1 : i32
    %c0_i32 = arith.constant 0 : i32
    %c0_i32_0 = arith.constant 0 : i32
    %c0_i32_1 = arith.constant 0 : i32
    return %1, %c0_i32, %c0_i32_0 : i32, i32, i32
  }
}

module attributes {stable_mosaic.version = 11 : i64} {
  func.func @_scale_shift_relu_kernel(%arg0: i32, %arg1: memref<128x1024xf32, #tpu.memory_space<vmem>>, %arg2: memref<1x1024xf32, #tpu.memory_space<vmem>>, %arg3: memref<1x1024xf32, #tpu.memory_space<vmem>>, %arg4: memref<128x1024xf32, #tpu.memory_space<vmem>>) attributes {dimension_semantics = [#tpu.dimension_semantics<parallel>], iteration_bounds = array<i64: 1>, scalar_prefetch = 0 : i64, scratch_operands = 0 : i64, tpu.core_type = #tpu.core_type<tc>, window_params = [{transform_indices = @transform_0, window_bounds = array<i64: 128, 1024>}, {pipeline_mode = #tpu.pipeline_mode<synchronous>, transform_indices = @transform_1, window_bounds = array<i64: 1, 1024>}, {pipeline_mode = #tpu.pipeline_mode<synchronous>, transform_indices = @transform_2, window_bounds = array<i64: 1, 1024>}, {transform_indices = @transform_3, window_bounds = array<i64: 128, 1024>}]} {
    %c0 = arith.constant 0 : index
    %c0_0 = arith.constant 0 : index
    %0 = vector.load %arg1[%c0, %c0_0] : memref<128x1024xf32, #tpu.memory_space<vmem>>, vector<128x1024xf32>
    %c0_1 = arith.constant 0 : index
    %c0_2 = arith.constant 0 : index
    %1 = vector.load %arg2[%c0_1, %c0_2] : memref<1x1024xf32, #tpu.memory_space<vmem>>, vector<1x1024xf32>
    %2 = vector.broadcast %1 : vector<1x1024xf32> to vector<128x1024xf32>
    %3 = arith.mulf %0, %2 : vector<128x1024xf32>
    %c0_3 = arith.constant 0 : index
    %c0_4 = arith.constant 0 : index
    %4 = vector.load %arg3[%c0_3, %c0_4] : memref<1x1024xf32, #tpu.memory_space<vmem>>, vector<1x1024xf32>
    %5 = vector.broadcast %4 : vector<1x1024xf32> to vector<128x1024xf32>
    %6 = arith.addf %3, %5 : vector<128x1024xf32>
    %cst = arith.constant 0.000000e+00 : f32
    %7 = vector.broadcast %cst : f32 to vector<128x1024xf32>
    %8 = arith.maximumf %6, %7 : vector<128x1024xf32>
    %c0_5 = arith.constant 0 : index
    %c0_6 = arith.constant 0 : index
    %9 = vector.load %arg4[%c0_5, %c0_6] : memref<128x1024xf32, #tpu.memory_space<vmem>>, vector<128x1024xf32>
    tpu.vector_store %arg4[%c0_5, %c0_6], %8 {strides = array<i32>} : memref<128x1024xf32, #tpu.memory_space<vmem>>, vector<128x1024xf32>,
    return
  }
  func.func @transform_0(%arg0: i32) -> (i32, i32) {
    %c0_i32 = arith.constant 0 : i32
    %c0_i32_0 = arith.constant 0 : i32
    return %arg0, %c0_i32 : i32, i32
  }
  func.func @transform_1(%arg0: i32) -> (i32, i32) {
    %c0_i32 = arith.constant 0 : i32
    %c0_i32_0 = arith.constant 0 : i32
    %c0_i32_1 = arith.constant 0 : i32
    return %c0_i32, %c0_i32_0 : i32, i32
  }
  func.func @transform_2(%arg0: i32) -> (i32, i32) {
    %c0_i32 = arith.constant 0 : i32
    %c0_i32_0 = arith.constant 0 : i32
    %c0_i32_1 = arith.constant 0 : i32
    return %c0_i32, %c0_i32_0 : i32, i32
  }
  func.func @transform_3(%arg0: i32) -> (i32, i32) {
    %c0_i32 = arith.constant 0 : i32
    %c0_i32_0 = arith.constant 0 : i32
    return %arg0, %c0_i32 : i32, i32
  }
}

module attributes {stable_mosaic.version = 11 : i64} {
  func.func @_mm_stats_kernel(%arg0: i32, %arg1: i32, %arg2: memref<1x128x256xbf16, #tpu.memory_space<vmem>>, %arg3: memref<1x256x128xbf16, #tpu.memory_space<vmem>>, %arg4: memref<1x128x128xf32, #tpu.memory_space<vmem>>, %arg5: memref<1x8x128xf32, #tpu.memory_space<vmem>>) attributes {dimension_semantics = [#tpu.dimension_semantics<parallel>, #tpu.dimension_semantics<parallel>], iteration_bounds = array<i64: 4, 1>, scalar_prefetch = 0 : i64, scratch_operands = 0 : i64, tpu.core_type = #tpu.core_type<tc>, window_params = [{transform_indices = @transform_0, window_bounds = array<i64: 1, 128, 256>}, {transform_indices = @transform_1, window_bounds = array<i64: 1, 256, 128>}, {transform_indices = @transform_2, window_bounds = array<i64: 1, 128, 128>}, {transform_indices = @transform_3, window_bounds = array<i64: 1, 8, 128>}]} {
    %c0 = arith.constant 0 : index
    %c0_0 = arith.constant 0 : index
    %c0_1 = arith.constant 0 : index
    %0 = vector.load %arg2[%c0, %c0_0, %c0_1] : memref<1x128x256xbf16, #tpu.memory_space<vmem>>, vector<1x128x256xbf16>
    %1 = vector.shape_cast %0 : vector<1x128x256xbf16> to vector<128x256xbf16>
    %c0_2 = arith.constant 0 : index
    %c0_3 = arith.constant 0 : index
    %c0_4 = arith.constant 0 : index
    %2 = vector.load %arg3[%c0_2, %c0_3, %c0_4] : memref<1x256x128xbf16, #tpu.memory_space<vmem>>, vector<1x256x128xbf16>
    %3 = vector.shape_cast %2 : vector<1x256x128xbf16> to vector<256x128xbf16>
    %cst = arith.constant dense<0.000000e+00> : vector<128x128xf32>
    %4 = tpu.matmul %1, %3, %cst {dimension_numbers = #tpu.dot_dimension_numbers<[1], [0], [0], [1], [0, 0, 1, 1], [], []>} : vector<128x256xbf16>, vector<256x128xbf16>, vector<128x128xf32> -> vector<128x128xf32>
    %c0_5 = arith.constant 0 : index
    %c0_6 = arith.constant 0 : index
    %c0_7 = arith.constant 0 : index
    %5 = vector.load %arg4[%c0_5, %c0_6, %c0_7] : memref<1x128x128xf32, #tpu.memory_space<vmem>>, vector<1x128x128xf32>
    %6 = vector.shape_cast %5 : vector<1x128x128xf32> to vector<128x128xf32>
    %7 = vector.shape_cast %4 : vector<128x128xf32> to vector<1x128x128xf32>
    tpu.vector_store %arg4[%c0_5, %c0_6, %c0_7], %7 {strides = array<i32>} : memref<1x128x128xf32, #tpu.memory_space<vmem>>, vector<1x128x128xf32>,
    %cst_8 = arith.constant dense<0.000000e+00> : vector<128xf32>
    %8 = vector.multi_reduction <add>, %4, %cst_8 [0] : vector<128x128xf32> to vector<128xf32>
    %9 = vector.shape_cast %8 : vector<128xf32> to vector<1x128xf32>
    %10 = arith.mulf %4, %4 : vector<128x128xf32>
    %cst_9 = arith.constant dense<0.000000e+00> : vector<128xf32>
    %11 = vector.multi_reduction <add>, %10, %cst_9 [0] : vector<128x128xf32> to vector<128xf32>
    %12 = vector.shape_cast %11 : vector<128xf32> to vector<1x128xf32>
    %cst_10 = arith.constant 0.000000e+00 : f32
    %13 = vector.broadcast %cst_10 : f32 to vector<6x128xf32>
    %14 = tpu.concatenate %9, %12, %13 in 0 : vector<1x128xf32>, vector<1x128xf32>, vector<6x128xf32> -> vector<8x128xf32>
    %c0_11 = arith.constant 0 : index
    %c0_12 = arith.constant 0 : index
    %c0_13 = arith.constant 0 : index
    %15 = vector.load %arg5[%c0_11, %c0_12, %c0_13] : memref<1x8x128xf32, #tpu.memory_space<vmem>>, vector<1x8x128xf32>
    %16 = vector.shape_cast %15 : vector<1x8x128xf32> to vector<8x128xf32>
    %17 = vector.shape_cast %14 : vector<8x128xf32> to vector<1x8x128xf32>
    tpu.vector_store %arg5[%c0_11, %c0_12, %c0_13], %17 {strides = array<i32>} : memref<1x8x128xf32, #tpu.memory_space<vmem>>, vector<1x8x128xf32>,
    return
  }
  func.func @transform_0(%arg0: i32, %arg1: i32) -> (i32, i32, i32) {
    %c0_i32 = arith.constant 0 : i32
    %c0_i32_0 = arith.constant 0 : i32
    return %arg0, %arg1, %c0_i32 : i32, i32, i32
  }
  func.func @transform_1(%arg0: i32, %arg1: i32) -> (i32, i32, i32) {
    %c0_i32 = arith.constant 0 : i32
    %c0_i32_0 = arith.constant 0 : i32
    %c0_i32_1 = arith.constant 0 : i32
    return %arg0, %c0_i32, %c0_i32_0 : i32, i32, i32
  }
  func.func @transform_2(%arg0: i32, %arg1: i32) -> (i32, i32, i32) {
    %c0_i32 = arith.constant 0 : i32
    %c0_i32_0 = arith.constant 0 : i32
    return %arg0, %arg1, %c0_i32 : i32, i32, i32
  }
  func.func @transform_3(%arg0: i32, %arg1: i32) -> (i32, i32, i32) {
    %c1_i32 = arith.constant 1 : i32
    %0 = arith.muli %arg0, %c1_i32 : i32
    %1 = arith.addi %0, %arg1 : i32
    %c0_i32 = arith.constant 0 : i32
    %c0_i32_0 = arith.constant 0 : i32
    %c0_i32_1 = arith.constant 0 : i32
    return %1, %c0_i32, %c0_i32_0 : i32, i32, i32
  }
}

module attributes {stable_mosaic.version = 11 : i64} {
  func.func @_scale_shift_relu_kernel(%arg0: i32, %arg1: memref<256x128xf32, #tpu.memory_space<vmem>>, %arg2: memref<1x128xf32, #tpu.memory_space<vmem>>, %arg3: memref<1x128xf32, #tpu.memory_space<vmem>>, %arg4: memref<256x128xf32, #tpu.memory_space<vmem>>) attributes {dimension_semantics = [#tpu.dimension_semantics<parallel>], iteration_bounds = array<i64: 2>, scalar_prefetch = 0 : i64, scratch_operands = 0 : i64, tpu.core_type = #tpu.core_type<tc>, window_params = [{transform_indices = @transform_0, window_bounds = array<i64: 256, 128>}, {pipeline_mode = #tpu.pipeline_mode<synchronous>, transform_indices = @transform_1, window_bounds = array<i64: 1, 128>}, {pipeline_mode = #tpu.pipeline_mode<synchronous>, transform_indices = @transform_2, window_bounds = array<i64: 1, 128>}, {transform_indices = @transform_3, window_bounds = array<i64: 256, 128>}]} {
    %c0 = arith.constant 0 : index
    %c0_0 = arith.constant 0 : index
    %0 = vector.load %arg1[%c0, %c0_0] : memref<256x128xf32, #tpu.memory_space<vmem>>, vector<256x128xf32>
    %c0_1 = arith.constant 0 : index
    %c0_2 = arith.constant 0 : index
    %1 = vector.load %arg2[%c0_1, %c0_2] : memref<1x128xf32, #tpu.memory_space<vmem>>, vector<1x128xf32>
    %2 = vector.broadcast %1 : vector<1x128xf32> to vector<256x128xf32>
    %3 = arith.mulf %0, %2 : vector<256x128xf32>
    %c0_3 = arith.constant 0 : index
    %c0_4 = arith.constant 0 : index
    %4 = vector.load %arg3[%c0_3, %c0_4] : memref<1x128xf32, #tpu.memory_space<vmem>>, vector<1x128xf32>
    %5 = vector.broadcast %4 : vector<1x128xf32> to vector<256x128xf32>
    %6 = arith.addf %3, %5 : vector<256x128xf32>
    %cst = arith.constant 0.000000e+00 : f32
    %7 = vector.broadcast %cst : f32 to vector<256x128xf32>
    %8 = arith.maximumf %6, %7 : vector<256x128xf32>
    %c0_5 = arith.constant 0 : index
    %c0_6 = arith.constant 0 : index
    %9 = vector.load %arg4[%c0_5, %c0_6] : memref<256x128xf32, #tpu.memory_space<vmem>>, vector<256x128xf32>
    tpu.vector_store %arg4[%c0_5, %c0_6], %8 {strides = array<i32>} : memref<256x128xf32, #tpu.memory_space<vmem>>, vector<256x128xf32>,
    return
  }
  func.func @transform_0(%arg0: i32) -> (i32, i32) {
    %c0_i32 = arith.constant 0 : i32
    %c0_i32_0 = arith.constant 0 : i32
    return %arg0, %c0_i32 : i32, i32
  }
  func.func @transform_1(%arg0: i32) -> (i32, i32) {
    %c0_i32 = arith.constant 0 : i32
    %c0_i32_0 = arith.constant 0 : i32
    %c0_i32_1 = arith.constant 0 : i32
    return %c0_i32, %c0_i32_0 : i32, i32
  }
  func.func @transform_2(%arg0: i32) -> (i32, i32) {
    %c0_i32 = arith.constant 0 : i32
    %c0_i32_0 = arith.constant 0 : i32
    %c0_i32_1 = arith.constant 0 : i32
    return %c0_i32, %c0_i32_0 : i32, i32
  }
  func.func @transform_3(%arg0: i32) -> (i32, i32) {
    %c0_i32 = arith.constant 0 : i32
    %c0_i32_0 = arith.constant 0 : i32
    return %arg0, %c0_i32 : i32, i32
  }
}

module attributes {stable_mosaic.version = 11 : i64} {
  func.func @_mm_stats_kernel(%arg0: i32, %arg1: i32, %arg2: memref<1x128x128xbf16, #tpu.memory_space<vmem>>, %arg3: memref<1x128x128xbf16, #tpu.memory_space<vmem>>, %arg4: memref<1x128x128xf32, #tpu.memory_space<vmem>>, %arg5: memref<1x8x128xf32, #tpu.memory_space<vmem>>) attributes {dimension_semantics = [#tpu.dimension_semantics<parallel>, #tpu.dimension_semantics<parallel>], iteration_bounds = array<i64: 4, 1>, scalar_prefetch = 0 : i64, scratch_operands = 0 : i64, tpu.core_type = #tpu.core_type<tc>, window_params = [{transform_indices = @transform_0, window_bounds = array<i64: 1, 128, 128>}, {transform_indices = @transform_1, window_bounds = array<i64: 1, 128, 128>}, {transform_indices = @transform_2, window_bounds = array<i64: 1, 128, 128>}, {transform_indices = @transform_3, window_bounds = array<i64: 1, 8, 128>}]} {
    %c0 = arith.constant 0 : index
    %c0_0 = arith.constant 0 : index
    %c0_1 = arith.constant 0 : index
    %0 = vector.load %arg2[%c0, %c0_0, %c0_1] : memref<1x128x128xbf16, #tpu.memory_space<vmem>>, vector<1x128x128xbf16>
    %1 = vector.shape_cast %0 : vector<1x128x128xbf16> to vector<128x128xbf16>
    %c0_2 = arith.constant 0 : index
    %c0_3 = arith.constant 0 : index
    %c0_4 = arith.constant 0 : index
    %2 = vector.load %arg3[%c0_2, %c0_3, %c0_4] : memref<1x128x128xbf16, #tpu.memory_space<vmem>>, vector<1x128x128xbf16>
    %3 = vector.shape_cast %2 : vector<1x128x128xbf16> to vector<128x128xbf16>
    %cst = arith.constant dense<0.000000e+00> : vector<128x128xf32>
    %4 = tpu.matmul %1, %3, %cst {dimension_numbers = #tpu.dot_dimension_numbers<[1], [0], [0], [1], [0, 0, 1, 1], [], []>} : vector<128x128xbf16>, vector<128x128xbf16>, vector<128x128xf32> -> vector<128x128xf32>
    %c0_5 = arith.constant 0 : index
    %c0_6 = arith.constant 0 : index
    %c0_7 = arith.constant 0 : index
    %5 = vector.load %arg4[%c0_5, %c0_6, %c0_7] : memref<1x128x128xf32, #tpu.memory_space<vmem>>, vector<1x128x128xf32>
    %6 = vector.shape_cast %5 : vector<1x128x128xf32> to vector<128x128xf32>
    %7 = vector.shape_cast %4 : vector<128x128xf32> to vector<1x128x128xf32>
    tpu.vector_store %arg4[%c0_5, %c0_6, %c0_7], %7 {strides = array<i32>} : memref<1x128x128xf32, #tpu.memory_space<vmem>>, vector<1x128x128xf32>,
    %cst_8 = arith.constant dense<0.000000e+00> : vector<128xf32>
    %8 = vector.multi_reduction <add>, %4, %cst_8 [0] : vector<128x128xf32> to vector<128xf32>
    %9 = vector.shape_cast %8 : vector<128xf32> to vector<1x128xf32>
    %10 = arith.mulf %4, %4 : vector<128x128xf32>
    %cst_9 = arith.constant dense<0.000000e+00> : vector<128xf32>
    %11 = vector.multi_reduction <add>, %10, %cst_9 [0] : vector<128x128xf32> to vector<128xf32>
    %12 = vector.shape_cast %11 : vector<128xf32> to vector<1x128xf32>
    %cst_10 = arith.constant 0.000000e+00 : f32
    %13 = vector.broadcast %cst_10 : f32 to vector<6x128xf32>
    %14 = tpu.concatenate %9, %12, %13 in 0 : vector<1x128xf32>, vector<1x128xf32>, vector<6x128xf32> -> vector<8x128xf32>
    %c0_11 = arith.constant 0 : index
    %c0_12 = arith.constant 0 : index
    %c0_13 = arith.constant 0 : index
    %15 = vector.load %arg5[%c0_11, %c0_12, %c0_13] : memref<1x8x128xf32, #tpu.memory_space<vmem>>, vector<1x8x128xf32>
    %16 = vector.shape_cast %15 : vector<1x8x128xf32> to vector<8x128xf32>
    %17 = vector.shape_cast %14 : vector<8x128xf32> to vector<1x8x128xf32>
    tpu.vector_store %arg5[%c0_11, %c0_12, %c0_13], %17 {strides = array<i32>} : memref<1x8x128xf32, #tpu.memory_space<vmem>>, vector<1x8x128xf32>,
    return
  }
  func.func @transform_0(%arg0: i32, %arg1: i32) -> (i32, i32, i32) {
    %c0_i32 = arith.constant 0 : i32
    %c0_i32_0 = arith.constant 0 : i32
    return %arg0, %arg1, %c0_i32 : i32, i32, i32
  }
  func.func @transform_1(%arg0: i32, %arg1: i32) -> (i32, i32, i32) {
    %c0_i32 = arith.constant 0 : i32
    %c0_i32_0 = arith.constant 0 : i32
    %c0_i32_1 = arith.constant 0 : i32
    return %arg0, %c0_i32, %c0_i32_0 : i32, i32, i32
  }
  func.func @transform_2(%arg0: i32, %arg1: i32) -> (i32, i32, i32) {
    %c0_i32 = arith.constant 0 : i32
    %c0_i32_0 = arith.constant 0 : i32
    return %arg0, %arg1, %c0_i32 : i32, i32, i32
  }
  func.func @transform_3(%arg0: i32, %arg1: i32) -> (i32, i32, i32) {
    %c1_i32 = arith.constant 1 : i32
    %0 = arith.muli %arg0, %c1_i32 : i32
    %1 = arith.addi %0, %arg1 : i32
    %c0_i32 = arith.constant 0 : i32
    %c0_i32_0 = arith.constant 0 : i32
    %c0_i32_1 = arith.constant 0 : i32
    return %1, %c0_i32, %c0_i32_0 : i32, i32, i32
  }
}

module attributes {stable_mosaic.version = 11 : i64} {
  func.func @_mm_stats_kernel(%arg0: i32, %arg1: i32, %arg2: memref<1x256x128xbf16, #tpu.memory_space<vmem>>, %arg3: memref<1x128x128xbf16, #tpu.memory_space<vmem>>, %arg4: memref<1x256x128xf32, #tpu.memory_space<vmem>>, %arg5: memref<1x8x128xf32, #tpu.memory_space<vmem>>) attributes {dimension_semantics = [#tpu.dimension_semantics<parallel>, #tpu.dimension_semantics<parallel>], iteration_bounds = array<i64: 4, 2>, scalar_prefetch = 0 : i64, scratch_operands = 0 : i64, tpu.core_type = #tpu.core_type<tc>, window_params = [{transform_indices = @transform_0, window_bounds = array<i64: 1, 256, 128>}, {transform_indices = @transform_1, window_bounds = array<i64: 1, 128, 128>}, {transform_indices = @transform_2, window_bounds = array<i64: 1, 256, 128>}, {transform_indices = @transform_3, window_bounds = array<i64: 1, 8, 128>}]} {
    %c0 = arith.constant 0 : index
    %c0_0 = arith.constant 0 : index
    %c0_1 = arith.constant 0 : index
    %0 = vector.load %arg2[%c0, %c0_0, %c0_1] : memref<1x256x128xbf16, #tpu.memory_space<vmem>>, vector<1x256x128xbf16>
    %1 = vector.shape_cast %0 : vector<1x256x128xbf16> to vector<256x128xbf16>
    %c0_2 = arith.constant 0 : index
    %c0_3 = arith.constant 0 : index
    %c0_4 = arith.constant 0 : index
    %2 = vector.load %arg3[%c0_2, %c0_3, %c0_4] : memref<1x128x128xbf16, #tpu.memory_space<vmem>>, vector<1x128x128xbf16>
    %3 = vector.shape_cast %2 : vector<1x128x128xbf16> to vector<128x128xbf16>
    %cst = arith.constant dense<0.000000e+00> : vector<256x128xf32>
    %4 = tpu.matmul %1, %3, %cst {dimension_numbers = #tpu.dot_dimension_numbers<[1], [0], [0], [1], [0, 0, 1, 1], [], []>} : vector<256x128xbf16>, vector<128x128xbf16>, vector<256x128xf32> -> vector<256x128xf32>
    %c0_5 = arith.constant 0 : index
    %c0_6 = arith.constant 0 : index
    %c0_7 = arith.constant 0 : index
    %5 = vector.load %arg4[%c0_5, %c0_6, %c0_7] : memref<1x256x128xf32, #tpu.memory_space<vmem>>, vector<1x256x128xf32>
    %6 = vector.shape_cast %5 : vector<1x256x128xf32> to vector<256x128xf32>
    %7 = vector.shape_cast %4 : vector<256x128xf32> to vector<1x256x128xf32>
    tpu.vector_store %arg4[%c0_5, %c0_6, %c0_7], %7 {strides = array<i32>} : memref<1x256x128xf32, #tpu.memory_space<vmem>>, vector<1x256x128xf32>,
    %cst_8 = arith.constant dense<0.000000e+00> : vector<128xf32>
    %8 = vector.multi_reduction <add>, %4, %cst_8 [0] : vector<256x128xf32> to vector<128xf32>
    %9 = vector.shape_cast %8 : vector<128xf32> to vector<1x128xf32>
    %10 = arith.mulf %4, %4 : vector<256x128xf32>
    %cst_9 = arith.constant dense<0.000000e+00> : vector<128xf32>
    %11 = vector.multi_reduction <add>, %10, %cst_9 [0] : vector<256x128xf32> to vector<128xf32>
    %12 = vector.shape_cast %11 : vector<128xf32> to vector<1x128xf32>
    %cst_10 = arith.constant 0.000000e+00 : f32
    %13 = vector.broadcast %cst_10 : f32 to vector<6x128xf32>
    %14 = tpu.concatenate %9, %12, %13 in 0 : vector<1x128xf32>, vector<1x128xf32>, vector<6x128xf32> -> vector<8x128xf32>
    %c0_11 = arith.constant 0 : index
    %c0_12 = arith.constant 0 : index
    %c0_13 = arith.constant 0 : index
    %15 = vector.load %arg5[%c0_11, %c0_12, %c0_13] : memref<1x8x128xf32, #tpu.memory_space<vmem>>, vector<1x8x128xf32>
    %16 = vector.shape_cast %15 : vector<1x8x128xf32> to vector<8x128xf32>
    %17 = vector.shape_cast %14 : vector<8x128xf32> to vector<1x8x128xf32>
    tpu.vector_store %arg5[%c0_11, %c0_12, %c0_13], %17 {strides = array<i32>} : memref<1x8x128xf32, #tpu.memory_space<vmem>>, vector<1x8x128xf32>,
    return
  }
  func.func @transform_0(%arg0: i32, %arg1: i32) -> (i32, i32, i32) {
    %c0_i32 = arith.constant 0 : i32
    %c0_i32_0 = arith.constant 0 : i32
    return %arg0, %arg1, %c0_i32 : i32, i32, i32
  }
  func.func @transform_1(%arg0: i32, %arg1: i32) -> (i32, i32, i32) {
    %c0_i32 = arith.constant 0 : i32
    %c0_i32_0 = arith.constant 0 : i32
    %c0_i32_1 = arith.constant 0 : i32
    return %arg0, %c0_i32, %c0_i32_0 : i32, i32, i32
  }
  func.func @transform_2(%arg0: i32, %arg1: i32) -> (i32, i32, i32) {
    %c0_i32 = arith.constant 0 : i32
    %c0_i32_0 = arith.constant 0 : i32
    return %arg0, %arg1, %c0_i32 : i32, i32, i32
  }
  func.func @transform_3(%arg0: i32, %arg1: i32) -> (i32, i32, i32) {
    %c2_i32 = arith.constant 2 : i32
    %0 = arith.muli %arg0, %c2_i32 : i32
    %1 = arith.addi %0, %arg1 : i32
    %c0_i32 = arith.constant 0 : i32
    %c0_i32_0 = arith.constant 0 : i32
    %c0_i32_1 = arith.constant 0 : i32
    return %1, %c0_i32, %c0_i32_0 : i32, i32, i32
  }
}

module attributes {stable_mosaic.version = 11 : i64} {
  func.func @_scale_shift_relu_kernel(%arg0: i32, %arg1: memref<512x128xf32, #tpu.memory_space<vmem>>, %arg2: memref<1x128xf32, #tpu.memory_space<vmem>>, %arg3: memref<1x128xf32, #tpu.memory_space<vmem>>, %arg4: memref<512x128xf32, #tpu.memory_space<vmem>>) attributes {dimension_semantics = [#tpu.dimension_semantics<parallel>], iteration_bounds = array<i64: 4>, scalar_prefetch = 0 : i64, scratch_operands = 0 : i64, tpu.core_type = #tpu.core_type<tc>, window_params = [{transform_indices = @transform_0, window_bounds = array<i64: 512, 128>}, {pipeline_mode = #tpu.pipeline_mode<synchronous>, transform_indices = @transform_1, window_bounds = array<i64: 1, 128>}, {pipeline_mode = #tpu.pipeline_mode<synchronous>, transform_indices = @transform_2, window_bounds = array<i64: 1, 128>}, {transform_indices = @transform_3, window_bounds = array<i64: 512, 128>}]} {
    %c0 = arith.constant 0 : index
    %c0_0 = arith.constant 0 : index
    %0 = vector.load %arg1[%c0, %c0_0] : memref<512x128xf32, #tpu.memory_space<vmem>>, vector<512x128xf32>
    %c0_1 = arith.constant 0 : index
    %c0_2 = arith.constant 0 : index
    %1 = vector.load %arg2[%c0_1, %c0_2] : memref<1x128xf32, #tpu.memory_space<vmem>>, vector<1x128xf32>
    %2 = vector.broadcast %1 : vector<1x128xf32> to vector<512x128xf32>
    %3 = arith.mulf %0, %2 : vector<512x128xf32>
    %c0_3 = arith.constant 0 : index
    %c0_4 = arith.constant 0 : index
    %4 = vector.load %arg3[%c0_3, %c0_4] : memref<1x128xf32, #tpu.memory_space<vmem>>, vector<1x128xf32>
    %5 = vector.broadcast %4 : vector<1x128xf32> to vector<512x128xf32>
    %6 = arith.addf %3, %5 : vector<512x128xf32>
    %cst = arith.constant 0.000000e+00 : f32
    %7 = vector.broadcast %cst : f32 to vector<512x128xf32>
    %8 = arith.maximumf %6, %7 : vector<512x128xf32>
    %c0_5 = arith.constant 0 : index
    %c0_6 = arith.constant 0 : index
    %9 = vector.load %arg4[%c0_5, %c0_6] : memref<512x128xf32, #tpu.memory_space<vmem>>, vector<512x128xf32>
    tpu.vector_store %arg4[%c0_5, %c0_6], %8 {strides = array<i32>} : memref<512x128xf32, #tpu.memory_space<vmem>>, vector<512x128xf32>,
    return
  }
  func.func @transform_0(%arg0: i32) -> (i32, i32) {
    %c0_i32 = arith.constant 0 : i32
    %c0_i32_0 = arith.constant 0 : i32
    return %arg0, %c0_i32 : i32, i32
  }
  func.func @transform_1(%arg0: i32) -> (i32, i32) {
    %c0_i32 = arith.constant 0 : i32
    %c0_i32_0 = arith.constant 0 : i32
    %c0_i32_1 = arith.constant 0 : i32
    return %c0_i32, %c0_i32_0 : i32, i32
  }
  func.func @transform_2(%arg0: i32) -> (i32, i32) {
    %c0_i32 = arith.constant 0 : i32
    %c0_i32_0 = arith.constant 0 : i32
    %c0_i32_1 = arith.constant 0 : i32
    return %c0_i32, %c0_i32_0 : i32, i32
  }
  func.func @transform_3(%arg0: i32) -> (i32, i32) {
    %c0_i32 = arith.constant 0 : i32
    %c0_i32_0 = arith.constant 0 : i32
    return %arg0, %c0_i32 : i32, i32
  }
}

module attributes {stable_mosaic.version = 11 : i64} {
  func.func @_mm_bias_tanh_kernel(%arg0: i32, %arg1: i32, %arg2: memref<1x512x128xbf16, #tpu.memory_space<vmem>>, %arg3: memref<1x128x128xbf16, #tpu.memory_space<vmem>>, %arg4: memref<1x128xf32, #tpu.memory_space<vmem>>, %arg5: memref<1x512x128xf32, #tpu.memory_space<vmem>>) attributes {dimension_semantics = [#tpu.dimension_semantics<parallel>, #tpu.dimension_semantics<parallel>], iteration_bounds = array<i64: 4, 4>, scalar_prefetch = 0 : i64, scratch_operands = 0 : i64, tpu.core_type = #tpu.core_type<tc>, window_params = [{transform_indices = @transform_0, window_bounds = array<i64: 1, 512, 128>}, {transform_indices = @transform_1, window_bounds = array<i64: 1, 128, 128>}, {pipeline_mode = #tpu.pipeline_mode<synchronous>, transform_indices = @transform_2, window_bounds = array<i64: 1, 128>}, {transform_indices = @transform_3, window_bounds = array<i64: 1, 512, 128>}]} {
    %c0 = arith.constant 0 : index
    %c0_0 = arith.constant 0 : index
    %c0_1 = arith.constant 0 : index
    %0 = vector.load %arg2[%c0, %c0_0, %c0_1] : memref<1x512x128xbf16, #tpu.memory_space<vmem>>, vector<1x512x128xbf16>
    %1 = vector.shape_cast %0 : vector<1x512x128xbf16> to vector<512x128xbf16>
    %c0_2 = arith.constant 0 : index
    %c0_3 = arith.constant 0 : index
    %c0_4 = arith.constant 0 : index
    %2 = vector.load %arg3[%c0_2, %c0_3, %c0_4] : memref<1x128x128xbf16, #tpu.memory_space<vmem>>, vector<1x128x128xbf16>
    %3 = vector.shape_cast %2 : vector<1x128x128xbf16> to vector<128x128xbf16>
    %cst = arith.constant dense<0.000000e+00> : vector<512x128xf32>
    %4 = tpu.matmul %1, %3, %cst {dimension_numbers = #tpu.dot_dimension_numbers<[1], [0], [0], [1], [0, 0, 1, 1], [], []>} : vector<512x128xbf16>, vector<128x128xbf16>, vector<512x128xf32> -> vector<512x128xf32>
    %c0_5 = arith.constant 0 : index
    %c0_6 = arith.constant 0 : index
    %5 = vector.load %arg4[%c0_5, %c0_6] : memref<1x128xf32, #tpu.memory_space<vmem>>, vector<1x128xf32>
    %6 = vector.broadcast %5 : vector<1x128xf32> to vector<512x128xf32>
    %7 = arith.addf %4, %6 : vector<512x128xf32>
    %8 = math.tanh %7 : vector<512x128xf32>
    %c0_7 = arith.constant 0 : index
    %c0_8 = arith.constant 0 : index
    %c0_9 = arith.constant 0 : index
    %9 = vector.load %arg5[%c0_7, %c0_8, %c0_9] : memref<1x512x128xf32, #tpu.memory_space<vmem>>, vector<1x512x128xf32>
    %10 = vector.shape_cast %9 : vector<1x512x128xf32> to vector<512x128xf32>
    %11 = vector.shape_cast %8 : vector<512x128xf32> to vector<1x512x128xf32>
    tpu.vector_store %arg5[%c0_7, %c0_8, %c0_9], %11 {strides = array<i32>} : memref<1x512x128xf32, #tpu.memory_space<vmem>>, vector<1x512x128xf32>,
    return
  }
  func.func @transform_0(%arg0: i32, %arg1: i32) -> (i32, i32, i32) {
    %c0_i32 = arith.constant 0 : i32
    %c0_i32_0 = arith.constant 0 : i32
    return %arg0, %arg1, %c0_i32 : i32, i32, i32
  }
  func.func @transform_1(%arg0: i32, %arg1: i32) -> (i32, i32, i32) {
    %c0_i32 = arith.constant 0 : i32
    %c0_i32_0 = arith.constant 0 : i32
    %c0_i32_1 = arith.constant 0 : i32
    return %arg0, %c0_i32, %c0_i32_0 : i32, i32, i32
  }
  func.func @transform_2(%arg0: i32, %arg1: i32) -> (i32, i32) {
    %c0_i32 = arith.constant 0 : i32
    %c0_i32_0 = arith.constant 0 : i32
    %c0_i32_1 = arith.constant 0 : i32
    return %c0_i32, %c0_i32_0 : i32, i32
  }
  func.func @transform_3(%arg0: i32, %arg1: i32) -> (i32, i32, i32) {
    %c0_i32 = arith.constant 0 : i32
    %c0_i32_0 = arith.constant 0 : i32
    return %arg0, %arg1, %c0_i32 : i32, i32, i32
  }
}

</mosaic_0001>

<bundles_post_ra>
// kernel: tile.18
= control target key start
LH: loop header
LB: loop body
LE: loop exit
PB: predicated region body
PF: predicated region fallthrough
CT: control target
= control target key end

     0   :  { %s28_s0 = inlined_call_operand.vmem [shape: f32[64], index: 0, kind: input, shape index: {}]   ;;  %s29_s1 = inlined_call_operand.vmem [shape: f32[16,64], index: 1, kind: output, shape index: {}]  }
   0x1   :  { %v4_v0 = vld [vmem:[%s28_s0] ss:$0 sm:$0xff] }
   0x2   :  { %5 = vst [vmem:[%s29_s1] sm:$0xff] %v4_v0  ;;  %8 = vst [vmem:[%s29_s1 + $0x8] sm:$0xff] %v4_v0 }

// kernel: tile.19
= control target key start
LH: loop header
LB: loop body
LE: loop exit
PB: predicated region body
PF: predicated region fallthrough
CT: control target
= control target key end

     0   :  { %vm3_vm0 = vcmask 523264   ;;  %vm10_vm1 = vcmask 1048064   ;;  %s116_s0 = inlined_call_operand.vmem [shape: f32[16,64], index: 0, kind: input, shape index: {}]   ;;  %s117_s1 = inlined_call_operand.vmem [shape: f32[1,1024], index: 1, kind: output, shape index: {}]  }
   0x1   :  { %v66_v0 = vld [vmem:[%s116_s0 + $0x1] ss:$2 sm:$0xff]   ;;  %v2_v1 = vld [vmem:[%s116_s0] ss:$2 sm:$0xff]   ;;  %s75_s0 = smov 64  }
   0x2   :  { %8 = vrot.lane.b32.xlu0 %v66_v0, %s75_s0  ;;  %4 = vst.msk [vmem:[#allocation0] ss:$8 sm:$0xf] %vm3_vm0, %v2_v1   ;;  %5 = vst.msk [vmem:[#allocation0] ss:$8 sm:$0xf0] %vm3_vm0, %v2_v1  }
  0x74   :  { %v9_v2 = vpop.permute.xlu0 %8  }
  0x75   :  { %11 = vst.msk [vmem:[#allocation0] ss:$8 sm:$0xf] %vm10_vm1, %v9_v2   ;;  %12 = vst.msk [vmem:[#allocation0] ss:$8 sm:$0xf0] %vm10_vm1, %v9_v2  }
  0x7c   :  { %v16_v3 = vld [vmem:[#allocation0] sm:$0x1]  ;;  %v20_v4 = vld [vmem:[#allocation0 + $0x8] sm:$0x1]  ;;  %v25_v5 = vld [vmem:[#allocation0 + $0x10] sm:$0x1] }
  0x7d   :  { %18 = vst [vmem:[%s117_s1] sm:$0x1] %v16_v3  ;;  %67 = vst [vmem:[%s117_s1 + $0x1] sm:$0x1] %v20_v4  ;;  %v31_v6 = vld [vmem:[#allocation0 + $0x18] sm:$0x1] }
  0x7e   :  { %68 = vst [vmem:[%s117_s1 + $0x2] sm:$0x1] %v25_v5  ;;  %v37_v7 = vld [vmem:[#allocation0 + $0x20] sm:$0x1]  ;;  %v43_v8 = vld [vmem:[#allocation0 + $0x28] sm:$0x1] }
  0x7f   :  { %69 = vst [vmem:[%s117_s1 + $0x3] sm:$0x1] %v31_v6  ;;  %70 = vst [vmem:[%s117_s1 + $0x4] sm:$0x1] %v37_v7  ;;  %v49_v9 = vld [vmem:[#allocation0 + $0x30] sm:$0x1] }
  0x80   :  { %71 = vst [vmem:[%s117_s1 + $0x5] sm:$0x1] %v43_v8  ;;  %v55_v10 = vld [vmem:[#allocation0 + $0x38] sm:$0x1]  ;;  %72 = vst [vmem:[%s117_s1 + $0x6] sm:$0x1] %v49_v9 }
  0x81   :  { %73 = vst [vmem:[%s117_s1 + $0x7] sm:$0x1] %v55_v10 }

// kernel: forward.10
= control target key start
LH: loop header
LB: loop body
LE: loop exit
PB: predicated region body
PF: predicated region fallthrough
CT: control target
= control target key end

     0   :  { %v144_v0 = vlaneseq  ;;  %s1824_s1 = inlined_call_operand.vmem [shape: f32[1,1024], index: 1, kind: input, shape index: {}]   ;;  %s1825_s2 = inlined_call_operand.vmem [shape: f32[1,1024], index: 2, kind: input, shape index: {}]   ;;  %s1826_s0 = inlined_call_operand.vmem [shape: f32[128,1024], index: 0, kind: input, shape index: {}]   ;;  %s1827_s3 = inlined_call_operand.vmem [shape: f32[128,1024], index: 3, kind: output, shape index: {}]  }
   0x1   :  { %v142_v2 = vld [vmem:[%s1824_s1] sm:$0xff]  ;;  %v15_v9 = vld [vmem:[%s1826_s0 + $0x8] sm:$0xff]  ;;  %v16_v18 = vld [vmem:[%s1826_s0 + $0x10] sm:$0xff] }
   0x2   :  { %v145_v1 = vshrl.u32 %v144_v0, 7  ;;  %v312_v3 = vld [vmem:[%s1825_s2] sm:$0xff]  ;;  %v17_v19 = vld [vmem:[%s1826_s0 + $0x18] sm:$0xff]  ;;  %v19_v29 = vld [vmem:[%s1826_s0 + $0x28] sm:$0xff] }
   0x3   :  { %v14_v8 = vld [vmem:[%s1826_s0] sm:$0xff]  ;;  %v20_v34 = vld [vmem:[%s1826_s0 + $0x30] sm:$0xff]  ;;  %v21_v48 = vld [vmem:[%s1826_s0 + $0x38] sm:$0xff] }
   0x4   :  { %v146_v4 = vsub.s32 0, %v145_v1  ;;  %v150_v5 = vsub.s32 1, %v145_v1  ;;  %v154_v6 = vsub.s32 2, %v145_v1  ;;  %v158_v7 = vsub.s32 3, %v145_v1  ;;  %v18_v24 = vld [vmem:[%s1826_s0 + $0x20] sm:$0xff]  ;;  %v23_v49 = vld [vmem:[%s1826_s0 + $0x48] sm:$0xff] }
   0x5   :  { %v162_v10 = vsub.s32 4, %v145_v1  ;;  %v166_v11 = vsub.s32 5, %v145_v1  ;;  %v170_v12 = vsub.s32 6, %v145_v1  ;;  %v174_v13 = vsub.s32 7, %v145_v1  ;;  %v22_v43 = vld [vmem:[%s1826_s0 + $0x40] sm:$0xff]  ;;  %v24_v50 = vld [vmem:[%s1826_s0 + $0x50] sm:$0xff] }
   0x6   :  { %v774_v14 = vrot.slane %v142_v2, %v146_v4  ;;  %v776_v15 = vrot.slane %v312_v3, %v146_v4  ;;  %v778_v16 = vrot.slane %v142_v2, %v150_v5  ;;  %v780_v17 = vrot.slane %v312_v3, %v150_v5  ;;  %v25_v55 = vld [vmem:[%s1826_s0 + $0x58] sm:$0xff]  ;;  %v26_v56 = vld [vmem:[%s1826_s0 + $0x60] sm:$0xff]  ;;  %v27_v61 = vld [vmem:[%s1826_s0 + $0x68] sm:$0xff] }
   0x7   :  { %v788_v20 = vrot.slane %v142_v2, %v154_v6  ;;  %v790_v21 = vrot.slane %v312_v3, %v154_v6  ;;  %v792_v22 = vrot.slane %v142_v2, %v158_v7  ;;  %v794_v23 = vrot.slane %v312_v3, %v158_v7 }
   0x8   :  { %v184_v25 = vmul.f32 %v774_v14, %v14_v8  ;;  %v185_v26 = vmul.f32 %v778_v16, %v15_v9  ;;  %v801_v27 = vrot.slane %v142_v2, %v162_v10  ;;  %v803_v28 = vrot.slane %v312_v3, %v162_v10 }
   0x9   :  { %v186_v30 = vmul.f32 %v788_v20, %v16_v18  ;;  %v187_v31 = vmul.f32 %v792_v22, %v17_v19  ;;  %v810_v32 = vrot.slane %v142_v2, %v166_v11  ;;  %v812_v33 = vrot.slane %v312_v3, %v166_v11  ;;  %v29_v11 = vld [vmem:[%s1826_s0 + $0x78] sm:$0xff] }
   0xa   :  { %v354_v35 = vadd.f32 %v776_v15, %v184_v25  ;;  %v355_v36 = vadd.f32 %v780_v17, %v185_v26  ;;  %v188_v37 = vmul.f32 %v801_v27, %v18_v24  ;;  %v820_v38 = vrot.slane %v142_v2, %v170_v12  ;;  %v30_v24 = vld [vmem:[%s1826_s0 + $0x80] sm:$0xff]  ;;  %v31_v25 = vld [vmem:[%s1826_s0 + $0x88] sm:$0xff]  ;;  %v32_v26 = vld [vmem:[%s1826_s0 + $0x90] sm:$0xff] }
   0xb   :  { %v356_v39 = vadd.f32 %v790_v21, %v186_v30  ;;  %v357_v40 = vadd.f32 %v794_v23, %v187_v31  ;;  %v189_v41 = vmul.f32 %v810_v32, %v19_v29  ;;  %v825_v42 = vrot.slane %v312_v3, %v170_v12 }
   0xc   :  { %v482_v44 = vmax.f32 %v354_v35, 0.0  ;;  %v483_v45 = vmax.f32 %v355_v36, 0.0  ;;  %v358_v46 = vadd.f32 %v803_v28, %v188_v37  ;;  %v190_v47 = vmul.f32 %v820_v38, %v20_v34  ;;  %v33_v35 = vld [vmem:[%s1826_s0 + $0x98] sm:$0xff]  ;;  %v34_v36 = vld [vmem:[%s1826_s0 + $0xa0] sm:$0xff] }
   0xd   :  { %v484_v51 = vmax.f32 %v356_v39, 0.0  ;;  %v485_v52 = vmax.f32 %v357_v40, 0.0  ;;  %v359_v53 = vadd.f32 %v812_v33, %v189_v41  ;;  %v842_v54 = vrot.slane %v142_v2, %v174_v13  ;;  %v28_v2 = vld [vmem:[%s1826_s0 + $0x70] sm:$0xff] }
   0xe   :  { %610 = vst [vmem:[%s1827_s3] sm:$0xff] %v482_v44  ;;  %611 = vst [vmem:[%s1827_s3 + $0x8] sm:$0xff] %v483_v45  ;;  %v486_v57 = vmax.f32 %v358_v46, 0.0  ;;  %v360_v58 = vadd.f32 %v825_v42, %v190_v47  ;;  %v857_v59 = vrot.slane %v312_v3, %v174_v13  ;;  %v192_v60 = vmul.f32 %v774_v14, %v22_v43  ;;  %v35_v43 = vld [vmem:[%s1826_s0 + $0xa8] sm:$0xff] }
   0xf   :  { %612 = vst [vmem:[%s1827_s3 + $0x10] sm:$0xff] %v484_v51  ;;  %613 = vst [vmem:[%s1827_s3 + $0x18] sm:$0xff] %v485_v52  ;;  %v487_v62 = vmax.f32 %v359_v53, 0.0  ;;  %v191_v63 = vmul.f32 %v842_v54, %v21_v48  ;;  %v193_v0 = vmul.f32 %v778_v16, %v23_v49  ;;  %v194_v1 = vmul.f32 %v788_v20, %v24_v50  ;;  %v36_v48 = vld [vmem:[%s1826_s0 + $0xb0] sm:$0xff] }
  0x10   :  { %614 = vst [vmem:[%s1827_s3 + $0x20] sm:$0xff] %v486_v57  ;;  %v488_v3 = vmax.f32 %v360_v58, 0.0  ;;  %v362_v4 = vadd.f32 %v776_v15, %v192_v60  ;;  %v195_v5 = vmul.f32 %v792_v22, %v25_v55  ;;  %v196_v6 = vmul.f32 %v801_v27, %v26_v56  ;;  %v37_v58 = vld [vmem:[%s1826_s0 + $0xb8] sm:$0xff] }
  0x11   :  { %615 = vst [vmem:[%s1827_s3 + $0x28] sm:$0xff] %v487_v62  ;;  %v361_v7 = vadd.f32 %v857_v59, %v191_v63  ;;  %v363_v8 = vadd.f32 %v780_v17, %v193_v0  ;;  %v364_v9 = vadd.f32 %v790_v21, %v194_v1  ;;  %v197_v10 = vmul.f32 %v810_v32, %v27_v61  ;;  %v38_v0 = vld [vmem:[%s1826_s0 + $0xc0] sm:$0xff]  ;;  %v39_v1 = vld [vmem:[%s1826_s0 + $0xc8] sm:$0xff] }
  0x12   :  { %616 = vst [vmem:[%s1827_s3 + $0x30] sm:$0xff] %v488_v3  ;;  %v490_v12 = vmax.f32 %v362_v4, 0.0  ;;  %v365_v13 = vadd.f32 %v794_v23, %v195_v5  ;;  %v366_v18 = vadd.f32 %v803_v28, %v196_v6  ;;  %v198_v19 = vmul.f32 %v820_v38, %v28_v2  ;;  %v40_v2 = vld [vmem:[%s1826_s0 + $0xd0] sm:$0xff] }
  0x13   :  { %v489_v29 = vmax.f32 %v361_v7, 0.0  ;;  %v491_v30 = vmax.f32 %v363_v8, 0.0  ;;  %v492_v31 = vmax.f32 %v364_v9, 0.0  ;;  %v367_v34 = vadd.f32 %v812_v33, %v197_v10  ;;  %v41_v7 = vld [vmem:[%s1826_s0 + $0xd8] sm:$0xff]  ;;  %v42_v8 = vld [vmem:[%s1826_s0 + $0xe0] sm:$0xff] }
  0x14   :  { %618 = vst [vmem:[%s1827_s3 + $0x40] sm:$0xff] %v490_v12  ;;  %v493_v37 = vmax.f32 %v365_v13, 0.0  ;;  %v494_v39 = vmax.f32 %v366_v18, 0.0  ;;  %v368_v40 = vadd.f32 %v825_v42, %v198_v19  ;;  %v199_v41 = vmul.f32 %v842_v54, %v29_v11  ;;  %v43_v13 = vld [vmem:[%s1826_s0 + $0xe8] sm:$0xff] }
  0x15   :  { %617 = vst [vmem:[%s1827_s3 + $0x38] sm:$0xff] %v489_v29  ;;  %619 = vst [vmem:[%s1827_s3 + $0x48] sm:$0xff] %v491_v30  ;;  %v495_v44 = vmax.f32 %v367_v34, 0.0  ;;  %v200_v45 = vmul.f32 %v774_v14, %v30_v24  ;;  %v201_v46 = vmul.f32 %v778_v16, %v31_v25  ;;  %v202_v47 = vmul.f32 %v788_v20, %v32_v26  ;;  %v44_v26 = vld [vmem:[%s1826_s0 + $0xf0] sm:$0xff] }
  0x16   :  { %620 = vst [vmem:[%s1827_s3 + $0x50] sm:$0xff] %v492_v31  ;;  %621 = vst [vmem:[%s1827_s3 + $0x58] sm:$0xff] %v493_v37  ;;  %v496_v49 = vmax.f32 %v368_v40, 0.0  ;;  %v369_v50 = vadd.f32 %v857_v59, %v199_v41  ;;  %v203_v51 = vmul.f32 %v792_v22, %v33_v35  ;;  %v204_v52 = vmul.f32 %v801_v27, %v34_v36  ;;  %v45_v40 = vld [vmem:[%s1826_s0 + $0xf8] sm:$0xff] }
  0x17   :  { %622 = vst [vmem:[%s1827_s3 + $0x60] sm:$0xff] %v494_v39  ;;  %623 = vst [vmem:[%s1827_s3 + $0x68] sm:$0xff] %v495_v44  ;;  %v370_v53 = vadd.f32 %v776_v15, %v200_v45  ;;  %v371_v55 = vadd.f32 %v780_v17, %v201_v46  ;;  %v372_v56 = vadd.f32 %v790_v21, %v202_v47  ;;  %v46_v46 = vld [vmem:[%s1826_s0 + $0x100] sm:$0xff]  ;;  %v47_v47 = vld [vmem:[%s1826_s0 + $0x108] sm:$0xff] }
  0x18   :  { %v205_v57 = vmul.f32 %v810_v32, %v35_v43  ;;  %624 = vst [vmem:[%s1827_s3 + $0x70] sm:$0xff] %v496_v49  ;;  %v497_v60 = vmax.f32 %v369_v50, 0.0  ;;  %v373_v61 = vadd.f32 %v794_v23, %v203_v51  ;;  %v374_v62 = vadd.f32 %v803_v28, %v204_v52 }
  0x19   :  { %v206_v63 = vmul.f32 %v820_v38, %v36_v48  ;;  %v498_v3 = vmax.f32 %v370_v53, 0.0  ;;  %v499_v4 = vmax.f32 %v371_v55, 0.0  ;;  %v500_v5 = vmax.f32 %v372_v56, 0.0  ;;  %v48_v48 = vld [vmem:[%s1826_s0 + $0x110] sm:$0xff]  ;;  %v49_v53 = vld [vmem:[%s1826_s0 + $0x118] sm:$0xff]  ;;  %v50_v55 = vld [vmem:[%s1826_s0 + $0x120] sm:$0xff] }
  0x1a   :  { %v375_v6 = vadd.f32 %v812_v33, %v205_v57  ;;  %625 = vst [vmem:[%s1827_s3 + $0x78] sm:$0xff] %v497_v60  ;;  %v501_v9 = vmax.f32 %v373_v61, 0.0  ;;  %v502_v10 = vmax.f32 %v374_v62, 0.0  ;;  %v207_v12 = vmul.f32 %v842_v54, %v37_v58  ;;  %v51_v61 = vld [vmem:[%s1826_s0 + $0x128] sm:$0xff] }
  0x1b   :  { %v376_v11 = vadd.f32 %v825_v42, %v206_v63  ;;  %626 = vst [vmem:[%s1827_s3 + $0x80] sm:$0xff] %v498_v3  ;;  %627 = vst [vmem:[%s1827_s3 + $0x88] sm:$0xff] %v499_v4  ;;  %v208_v19 = vmul.f32 %v774_v14, %v38_v0  ;;  %v209_v24 = vmul.f32 %v778_v16, %v39_v1 }
  0x1c   :  { %628 = vst [vmem:[%s1827_s3 + $0x90] sm:$0xff] %v500_v5  ;;  %v503_v18 = vmax.f32 %v375_v6, 0.0  ;;  %v210_v25 = vmul.f32 %v788_v20, %v40_v2  ;;  %629 = vst [vmem:[%s1827_s3 + $0x98] sm:$0xff] %v501_v9  ;;  %v377_v30 = vadd.f32 %v857_v59, %v207_v12  ;;  %v211_v31 = vmul.f32 %v792_v22, %v41_v7  ;;  %v52_v2 = vld [vmem:[%s1826_s0 + $0x130] sm:$0xff] }
  0x1d   :  { %630 = vst [vmem:[%s1827_s3 + $0xa0] sm:$0xff] %v502_v10  ;;  %v504_v29 = vmax.f32 %v376_v11, 0.0  ;;  %v212_v34 = vmul.f32 %v801_v27, %v42_v8  ;;  %v378_v35 = vadd.f32 %v776_v15, %v208_v19  ;;  %v379_v36 = vadd.f32 %v780_v17, %v209_v24  ;;  %v53_v11 = vld [vmem:[%s1826_s0 + $0x138] sm:$0xff]  ;;  %v54_v24 = vld [vmem:[%s1826_s0 + $0x140] sm:$0xff] }
  0x1e   :  { %631 = vst [vmem:[%s1827_s3 + $0xa8] sm:$0xff] %v503_v18  ;;  %v380_v37 = vadd.f32 %v790_v21, %v210_v25  ;;  %v213_v39 = vmul.f32 %v810_v32, %v43_v13  ;;  %v505_v41 = vmax.f32 %v377_v30, 0.0  ;;  %v381_v43 = vadd.f32 %v794_v23, %v211_v31  ;;  %v55_v25 = vld [vmem:[%s1826_s0 + $0x148] sm:$0xff] }
  0x1f   :  { %632 = vst [vmem:[%s1827_s3 + $0xb0] sm:$0xff] %v504_v29  ;;  %v382_v44 = vadd.f32 %v803_v28, %v212_v34  ;;  %v214_v45 = vmul.f32 %v820_v38, %v44_v26  ;;  %v506_v49 = vmax.f32 %v378_v35, 0.0  ;;  %v507_v50 = vmax.f32 %v379_v36, 0.0  ;;  %v56_v26 = vld [vmem:[%s1826_s0 + $0x150] sm:$0xff]  ;;  %v57_v35 = vld [vmem:[%s1826_s0 + $0x158] sm:$0xff]  ;;  %v58_v36 = vld [vmem:[%s1826_s0 + $0x160] sm:$0xff] }
  0x20   :  { %v508_v51 = vmax.f32 %v380_v37, 0.0  ;;  %v383_v52 = vadd.f32 %v812_v33, %v213_v39  ;;  %633 = vst [vmem:[%s1827_s3 + $0xb8] sm:$0xff] %v505_v41  ;;  %v509_v56 = vmax.f32 %v381_v43, 0.0  ;;  %v215_v60 = vmul.f32 %v842_v54, %v45_v40  ;;  %v59_v43 = vld [vmem:[%s1826_s0 + $0x168] sm:$0xff] }
  0x21   :  { %v510_v57 = vmax.f32 %v382_v44, 0.0  ;;  %v384_v58 = vadd.f32 %v825_v42, %v214_v45  ;;  %634 = vst [vmem:[%s1827_s3 + $0xc0] sm:$0xff] %v506_v49  ;;  %635 = vst [vmem:[%s1827_s3 + $0xc8] sm:$0xff] %v507_v50  ;;  %v216_v63 = vmul.f32 %v774_v14, %v46_v46  ;;  %v217_v0 = vmul.f32 %v778_v16, %v47_v47 }
  0x22   :  { %636 = vst [vmem:[%s1827_s3 + $0xd0] sm:$0xff] %v508_v51  ;;  %v511_v62 = vmax.f32 %v383_v52, 0.0  ;;  %v218_v1 = vmul.f32 %v788_v20, %v48_v48  ;;  %637 = vst [vmem:[%s1827_s3 + $0xd8] sm:$0xff] %v509_v56  ;;  %v385_v4 = vadd.f32 %v857_v59, %v215_v60  ;;  %v219_v5 = vmul.f32 %v792_v22, %v49_v53  ;;  %v60_v48 = vld [vmem:[%s1826_s0 + $0x170] sm:$0xff] }
  0x23   :  { %638 = vst [vmem:[%s1827_s3 + $0xe0] sm:$0xff] %v510_v57  ;;  %v512_v3 = vmax.f32 %v384_v58, 0.0  ;;  %v220_v6 = vmul.f32 %v801_v27, %v50_v55  ;;  %v386_v7 = vadd.f32 %v776_v15, %v216_v63  ;;  %v387_v8 = vadd.f32 %v780_v17, %v217_v0  ;;  %v61_v58 = vld [vmem:[%s1826_s0 + $0x178] sm:$0xff]  ;;  %v62_v0 = vld [vmem:[%s1826_s0 + $0x180] sm:$0xff] }
  0x24   :  { %639 = vst [vmem:[%s1827_s3 + $0xe8] sm:$0xff] %v511_v62  ;;  %v388_v9 = vadd.f32 %v790_v21, %v218_v1  ;;  %v221_v10 = vmul.f32 %v810_v32, %v51_v61  ;;  %v513_v12 = vmax.f32 %v385_v4, 0.0  ;;  %v389_v13 = vadd.f32 %v794_v23, %v219_v5  ;;  %v63_v1 = vld [vmem:[%s1826_s0 + $0x188] sm:$0xff] }
  0x25   :  { %640 = vst [vmem:[%s1827_s3 + $0xf0] sm:$0xff] %v512_v3  ;;  %v390_v18 = vadd.f32 %v803_v28, %v220_v6  ;;  %v222_v19 = vmul.f32 %v820_v38, %v52_v2  ;;  %v514_v29 = vmax.f32 %v386_v7, 0.0  ;;  %v515_v30 = vmax.f32 %v387_v8, 0.0  ;;  %v64_v2 = vld [vmem:[%s1826_s0 + $0x190] sm:$0xff]  ;;  %v65_v7 = vld [vmem:[%s1826_s0 + $0x198] sm:$0xff]  ;;  %v66_v8 = vld [vmem:[%s1826_s0 + $0x1a0] sm:$0xff] }
  0x26   :  { %v516_v31 = vmax.f32 %v388_v9, 0.0  ;;  %v391_v34 = vadd.f32 %v812_v33, %v221_v10  ;;  %641 = vst [vmem:[%s1827_s3 + $0xf8] sm:$0xff] %v513_v12  ;;  %v517_v37 = vmax.f32 %v389_v13, 0.0  ;;  %v223_v41 = vmul.f32 %v842_v54, %v53_v11  ;;  %v67_v13 = vld [vmem:[%s1826_s0 + $0x1a8] sm:$0xff] }
  0x27   :  { %v518_v39 = vmax.f32 %v390_v18, 0.0  ;;  %v392_v40 = vadd.f32 %v825_v42, %v222_v19  ;;  %642 = vst [vmem:[%s1827_s3 + $0x100] sm:$0xff] %v514_v29  ;;  %643 = vst [vmem:[%s1827_s3 + $0x108] sm:$0xff] %v515_v30  ;;  %v224_v45 = vmul.f32 %v774_v14, %v54_v24  ;;  %v225_v46 = vmul.f32 %v778_v16, %v55_v25 }
  0x28   :  { %644 = vst [vmem:[%s1827_s3 + $0x110] sm:$0xff] %v516_v31  ;;  %v519_v44 = vmax.f32 %v391_v34, 0.0  ;;  %v226_v47 = vmul.f32 %v788_v20, %v56_v26  ;;  %645 = vst [vmem:[%s1827_s3 + $0x118] sm:$0xff] %v517_v37  ;;  %v393_v50 = vadd.f32 %v857_v59, %v223_v41  ;;  %v227_v51 = vmul.f32 %v792_v22, %v57_v35  ;;  %v68_v26 = vld [vmem:[%s1826_s0 + $0x1b0] sm:$0xff] }
  0x29   :  { %646 = vst [vmem:[%s1827_s3 + $0x120] sm:$0xff] %v518_v39  ;;  %v520_v49 = vmax.f32 %v392_v40, 0.0  ;;  %v228_v52 = vmul.f32 %v801_v27, %v58_v36  ;;  %v394_v53 = vadd.f32 %v776_v15, %v224_v45  ;;  %v395_v55 = vadd.f32 %v780_v17, %v225_v46  ;;  %v69_v40 = vld [vmem:[%s1826_s0 + $0x1b8] sm:$0xff]  ;;  %v70_v46 = vld [vmem:[%s1826_s0 + $0x1c0] sm:$0xff] }
  0x2a   :  { %647 = vst [vmem:[%s1827_s3 + $0x128] sm:$0xff] %v519_v44  ;;  %v396_v56 = vadd.f32 %v790_v21, %v226_v47  ;;  %v229_v57 = vmul.f32 %v810_v32, %v59_v43  ;;  %v521_v60 = vmax.f32 %v393_v50, 0.0  ;;  %v397_v61 = vadd.f32 %v794_v23, %v227_v51  ;;  %v71_v47 = vld [vmem:[%s1826_s0 + $0x1c8] sm:$0xff] }
  0x2b   :  { %648 = vst [vmem:[%s1827_s3 + $0x130] sm:$0xff] %v520_v49  ;;  %v398_v62 = vadd.f32 %v803_v28, %v228_v52  ;;  %v230_v63 = vmul.f32 %v820_v38, %v60_v48  ;;  %v522_v3 = vmax.f32 %v394_v53, 0.0  ;;  %v523_v4 = vmax.f32 %v395_v55, 0.0  ;;  %v72_v48 = vld [vmem:[%s1826_s0 + $0x1d0] sm:$0xff]  ;;  %v73_v53 = vld [vmem:[%s1826_s0 + $0x1d8] sm:$0xff]  ;;  %v74_v55 = vld [vmem:[%s1826_s0 + $0x1e0] sm:$0xff] }
  0x2c   :  { %v524_v5 = vmax.f32 %v396_v56, 0.0  ;;  %v399_v6 = vadd.f32 %v812_v33, %v229_v57  ;;  %649 = vst [vmem:[%s1827_s3 + $0x138] sm:$0xff] %v521_v60  ;;  %v525_v9 = vmax.f32 %v397_v61, 0.0  ;;  %v231_v12 = vmul.f32 %v842_v54, %v61_v58  ;;  %v75_v61 = vld [vmem:[%s1826_s0 + $0x1e8] sm:$0xff] }
  0x2d   :  { %v526_v10 = vmax.f32 %v398_v62, 0.0  ;;  %v400_v11 = vadd.f32 %v825_v42, %v230_v63  ;;  %650 = vst [vmem:[%s1827_s3 + $0x140] sm:$0xff] %v522_v3  ;;  %651 = vst [vmem:[%s1827_s3 + $0x148] sm:$0xff] %v523_v4  ;;  %v232_v19 = vmul.f32 %v774_v14, %v62_v0  ;;  %v233_v24 = vmul.f32 %v778_v16, %v63_v1 }
  0x2e   :  { %652 = vst [vmem:[%s1827_s3 + $0x150] sm:$0xff] %v524_v5  ;;  %v527_v18 = vmax.f32 %v399_v6, 0.0  ;;  %v234_v25 = vmul.f32 %v788_v20, %v64_v2  ;;  %653 = vst [vmem:[%s1827_s3 + $0x158] sm:$0xff] %v525_v9  ;;  %v401_v30 = vadd.f32 %v857_v59, %v231_v12  ;;  %v235_v31 = vmul.f32 %v792_v22, %v65_v7  ;;  %v76_v2 = vld [vmem:[%s1826_s0 + $0x1f0] sm:$0xff] }
  0x2f   :  { %654 = vst [vmem:[%s1827_s3 + $0x160] sm:$0xff] %v526_v10  ;;  %v528_v29 = vmax.f32 %v400_v11, 0.0  ;;  %v236_v34 = vmul.f32 %v801_v27, %v66_v8  ;;  %v402_v35 = vadd.f32 %v776_v15, %v232_v19  ;;  %v403_v36 = vadd.f32 %v780_v17, %v233_v24  ;;  %v77_v11 = vld [vmem:[%s1826_s0 + $0x1f8] sm:$0xff]  ;;  %v78_v24 = vld [vmem:[%s1826_s0 + $0x200] sm:$0xff] }
  0x30   :  { %655 = vst [vmem:[%s1827_s3 + $0x168] sm:$0xff] %v527_v18  ;;  %v404_v37 = vadd.f32 %v790_v21, %v234_v25  ;;  %v237_v39 = vmul.f32 %v810_v32, %v67_v13  ;;  %v529_v41 = vmax.f32 %v401_v30, 0.0  ;;  %v405_v43 = vadd.f32 %v794_v23, %v235_v31  ;;  %v79_v25 = vld [vmem:[%s1826_s0 + $0x208] sm:$0xff] }
  0x31   :  { %656 = vst [vmem:[%s1827_s3 + $0x170] sm:$0xff] %v528_v29  ;;  %v406_v44 = vadd.f32 %v803_v28, %v236_v34  ;;  %v238_v45 = vmul.f32 %v820_v38, %v68_v26  ;;  %v530_v49 = vmax.f32 %v402_v35, 0.0  ;;  %v531_v50 = vmax.f32 %v403_v36, 0.0  ;;  %v80_v26 = vld [vmem:[%s1826_s0 + $0x210] sm:$0xff]  ;;  %v81_v35 = vld [vmem:[%s1826_s0 + $0x218] sm:$0xff]  ;;  %v82_v36 = vld [vmem:[%s1826_s0 + $0x220] sm:$0xff] }
  0x32   :  { %v532_v51 = vmax.f32 %v404_v37, 0.0  ;;  %v407_v52 = vadd.f32 %v812_v33, %v237_v39  ;;  %657 = vst [vmem:[%s1827_s3 + $0x178] sm:$0xff] %v529_v41  ;;  %v533_v56 = vmax.f32 %v405_v43, 0.0  ;;  %v239_v60 = vmul.f32 %v842_v54, %v69_v40  ;;  %v83_v43 = vld [vmem:[%s1826_s0 + $0x228] sm:$0xff] }
  0x33   :  { %v534_v57 = vmax.f32 %v406_v44, 0.0  ;;  %v408_v58 = vadd.f32 %v825_v42, %v238_v45  ;;  %658 = vst [vmem:[%s1827_s3 + $0x180] sm:$0xff] %v530_v49  ;;  %659 = vst [vmem:[%s1827_s3 + $0x188] sm:$0xff] %v531_v50  ;;  %v240_v63 = vmul.f32 %v774_v14, %v70_v46  ;;  %v241_v0 = vmul.f32 %v778_v16, %v71_v47 }
  0x34   :  { %660 = vst [vmem:[%s1827_s3 + $0x190] sm:$0xff] %v532_v51  ;;  %v535_v62 = vmax.f32 %v407_v52, 0.0  ;;  %v242_v1 = vmul.f32 %v788_v20, %v72_v48  ;;  %661 = vst [vmem:[%s1827_s3 + $0x198] sm:$0xff] %v533_v56  ;;  %v409_v4 = vadd.f32 %v857_v59, %v239_v60  ;;  %v243_v5 = vmul.f32 %v792_v22, %v73_v53  ;;  %v84_v48 = vld [vmem:[%s1826_s0 + $0x230] sm:$0xff] }
  0x35   :  { %662 = vst [vmem:[%s1827_s3 + $0x1a0] sm:$0xff] %v534_v57  ;;  %v536_v3 = vmax.f32 %v408_v58, 0.0  ;;  %v244_v6 = vmul.f32 %v801_v27, %v74_v55  ;;  %v410_v7 = vadd.f32 %v776_v15, %v240_v63  ;;  %v411_v8 = vadd.f32 %v780_v17, %v241_v0  ;;  %v85_v58 = vld [vmem:[%s1826_s0 + $0x238] sm:$0xff]  ;;  %v86_v0 = vld [vmem:[%s1826_s0 + $0x240] sm:$0xff] }
  0x36   :  { %663 = vst [vmem:[%s1827_s3 + $0x1a8] sm:$0xff] %v535_v62  ;;  %v412_v9 = vadd.f32 %v790_v21, %v242_v1  ;;  %v245_v10 = vmul.f32 %v810_v32, %v75_v61  ;;  %v537_v12 = vmax.f32 %v409_v4, 0.0  ;;  %v413_v13 = vadd.f32 %v794_v23, %v243_v5  ;;  %v87_v1 = vld [vmem:[%s1826_s0 + $0x248] sm:$0xff] }
  0x37   :  { %664 = vst [vmem:[%s1827_s3 + $0x1b0] sm:$0xff] %v536_v3  ;;  %v414_v18 = vadd.f32 %v803_v28, %v244_v6  ;;  %v246_v19 = vmul.f32 %v820_v38, %v76_v2  ;;  %v538_v29 = vmax.f32 %v410_v7, 0.0  ;;  %v539_v30 = vmax.f32 %v411_v8, 0.0  ;;  %v88_v2 = vld [vmem:[%s1826_s0 + $0x250] sm:$0xff]  ;;  %v89_v7 = vld [vmem:[%s1826_s0 + $0x258] sm:$0xff]  ;;  %v90_v8 = vld [vmem:[%s1826_s0 + $0x260] sm:$0xff] }
  0x38   :  { %v540_v31 = vmax.f32 %v412_v9, 0.0  ;;  %v415_v34 = vadd.f32 %v812_v33, %v245_v10  ;;  %665 = vst [vmem:[%s1827_s3 + $0x1b8] sm:$0xff] %v537_v12  ;;  %v541_v37 = vmax.f32 %v413_v13, 0.0  ;;  %v247_v41 = vmul.f32 %v842_v54, %v77_v11  ;;  %v91_v13 = vld [vmem:[%s1826_s0 + $0x268] sm:$0xff] }
  0x39   :  { %v542_v39 = vmax.f32 %v414_v18, 0.0  ;;  %v416_v40 = vadd.f32 %v825_v42, %v246_v19  ;;  %666 = vst [vmem:[%s1827_s3 + $0x1c0] sm:$0xff] %v538_v29  ;;  %667 = vst [vmem:[%s1827_s3 + $0x1c8] sm:$0xff] %v539_v30  ;;  %v248_v45 = vmul.f32 %v774_v14, %v78_v24  ;;  %v249_v46 = vmul.f32 %v778_v16, %v79_v25 }
  0x3a   :  { %668 = vst [vmem:[%s1827_s3 + $0x1d0] sm:$0xff] %v540_v31  ;;  %v543_v44 = vmax.f32 %v415_v34, 0.0  ;;  %v250_v47 = vmul.f32 %v788_v20, %v80_v26  ;;  %669 = vst [vmem:[%s1827_s3 + $0x1d8] sm:$0xff] %v541_v37  ;;  %v417_v50 = vadd.f32 %v857_v59, %v247_v41  ;;  %v251_v51 = vmul.f32 %v792_v22, %v81_v35  ;;  %v92_v26 = vld [vmem:[%s1826_s0 + $0x270] sm:$0xff] }
  0x3b   :  { %670 = vst [vmem:[%s1827_s3 + $0x1e0] sm:$0xff] %v542_v39  ;;  %v544_v49 = vmax.f32 %v416_v40, 0.0  ;;  %v252_v52 = vmul.f32 %v801_v27, %v82_v36  ;;  %v418_v53 = vadd.f32 %v776_v15, %v248_v45  ;;  %v419_v55 = vadd.f32 %v780_v17, %v249_v46  ;;  %v93_v40 = vld [vmem:[%s1826_s0 + $0x278] sm:$0xff]  ;;  %v94_v46 = vld [vmem:[%s1826_s0 + $0x280] sm:$0xff] }
  0x3c   :  { %671 = vst [vmem:[%s1827_s3 + $0x1e8] sm:$0xff] %v543_v44  ;;  %v420_v56 = vadd.f32 %v790_v21, %v250_v47  ;;  %v253_v57 = vmul.f32 %v810_v32, %v83_v43  ;;  %v545_v60 = vmax.f32 %v417_v50, 0.0  ;;  %v421_v61 = vadd.f32 %v794_v23, %v251_v51  ;;  %v95_v47 = vld [vmem:[%s1826_s0 + $0x288] sm:$0xff] }
  0x3d   :  { %672 = vst [vmem:[%s1827_s3 + $0x1f0] sm:$0xff] %v544_v49  ;;  %v422_v62 = vadd.f32 %v803_v28, %v252_v52  ;;  %v254_v63 = vmul.f32 %v820_v38, %v84_v48  ;;  %v546_v3 = vmax.f32 %v418_v53, 0.0  ;;  %v547_v4 = vmax.f32 %v419_v55, 0.0  ;;  %v96_v48 = vld [vmem:[%s1826_s0 + $0x290] sm:$0xff]  ;;  %v97_v53 = vld [vmem:[%s1826_s0 + $0x298] sm:$0xff]  ;;  %v98_v55 = vld [vmem:[%s1826_s0 + $0x2a0] sm:$0xff] }
  0x3e   :  { %v548_v5 = vmax.f32 %v420_v56, 0.0  ;;  %v423_v6 = vadd.f32 %v812_v33, %v253_v57  ;;  %673 = vst [vmem:[%s1827_s3 + $0x1f8] sm:$0xff] %v545_v60  ;;  %v549_v9 = vmax.f32 %v421_v61, 0.0  ;;  %v255_v12 = vmul.f32 %v842_v54, %v85_v58  ;;  %v99_v61 = vld [vmem:[%s1826_s0 + $0x2a8] sm:$0xff] }
  0x3f   :  { %v550_v10 = vmax.f32 %v422_v62, 0.0  ;;  %v424_v11 = vadd.f32 %v825_v42, %v254_v63  ;;  %674 = vst [vmem:[%s1827_s3 + $0x200] sm:$0xff] %v546_v3  ;;  %675 = vst [vmem:[%s1827_s3 + $0x208] sm:$0xff] %v547_v4  ;;  %v256_v19 = vmul.f32 %v774_v14, %v86_v0  ;;  %v257_v24 = vmul.f32 %v778_v16, %v87_v1 }
  0x40   :  { %676 = vst [vmem:[%s1827_s3 + $0x210] sm:$0xff] %v548_v5  ;;  %v551_v18 = vmax.f32 %v423_v6, 0.0  ;;  %v258_v25 = vmul.f32 %v788_v20, %v88_v2  ;;  %677 = vst [vmem:[%s1827_s3 + $0x218] sm:$0xff] %v549_v9  ;;  %v425_v30 = vadd.f32 %v857_v59, %v255_v12  ;;  %v259_v31 = vmul.f32 %v792_v22, %v89_v7  ;;  %v100_v2 = vld [vmem:[%s1826_s0 + $0x2b0] sm:$0xff] }
  0x41   :  { %678 = vst [vmem:[%s1827_s3 + $0x220] sm:$0xff] %v550_v10  ;;  %v552_v29 = vmax.f32 %v424_v11, 0.0  ;;  %v260_v34 = vmul.f32 %v801_v27, %v90_v8  ;;  %v426_v35 = vadd.f32 %v776_v15, %v256_v19  ;;  %v427_v36 = vadd.f32 %v780_v17, %v257_v24  ;;  %v101_v11 = vld [vmem:[%s1826_s0 + $0x2b8] sm:$0xff]  ;;  %v102_v24 = vld [vmem:[%s1826_s0 + $0x2c0] sm:$0xff] }
  0x42   :  { %679 = vst [vmem:[%s1827_s3 + $0x228] sm:$0xff] %v551_v18  ;;  %v428_v37 = vadd.f32 %v790_v21, %v258_v25  ;;  %v261_v39 = vmul.f32 %v810_v32, %v91_v13  ;;  %v553_v41 = vmax.f32 %v425_v30, 0.0  ;;  %v429_v43 = vadd.f32 %v794_v23, %v259_v31  ;;  %v103_v25 = vld [vmem:[%s1826_s0 + $0x2c8] sm:$0xff] }
  0x43   :  { %680 = vst [vmem:[%s1827_s3 + $0x230] sm:$0xff] %v552_v29  ;;  %v430_v44 = vadd.f32 %v803_v28, %v260_v34  ;;  %v262_v45 = vmul.f32 %v820_v38, %v92_v26  ;;  %v554_v49 = vmax.f32 %v426_v35, 0.0  ;;  %v555_v50 = vmax.f32 %v427_v36, 0.0  ;;  %v104_v26 = vld [vmem:[%s1826_s0 + $0x2d0] sm:$0xff]  ;;  %v105_v35 = vld [vmem:[%s1826_s0 + $0x2d8] sm:$0xff]  ;;  %v106_v36 = vld [vmem:[%s1826_s0 + $0x2e0] sm:$0xff] }
  0x44   :  { %v556_v51 = vmax.f32 %v428_v37, 0.0  ;;  %v431_v52 = vadd.f32 %v812_v33, %v261_v39  ;;  %681 = vst [vmem:[%s1827_s3 + $0x238] sm:$0xff] %v553_v41  ;;  %v557_v56 = vmax.f32 %v429_v43, 0.0  ;;  %v263_v60 = vmul.f32 %v842_v54, %v93_v40  ;;  %v107_v43 = vld [vmem:[%s1826_s0 + $0x2e8] sm:$0xff] }
  0x45   :  { %v558_v57 = vmax.f32 %v430_v44, 0.0  ;;  %v432_v58 = vadd.f32 %v825_v42, %v262_v45  ;;  %682 = vst [vmem:[%s1827_s3 + $0x240] sm:$0xff] %v554_v49  ;;  %683 = vst [vmem:[%s1827_s3 + $0x248] sm:$0xff] %v555_v50  ;;  %v264_v63 = vmul.f32 %v774_v14, %v94_v46  ;;  %v265_v0 = vmul.f32 %v778_v16, %v95_v47 }
  0x46   :  { %684 = vst [vmem:[%s1827_s3 + $0x250] sm:$0xff] %v556_v51  ;;  %v559_v62 = vmax.f32 %v431_v52, 0.0  ;;  %v266_v1 = vmul.f32 %v788_v20, %v96_v48  ;;  %685 = vst [vmem:[%s1827_s3 + $0x258] sm:$0xff] %v557_v56  ;;  %v433_v4 = vadd.f32 %v857_v59, %v263_v60  ;;  %v267_v5 = vmul.f32 %v792_v22, %v97_v53  ;;  %v108_v48 = vld [vmem:[%s1826_s0 + $0x2f0] sm:$0xff] }
  0x47   :  { %686 = vst [vmem:[%s1827_s3 + $0x260] sm:$0xff] %v558_v57  ;;  %v560_v3 = vmax.f32 %v432_v58, 0.0  ;;  %v268_v6 = vmul.f32 %v801_v27, %v98_v55  ;;  %v434_v7 = vadd.f32 %v776_v15, %v264_v63  ;;  %v435_v8 = vadd.f32 %v780_v17, %v265_v0  ;;  %v109_v58 = vld [vmem:[%s1826_s0 + $0x2f8] sm:$0xff]  ;;  %v110_v0 = vld [vmem:[%s1826_s0 + $0x300] sm:$0xff] }
  0x48   :  { %687 = vst [vmem:[%s1827_s3 + $0x268] sm:$0xff] %v559_v62  ;;  %v436_v9 = vadd.f32 %v790_v21, %v266_v1  ;;  %v269_v10 = vmul.f32 %v810_v32, %v99_v61  ;;  %v561_v12 = vmax.f32 %v433_v4, 0.0  ;;  %v437_v13 = vadd.f32 %v794_v23, %v267_v5  ;;  %v111_v1 = vld [vmem:[%s1826_s0 + $0x308] sm:$0xff] }
  0x49   :  { %688 = vst [vmem:[%s1827_s3 + $0x270] sm:$0xff] %v560_v3  ;;  %v438_v18 = vadd.f32 %v803_v28, %v268_v6  ;;  %v270_v19 = vmul.f32 %v820_v38, %v100_v2  ;;  %v562_v29 = vmax.f32 %v434_v7, 0.0  ;;  %v563_v30 = vmax.f32 %v435_v8, 0.0  ;;  %v112_v2 = vld [vmem:[%s1826_s0 + $0x310] sm:$0xff]  ;;  %v113_v7 = vld [vmem:[%s1826_s0 + $0x318] sm:$0xff]  ;;  %v114_v8 = vld [vmem:[%s1826_s0 + $0x320] sm:$0xff] }
  0x4a   :  { %v564_v31 = vmax.f32 %v436_v9, 0.0  ;;  %v439_v34 = vadd.f32 %v812_v33, %v269_v10  ;;  %689 = vst [vmem:[%s1827_s3 + $0x278] sm:$0xff] %v561_v12  ;;  %v565_v37 = vmax.f32 %v437_v13, 0.0  ;;  %v271_v41 = vmul.f32 %v842_v54, %v101_v11  ;;  %v115_v13 = vld [vmem:[%s1826_s0 + $0x328] sm:$0xff] }
  0x4b   :  { %v566_v39 = vmax.f32 %v438_v18, 0.0  ;;  %v440_v40 = vadd.f32 %v825_v42, %v270_v19  ;;  %690 = vst [vmem:[%s1827_s3 + $0x280] sm:$0xff] %v562_v29  ;;  %691 = vst [vmem:[%s1827_s3 + $0x288] sm:$0xff] %v563_v30  ;;  %v272_v45 = vmul.f32 %v774_v14, %v102_v24  ;;  %v273_v46 = vmul.f32 %v778_v16, %v103_v25 }
  0x4c   :  { %692 = vst [vmem:[%s1827_s3 + $0x290] sm:$0xff] %v564_v31  ;;  %v567_v44 = vmax.f32 %v439_v34, 0.0  ;;  %v274_v47 = vmul.f32 %v788_v20, %v104_v26  ;;  %693 = vst [vmem:[%s1827_s3 + $0x298] sm:$0xff] %v565_v37  ;;  %v441_v50 = vadd.f32 %v857_v59, %v271_v41  ;;  %v275_v51 = vmul.f32 %v792_v22, %v105_v35  ;;  %v116_v26 = vld [vmem:[%s1826_s0 + $0x330] sm:$0xff] }
  0x4d   :  { %694 = vst [vmem:[%s1827_s3 + $0x2a0] sm:$0xff] %v566_v39  ;;  %v568_v49 = vmax.f32 %v440_v40, 0.0  ;;  %v276_v52 = vmul.f32 %v801_v27, %v106_v36  ;;  %v442_v53 = vadd.f32 %v776_v15, %v272_v45  ;;  %v443_v55 = vadd.f32 %v780_v17, %v273_v46  ;;  %v117_v40 = vld [vmem:[%s1826_s0 + $0x338] sm:$0xff]  ;;  %v118_v46 = vld [vmem:[%s1826_s0 + $0x340] sm:$0xff] }
  0x4e   :  { %695 = vst [vmem:[%s1827_s3 + $0x2a8] sm:$0xff] %v567_v44  ;;  %v444_v56 = vadd.f32 %v790_v21, %v274_v47  ;;  %v277_v57 = vmul.f32 %v810_v32, %v107_v43  ;;  %v569_v60 = vmax.f32 %v441_v50, 0.0  ;;  %v445_v61 = vadd.f32 %v794_v23, %v275_v51  ;;  %v119_v47 = vld [vmem:[%s1826_s0 + $0x348] sm:$0xff] }
  0x4f   :  { %696 = vst [vmem:[%s1827_s3 + $0x2b0] sm:$0xff] %v568_v49  ;;  %v446_v62 = vadd.f32 %v803_v28, %v276_v52  ;;  %v278_v63 = vmul.f32 %v820_v38, %v108_v48  ;;  %v570_v3 = vmax.f32 %v442_v53, 0.0  ;;  %v571_v4 = vmax.f32 %v443_v55, 0.0  ;;  %v120_v48 = vld [vmem:[%s1826_s0 + $0x350] sm:$0xff]  ;;  %v121_v53 = vld [vmem:[%s1826_s0 + $0x358] sm:$0xff]  ;;  %v122_v55 = vld [vmem:[%s1826_s0 + $0x360] sm:$0xff] }
  0x50   :  { %v572_v5 = vmax.f32 %v444_v56, 0.0  ;;  %v447_v6 = vadd.f32 %v812_v33, %v277_v57  ;;  %697 = vst [vmem:[%s1827_s3 + $0x2b8] sm:$0xff] %v569_v60  ;;  %v573_v9 = vmax.f32 %v445_v61, 0.0  ;;  %v279_v12 = vmul.f32 %v842_v54, %v109_v58  ;;  %v123_v61 = vld [vmem:[%s1826_s0 + $0x368] sm:$0xff] }
  0x51   :  { %v574_v10 = vmax.f32 %v446_v62, 0.0  ;;  %v448_v11 = vadd.f32 %v825_v42, %v278_v63  ;;  %698 = vst [vmem:[%s1827_s3 + $0x2c0] sm:$0xff] %v570_v3  ;;  %699 = vst [vmem:[%s1827_s3 + $0x2c8] sm:$0xff] %v571_v4  ;;  %v280_v19 = vmul.f32 %v774_v14, %v110_v0  ;;  %v281_v24 = vmul.f32 %v778_v16, %v111_v1 }
  0x52   :  { %700 = vst [vmem:[%s1827_s3 + $0x2d0] sm:$0xff] %v572_v5  ;;  %v575_v18 = vmax.f32 %v447_v6, 0.0  ;;  %v282_v25 = vmul.f32 %v788_v20, %v112_v2  ;;  %701 = vst [vmem:[%s1827_s3 + $0x2d8] sm:$0xff] %v573_v9  ;;  %v449_v30 = vadd.f32 %v857_v59, %v279_v12  ;;  %v283_v31 = vmul.f32 %v792_v22, %v113_v7  ;;  %v124_v2 = vld [vmem:[%s1826_s0 + $0x370] sm:$0xff] }
  0x53   :  { %702 = vst [vmem:[%s1827_s3 + $0x2e0] sm:$0xff] %v574_v10  ;;  %v576_v29 = vmax.f32 %v448_v11, 0.0  ;;  %v284_v34 = vmul.f32 %v801_v27, %v114_v8  ;;  %v450_v35 = vadd.f32 %v776_v15, %v280_v19  ;;  %v451_v36 = vadd.f32 %v780_v17, %v281_v24  ;;  %v125_v11 = vld [vmem:[%s1826_s0 + $0x378] sm:$0xff]  ;;  %v126_v24 = vld [vmem:[%s1826_s0 + $0x380] sm:$0xff] }
  0x54   :  { %703 = vst [vmem:[%s1827_s3 + $0x2e8] sm:$0xff] %v575_v18  ;;  %v452_v37 = vadd.f32 %v790_v21, %v282_v25  ;;  %v285_v39 = vmul.f32 %v810_v32, %v115_v13  ;;  %v577_v41 = vmax.f32 %v449_v30, 0.0  ;;  %v453_v43 = vadd.f32 %v794_v23, %v283_v31  ;;  %v127_v25 = vld [vmem:[%s1826_s0 + $0x388] sm:$0xff] }
  0x55   :  { %704 = vst [vmem:[%s1827_s3 + $0x2f0] sm:$0xff] %v576_v29  ;;  %v454_v44 = vadd.f32 %v803_v28, %v284_v34  ;;  %v286_v45 = vmul.f32 %v820_v38, %v116_v26  ;;  %v578_v49 = vmax.f32 %v450_v35, 0.0  ;;  %v579_v50 = vmax.f32 %v451_v36, 0.0  ;;  %v128_v26 = vld [vmem:[%s1826_s0 + $0x390] sm:$0xff]  ;;  %v129_v35 = vld [vmem:[%s1826_s0 + $0x398] sm:$0xff]  ;;  %v130_v36 = vld [vmem:[%s1826_s0 + $0x3a0] sm:$0xff] }
  0x56   :  { %v580_v51 = vmax.f32 %v452_v37, 0.0  ;;  %v455_v52 = vadd.f32 %v812_v33, %v285_v39  ;;  %705 = vst [vmem:[%s1827_s3 + $0x2f8] sm:$0xff] %v577_v41  ;;  %v581_v56 = vmax.f32 %v453_v43, 0.0  ;;  %v287_v60 = vmul.f32 %v842_v54, %v117_v40  ;;  %v131_v43 = vld [vmem:[%s1826_s0 + $0x3a8] sm:$0xff] }
  0x57   :  { %v582_v57 = vmax.f32 %v454_v44, 0.0  ;;  %v456_v58 = vadd.f32 %v825_v42, %v286_v45  ;;  %706 = vst [vmem:[%s1827_s3 + $0x300] sm:$0xff] %v578_v49  ;;  %707 = vst [vmem:[%s1827_s3 + $0x308] sm:$0xff] %v579_v50  ;;  %v288_v63 = vmul.f32 %v774_v14, %v118_v46  ;;  %v289_v0 = vmul.f32 %v778_v16, %v119_v47 }
  0x58   :  { %708 = vst [vmem:[%s1827_s3 + $0x310] sm:$0xff] %v580_v51  ;;  %v583_v62 = vmax.f32 %v455_v52, 0.0  ;;  %v290_v1 = vmul.f32 %v788_v20, %v120_v48  ;;  %709 = vst [vmem:[%s1827_s3 + $0x318] sm:$0xff] %v581_v56  ;;  %v457_v4 = vadd.f32 %v857_v59, %v287_v60  ;;  %v291_v5 = vmul.f32 %v792_v22, %v121_v53  ;;  %v132_v48 = vld [vmem:[%s1826_s0 + $0x3b0] sm:$0xff] }
  0x59   :  { %710 = vst [vmem:[%s1827_s3 + $0x320] sm:$0xff] %v582_v57  ;;  %v584_v3 = vmax.f32 %v456_v58, 0.0  ;;  %v292_v6 = vmul.f32 %v801_v27, %v122_v55  ;;  %v458_v7 = vadd.f32 %v776_v15, %v288_v63  ;;  %v459_v8 = vadd.f32 %v780_v17, %v289_v0  ;;  %v133_v58 = vld [vmem:[%s1826_s0 + $0x3b8] sm:$0xff]  ;;  %v134_v0 = vld [vmem:[%s1826_s0 + $0x3c0] sm:$0xff] }
  0x5a   :  { %711 = vst [vmem:[%s1827_s3 + $0x328] sm:$0xff] %v583_v62  ;;  %v460_v9 = vadd.f32 %v790_v21, %v290_v1  ;;  %v293_v10 = vmul.f32 %v810_v32, %v123_v61  ;;  %v585_v12 = vmax.f32 %v457_v4, 0.0  ;;  %v461_v13 = vadd.f32 %v794_v23, %v291_v5  ;;  %v135_v1 = vld [vmem:[%s1826_s0 + $0x3c8] sm:$0xff] }
  0x5b   :  { %712 = vst [vmem:[%s1827_s3 + $0x330] sm:$0xff] %v584_v3  ;;  %v462_v18 = vadd.f32 %v803_v28, %v292_v6  ;;  %v294_v19 = vmul.f32 %v820_v38, %v124_v2  ;;  %v586_v29 = vmax.f32 %v458_v7, 0.0  ;;  %v587_v30 = vmax.f32 %v459_v8, 0.0  ;;  %v136_v2 = vld [vmem:[%s1826_s0 + $0x3d0] sm:$0xff]  ;;  %v137_v7 = vld [vmem:[%s1826_s0 + $0x3d8] sm:$0xff]  ;;  %v138_v8 = vld [vmem:[%s1826_s0 + $0x3e0] sm:$0xff] }
  0x5c   :  { %v588_v31 = vmax.f32 %v460_v9, 0.0  ;;  %v463_v34 = vadd.f32 %v812_v33, %v293_v10  ;;  %713 = vst [vmem:[%s1827_s3 + $0x338] sm:$0xff] %v585_v12  ;;  %v589_v37 = vmax.f32 %v461_v13, 0.0  ;;  %v295_v41 = vmul.f32 %v842_v54, %v125_v11  ;;  %v139_v13 = vld [vmem:[%s1826_s0 + $0x3e8] sm:$0xff] }
  0x5d   :  { %v590_v39 = vmax.f32 %v462_v18, 0.0  ;;  %v464_v40 = vadd.f32 %v825_v42, %v294_v19  ;;  %714 = vst [vmem:[%s1827_s3 + $0x340] sm:$0xff] %v586_v29  ;;  %715 = vst [vmem:[%s1827_s3 + $0x348] sm:$0xff] %v587_v30  ;;  %v296_v45 = vmul.f32 %v774_v14, %v126_v24  ;;  %v297_v46 = vmul.f32 %v778_v16, %v127_v25 }
  0x5e   :  { %716 = vst [vmem:[%s1827_s3 + $0x350] sm:$0xff] %v588_v31  ;;  %v591_v44 = vmax.f32 %v463_v34, 0.0  ;;  %v298_v47 = vmul.f32 %v788_v20, %v128_v26  ;;  %717 = vst [vmem:[%s1827_s3 + $0x358] sm:$0xff] %v589_v37  ;;  %v465_v50 = vadd.f32 %v857_v59, %v295_v41  ;;  %v299_v51 = vmul.f32 %v792_v22, %v129_v35  ;;  %v140_v26 = vld [vmem:[%s1826_s0 + $0x3f0] sm:$0xff] }
  0x5f   :  { %718 = vst [vmem:[%s1827_s3 + $0x360] sm:$0xff] %v590_v39  ;;  %v592_v49 = vmax.f32 %v464_v40, 0.0  ;;  %v300_v52 = vmul.f32 %v801_v27, %v130_v36  ;;  %v466_v53 = vadd.f32 %v776_v15, %v296_v45  ;;  %v467_v55 = vadd.f32 %v780_v17, %v297_v46  ;;  %v141_v36 = vld [vmem:[%s1826_s0 + $0x3f8] sm:$0xff] }
  0x60   :  { %719 = vst [vmem:[%s1827_s3 + $0x368] sm:$0xff] %v591_v44  ;;  %v468_v56 = vadd.f32 %v790_v21, %v298_v47  ;;  %v301_v57 = vmul.f32 %v810_v32, %v131_v43  ;;  %v593_v60 = vmax.f32 %v465_v50, 0.0  ;;  %v469_v61 = vadd.f32 %v794_v23, %v299_v51 }
  0x61   :  { %720 = vst [vmem:[%s1827_s3 + $0x370] sm:$0xff] %v592_v49  ;;  %v470_v62 = vadd.f32 %v803_v28, %v300_v52  ;;  %v302_v63 = vmul.f32 %v820_v38, %v132_v48  ;;  %v594_v3 = vmax.f32 %v466_v53, 0.0  ;;  %v595_v4 = vmax.f32 %v467_v55, 0.0 }
  0x62   :  { %v596_v5 = vmax.f32 %v468_v56, 0.0  ;;  %v471_v6 = vadd.f32 %v812_v33, %v301_v57  ;;  %721 = vst [vmem:[%s1827_s3 + $0x378] sm:$0xff] %v593_v60  ;;  %v597_v9 = vmax.f32 %v469_v61, 0.0  ;;  %v303_v12 = vmul.f32 %v842_v54, %v133_v58 }
  0x63   :  { %v598_v10 = vmax.f32 %v470_v62, 0.0  ;;  %v472_v11 = vadd.f32 %v825_v42, %v302_v63  ;;  %722 = vst [vmem:[%s1827_s3 + $0x380] sm:$0xff] %v594_v3  ;;  %723 = vst [vmem:[%s1827_s3 + $0x388] sm:$0xff] %v595_v4  ;;  %v304_v19 = vmul.f32 %v774_v14, %v134_v0  ;;  %v305_v24 = vmul.f32 %v778_v16, %v135_v1 }
  0x64   :  { %724 = vst [vmem:[%s1827_s3 + $0x390] sm:$0xff] %v596_v5  ;;  %v599_v18 = vmax.f32 %v471_v6, 0.0  ;;  %v306_v25 = vmul.f32 %v788_v20, %v136_v2  ;;  %725 = vst [vmem:[%s1827_s3 + $0x398] sm:$0xff] %v597_v9  ;;  %v473_v30 = vadd.f32 %v857_v59, %v303_v12  ;;  %v307_v14 = vmul.f32 %v792_v22, %v137_v7 }
  0x65   :  { %726 = vst [vmem:[%s1827_s3 + $0x3a0] sm:$0xff] %v598_v10  ;;  %v600_v29 = vmax.f32 %v472_v11, 0.0  ;;  %v308_v16 = vmul.f32 %v801_v27, %v138_v8  ;;  %v474_v20 = vadd.f32 %v776_v15, %v304_v19  ;;  %v475_v31 = vadd.f32 %v780_v17, %v305_v24 }
  0x66   :  { %727 = vst [vmem:[%s1827_s3 + $0x3a8] sm:$0xff] %v599_v18  ;;  %v476_v34 = vadd.f32 %v790_v21, %v306_v25  ;;  %v309_v35 = vmul.f32 %v810_v32, %v139_v13  ;;  %v601_v22 = vmax.f32 %v473_v30, 0.0  ;;  %v477_v27 = vadd.f32 %v794_v23, %v307_v14 }
  0x67   :  { %728 = vst [vmem:[%s1827_s3 + $0x3b0] sm:$0xff] %v600_v29  ;;  %v478_v37 = vadd.f32 %v803_v28, %v308_v16  ;;  %v310_v15 = vmul.f32 %v820_v38, %v140_v26  ;;  %v602_v17 = vmax.f32 %v474_v20, 0.0  ;;  %v603_v39 = vmax.f32 %v475_v31, 0.0 }
  0x68   :  { %v604_v21 = vmax.f32 %v476_v34, 0.0  ;;  %v479_v32 = vadd.f32 %v812_v33, %v309_v35  ;;  %729 = vst [vmem:[%s1827_s3 + $0x3b8] sm:$0xff] %v601_v22  ;;  %v605_v40 = vmax.f32 %v477_v27, 0.0  ;;  %v311_v44 = vmul.f32 %v842_v54, %v141_v36 }
  0x69   :  { %v606_v41 = vmax.f32 %v478_v37, 0.0  ;;  %v480_v43 = vadd.f32 %v825_v42, %v310_v15  ;;  %730 = vst [vmem:[%s1827_s3 + $0x3c0] sm:$0xff] %v602_v17  ;;  %731 = vst [vmem:[%s1827_s3 + $0x3c8] sm:$0xff] %v603_v39 }
  0x6a   :  { %732 = vst [vmem:[%s1827_s3 + $0x3d0] sm:$0xff] %v604_v21  ;;  %v607_v23 = vmax.f32 %v479_v32, 0.0  ;;  %733 = vst [vmem:[%s1827_s3 + $0x3d8] sm:$0xff] %v605_v40  ;;  %v481_v33 = vadd.f32 %v857_v59, %v311_v44 }
  0x6b   :  { %734 = vst [vmem:[%s1827_s3 + $0x3e0] sm:$0xff] %v606_v41  ;;  %v608_v28 = vmax.f32 %v480_v43, 0.0 }
  0x6c   :  { %735 = vst [vmem:[%s1827_s3 + $0x3e8] sm:$0xff] %v607_v23  ;;  %v609_v38 = vmax.f32 %v481_v33, 0.0 }
  0x6d   :  { %736 = vst [vmem:[%s1827_s3 + $0x3f0] sm:$0xff] %v608_v28 }
  0x6e   :  { %737 = vst [vmem:[%s1827_s3 + $0x3f8] sm:$0xff] %v609_v38 }

// kernel: forward.11
= control target key start
LH: loop header
LB: loop body
LE: loop exit
PB: predicated region body
PF: predicated region fallthrough
CT: control target
= control target key end

     0   :  { %9 = vsyncpa [#allocation3], 0  ;;  %s1360_s0 = inlined_call_operand.vmem [shape: bf16[4,128,256], index: 0, kind: input, shape index: {}]   ;;  %s1361_s1 = inlined_call_operand.hbm [shape: bf16[4,256,128], index: 1, kind: input, shape index: {}]   ;;  %s1362_s2 = inlined_call_operand.vmem [shape: f32[4,128,128], index: 2, kind: output, shape index: {0}]   ;;  %s1363_s3 = inlined_call_operand.vmem [shape: f32[4,8,128], index: 3, kind: output, shape index: {1}]  }
   0x1   :  { %11 = vsyncpa [#allocation3 + $0x1], 0  ;;  %s1150_s12 = smov 0   ;;  %s1152_s13 = smov 0  }
   0x2   :  { %s1154_s14 = smov 0   ;;  %s1156_s15 = smov 0  }
   0x3   :  { %s1158_s16 = smov 0   ;;  %s1160_s17 = smov 0  }
   0x4 LB: > { %s817_s18 = sadd.s32 4294967295, %s1125_s17   ;;  %s29_s19 = sadd.s32 1, %s1121_s16  ;;  %s1125_s17 = sphi %s1160_s17, %s17_s17   ;;  %s1121_s16 = sphi %s1158_s16, %s1371_s16   ;;  %s1117_s15 = sphi %s1156_s15, %s1370_s15   ;;  %s1113_s14 = sphi %s1154_s14, %s1369_s14   ;;  %s1109_s13 = sphi %s1152_s13, %s1368_s13   ;;  %s1105_s12 = sphi %s1150_s12, %s1367_s12  }
   0x5   : > { %p31_p0 = scmp.ge.s32.totalorder %s29_s19, 4  ;;  %s64_s20 = sadd.s32 1, %s1113_s14 }
   0x6   : > { %p71_p1 = scmp.ne.s32.totalorder %s1113_s14, %s1109_s13  ;;  %p72_p2 = scmp.eq.s32.totalorder %s1125_s17, 0 }
   0x7   : > { %s1373_s19 = smov (%p31_p0, %s29_s19), 0  ;;  %p77_p4 = scmp.ne.s32.totalorder %s1109_s13, %s1105_s12 }
   0x8   : > { %p1186_p3 = por %p72_p2, %p71_p1  ;;  %s61_s22 = ssub.s32 %s1121_s16, %s1373_s19 }
   0x9   : > { %p78_p5 = scmp.eq.s32.totalorder %s817_s18, 0  ;;  %p62_p6 = scmp.eq.s32.totalorder %s61_s22, 0 }
   0xa   : > { %p954_p8 = scmp.lt.s32.totalorder %s1125_s17, 4  ;;  %s171_s25 = sand.u32 1, %s1113_s14  }
   0xb   : > { %p1193_p7 = por %p78_p5, %p77_p4  ;;  %s865_s26 = sshll.u32 %s1121_s16, 11 }
   0xc   : > { %s1199_s24 = scalar_select %p62_p6, %s1113_s14, %s64_s20  }
   0xd   : > { %s821_s27 = sshll.u32 %s171_s25, 7  ;;  %s1206_s30 = scalar_lea.hbm %s1361_s1, %s865_s26 }
   0xe   : > { %s175_s4 = scalar_lea.vmem [#allocation2], %s821_s27  ;;  %p1210_p9 = pnand %p954_p8, %p1186_p3 }
   0xf   : > { %s182_s5 = sshll.u32 %s175_s4, 4  ;;  %s1216_s7 = scalar_lea.sflag [#allocation3], %s171_s25  ;;  %s1214_s5 = int_to_ptr.vmem [resolvable:$true] %s182_s5 }
  0x10   : > { %s1045_s8 = scalar_lea.hbm %s1206_s30, 2048  ;;  %p1047_p11 = pneg %p1210_p9 }
  0x11   : > { %p1046_p10 = scmp.ne.s32.totalorder %s1206_s30, %s1045_s8  ;;  %s1050_s11 = scalar_lea.hbm %s1361_s1, 8192 }
  0x12   : > { %p1051_p0 = scmp.lt.u32.totalorder %s1206_s30, %s1361_s1  ;;  %p1052_p1 = scmp.lt.u32.totalorder %s1050_s11, %s1045_s8 }
  0x13   : > { %p1048_p12 = pnand %p1047_p11, %p1046_p10  ;;  %p1054_p3 = scmp.lt.u32.totalorder %s1045_s8, %s1206_s30 }
  0x14   : > { %p1053_p2 = por %p1052_p1, %p1051_p0 }
  0x15   : > { %p1049_p13 = pneg %p1048_p12 }
  0x16   : > { %p1055_p4 = por %p1054_p3, %p1053_p2 }
  0x18   : > { %p1056_p5 = pnand %p1055_p4, %p1049_p13 }
  0x1a   : > { %1059 = shalt.err (!%p1056_p5)
}
  0x1b   : > { %s1060_s20 = scalar_lea.vmem %s1214_s5, 2048  ;;  %s1127_s21 = smov [#allocation2]  }
  0x1c   : > { %p1061_p6 = scmp.ne.s32.totalorder %s1214_s5, %s1060_s20  ;;  %s1065_s22 = sshll.u32 %s1127_s21, 4  ;;  %s1066_s22 = int_to_ptr.vmem [resolvable:$false] %s1065_s22 }
  0x1d   : > { %s1067_s25 = scalar_lea.vmem %s1066_s22, 4096  ;;  %p1068_p12 = scmp.lt.s32.totalorder %s1214_s5, %s1066_s22 }
  0x1e   : > { %p1063_p8 = pnand %p1061_p6, %p1047_p11  ;;  %p1069_p0 = scmp.lt.s32.totalorder %s1067_s25, %s1060_s20 }
  0x20   : > { %p1064_p10 = pneg %p1063_p8  ;;  %p1070_p1 = por %p1069_p0, %p1068_p12 }
  0x22   : > { %p1071_p2 = pnand %p1070_p1, %p1064_p10 }
  0x24   : > { %1074 = shalt.err (!%p1071_p2)
}
  0x25   : > { %s1128_s26 = smov 64   ;;  %s1129_s27 = smov 4  }
  0x26   : > { %953 = dma.hbm_to_vmem [thread:$0]  (!%p1210_p9), %s1206_s30, 2048, %s1214_s5, %s1216_s7, %s1128_s26, %s1128_s26, %s1129_s27  }
  0x27   : > { %p824_p11 = scmp.ge.s32.totalorder %s1125_s17, 1  ;;  %p190_p13 = scmp.lt.s32.totalorder %s1125_s17, 5 }
  0x29   : > { %p191_p3 = pnand %p824_p11, %p190_p13 }
  0x2a   : > { %s196_s28 = sand.u32 (!%p191_p3), 1, %s1109_s13  }
  0x2b   : > { %194 = sbr.rel (%p191_p3) target bundleno = 360 (0x168), region = 28  ;;  %s825_s29 = sshll.u32 (!%p191_p3), %s196_s28, 7 }
  0x2c   : > { %s197_s4 = scalar_lea.sflag (!%p191_p3), [#allocation3], %s196_s28  ;;  %s1247_s8 = scalar_lea.vmem (!%p191_p3), [#allocation2], %s825_s29 }
  0x32   : > { %1100 = dma.done.wait (%p1193_p7), %s197_s4, 2048  }
  0x33   : > { %1102 = vsyncadd (%p1193_p7), %s197_s4, 4294965248  ;;  %v1005_v0 = vld [vmem:[%s1247_s8 + $0x40] sm:$0xff]   ;;  %v1007_v2 = vld [vmem:[%s1247_s8 + $0x48] sm:$0xff]   ;;  %p243_p9 = scmp.lt.s32.totalorder %s1117_s15, 3  ;;  %vm665_vm0 = vcmask 1040384   ;;  %vm667_vm1 = vcmask 1041408  }
  0x34   : > { %v1006_v1 = vld [vmem:[%s1247_s8] sm:$0xff]   ;;  %868 = vmatprep.subr.bf16.mxu0 %v1005_v0  ;;  %932 = vmatprep.subr.bf16.mxu1 %v1005_v0  ;;  %v1008_v3 = vld [vmem:[%s1247_s8 + $0x8] sm:$0xff]   ;;  %v1009_v4 = vld [vmem:[%s1247_s8 + $0x50] sm:$0xff]  }
  0x35   : > { %869 = vmatpush3.bf16.msra.mxu0 %v1006_v1  ;;  %940 = vmatpush3.bf16.msra.mxu1 %v1006_v1  ;;  %v1010_v5 = vld [vmem:[%s1247_s8 + $0x10] sm:$0xff]   ;;  %s1375_s15 = smov (!%p243_p9, %s1117_s15), 3  ;;  %v1011_v6 = vld [vmem:[%s1247_s8 + $0x58] sm:$0xff]   ;;  %v1013_v8 = vld [vmem:[%s1247_s8 + $0x60] sm:$0xff]  }
  0x36   : > { %870 = vmatprep.subr.bf16.mxu0 %v1007_v2  ;;  %933 = vmatprep.subr.bf16.mxu1 %v1007_v2  ;;  %v1012_v7 = vld [vmem:[%s1247_s8 + $0x18] sm:$0xff]   ;;  %s866_s23 = sshll.u32 %s1375_s15, 7  ;;  %v1014_v9 = vld [vmem:[%s1247_s8 + $0x20] sm:$0xff]   ;;  %v1015_v10 = vld [vmem:[%s1247_s8 + $0x68] sm:$0xff]   ;;  %s830_s11 = sshll.u32 %s1375_s15, 3 }
  0x37   : > { %s1272_s6 = scalar_lea.vmem %s1360_s0, %s866_s23  ;;  %v1016_v12 = vld [vmem:[%s1247_s8 + $0x28] sm:$0xff]   ;;  %v1017_v14 = vld [vmem:[%s1247_s8 + $0x70] sm:$0xff]   ;;  %v1019_v16 = vld [vmem:[%s1247_s8 + $0x78] sm:$0xff]   ;;  %s1302_s10 = scalar_lea.vmem %s1362_s2, %s866_s23 }
  0x38   : > { %v1023_v11 = vld [vmem:[%s1272_s6 + $0x4] ss:$8 sps:$4 sm:$0xff]   ;;  %v1018_v15 = vld [vmem:[%s1247_s8 + $0x30] sm:$0xff]   ;;  %v1020_v17 = vld [vmem:[%s1247_s8 + $0x38] sm:$0xff]   ;;  %s267_s20 = scalar_lea.vmem %s1363_s3, %s830_s11 }
  0x39   : > { %871 = vmatpush3.bf16.msra.mxu0 %v1008_v3  ;;  %941 = vmatpush3.bf16.msra.mxu1 %v1008_v3  ;;  %v1029_v13 = vld [vmem:[%s1272_s6 + $0x44] ss:$8 sps:$4 sm:$0xff]   ;;  %v1021_v18 = vld [vmem:[%s1272_s6] ss:$8 sps:$4 sm:$0xff]   ;;  %v1024_v20 = vld [vmem:[%s1272_s6 + $0x14] ss:$8 sps:$4 sm:$0xff]  }
  0x3a   : > { %872 = vmatprep.subr.bf16.mxu0 %v1009_v4  ;;  %934 = vmatprep.subr.bf16.mxu1 %v1009_v4  ;;  %v1027_v19 = vld [vmem:[%s1272_s6 + $0x40] ss:$8 sps:$4 sm:$0xff]   ;;  %v1033_v21 = vld [vmem:[%s1272_s6 + $0x54] ss:$8 sps:$4 sm:$0xff]   ;;  %v1026_v22 = vld [vmem:[%s1272_s6 + $0x10] ss:$8 sps:$4 sm:$0xff]  }
  0x3b   : > { %526 = vmatprep.mubr.bf16.mxu0 %v1023_v11  ;;  %558 = vmatprep.mubr.bf16.mxu1 %v1029_v13  ;;  %v1035_v23 = vld [vmem:[%s1272_s6 + $0x50] ss:$8 sps:$4 sm:$0xff]   ;;  %v1030_v24 = vld [vmem:[%s1272_s6 + $0x24] ss:$8 sps:$4 sm:$0xff]   ;;  %v1032_v26 = vld [vmem:[%s1272_s6 + $0x20] ss:$8 sps:$4 sm:$0xff]  }
  0x3c   : > { %v1039_v25 = vld [vmem:[%s1272_s6 + $0x64] ss:$8 sps:$4 sm:$0xff]   ;;  %v1041_v27 = vld [vmem:[%s1272_s6 + $0x60] ss:$8 sps:$4 sm:$0xff]   ;;  %v1036_v28 = vld [vmem:[%s1272_s6 + $0x34] ss:$8 sps:$4 sm:$0xff]  }
  0x3d   : > { %873 = vmatpush3.bf16.msra.mxu0 %v1010_v5  ;;  %942 = vmatpush3.bf16.msra.mxu1 %v1010_v5  ;;  %v1042_v29 = vld [vmem:[%s1272_s6 + $0x74] ss:$8 sps:$4 sm:$0xff]   ;;  %v1038_v30 = vld [vmem:[%s1272_s6 + $0x30] ss:$8 sps:$4 sm:$0xff]  }
  0x3e   : > { %874 = vmatprep.subr.bf16.mxu0 %v1011_v6  ;;  %935 = vmatprep.subr.bf16.mxu1 %v1011_v6  ;;  %v1044_v31 = vld [vmem:[%s1272_s6 + $0x70] ss:$8 sps:$4 sm:$0xff]  }
  0x41   : > { %875 = vmatpush3.bf16.msra.mxu0 %v1012_v7  ;;  %943 = vmatpush3.bf16.msra.mxu1 %v1012_v7 }
  0x42   : > { %876 = vmatprep.subr.bf16.mxu0 %v1013_v8  ;;  %936 = vmatprep.subr.bf16.mxu1 %v1013_v8 }
  0x45   : > { %877 = vmatpush3.bf16.msra.mxu0 %v1014_v9  ;;  %944 = vmatpush3.bf16.msra.mxu1 %v1014_v9 }
  0x46   : > { %878 = vmatprep.subr.bf16.mxu0 %v1015_v10  ;;  %937 = vmatprep.subr.bf16.mxu1 %v1015_v10 }
  0x49   : > { %879 = vmatpush3.bf16.msra.mxu0 %v1016_v12  ;;  %945 = vmatpush3.bf16.msra.mxu1 %v1016_v12 }
  0x4a   : > { %880 = vmatprep.subr.bf16.mxu0 %v1017_v14  ;;  %938 = vmatprep.subr.bf16.mxu1 %v1017_v14 }
  0x4d   : > { %881 = vmatpush3.bf16.msra.mxu0 %v1018_v15  ;;  %946 = vmatpush3.bf16.msra.mxu1 %v1018_v15 }
  0x4e   : > { %882 = vmatprep.subr.bf16.mxu0 %v1019_v16  ;;  %939 = vmatprep.subr.bf16.mxu1 %v1019_v16 }
  0x51   : > { %883 = vmatpush3.bf16.msra.mxu0 %v1020_v17  ;;  %947 = vmatpush3.bf16.msra.mxu1 %v1020_v17 }
  0x54   : > { %527 = vmatmul.mubr.bf16.vlgmr.msra.gmra.mrb[0].mxu0 %v1021_v18  ;;  %559 = vmatmul.mubr.bf16.vlgmr.msra.gmra.mrb[0].mxu1 %v1027_v19 }
  0x55   : > { %534 = vmatprep.mubr.bf16.mxu0 %v1024_v20  ;;  %566 = vmatprep.mubr.bf16.mxu1 %v1033_v21 }
  0x5c   : > { %535 = vmatmul.mubr.bf16.gmra.mrb[4].mxu0 %v1026_v22  ;;  %567 = vmatmul.mubr.bf16.gmra.mrb[4].mxu1 %v1035_v23 }
  0x5d   : > { %542 = vmatprep.mubr.bf16.mxu0 %v1030_v24  ;;  %574 = vmatprep.mubr.bf16.mxu1 %v1039_v25 }
  0x64   : > { %543 = vmatmul.mubr.bf16.gmra.mrb[8].mxu0 %v1032_v26  ;;  %575 = vmatmul.mubr.bf16.gmra.mrb[8].mxu1 %v1041_v27 }
  0x65   : > { %550 = vmatprep.mubr.bf16.mxu0 %v1036_v28  ;;  %582 = vmatprep.mubr.bf16.mxu1 %v1042_v29 }
  0x6c   : > { %551 = vmatmul.mubr.bf16.gmra.mrb[12].mxu0 %v1038_v30  ;;  %583 = vmatmul.mubr.bf16.gmra.mrb[12].mxu1 %v1044_v31 }
 0x127   : > { %v884_v32 = vpop.f32.mrb[0].mxu0  ;;  %v908_v33 = vpop.f32.mrb[0].mxu1 }
 0x128   : > { %v885_v34 = vpop.f32.mrb[1].mxu0  ;;  %v909_v35 = vpop.f32.mrb[1].mxu1 }
 0x129   : > { %v886_v36 = vadd.f32 %v885_v34, %v884_v32  ;;  %v887_v37 = vpop.f32.mrb[2].mxu0  ;;  %v1304_v38 = vadd.f32 %v909_v35, %v908_v33  ;;  %v911_v39 = vpop.f32.mrb[2].mxu1 }
 0x12a   : > { %v888_v40 = vpop.f32.mrb[3].mxu0  ;;  %v912_v41 = vpop.f32.mrb[3].mxu1 }
 0x12b   : > { %591 = vst [vmem:[%s1302_s10] sm:$0xff] %v886_v36  ;;  %v889_v42 = vadd.f32 %v888_v40, %v887_v37  ;;  %599 = vst [vmem:[%s1302_s10 + $0x40] sm:$0xff] %v1304_v38  ;;  %v1309_v43 = vadd.f32 %v912_v41, %v911_v39  ;;  %v628_v44 = vmul.f32 %v886_v36, %v886_v36 }
 0x12c   : > { %v636_v37 = vmul.f32 %v1304_v38, %v1304_v38 }
 0x12d   : > { %592 = vst [vmem:[%s1302_s10 + $0x8] sm:$0xff] %v889_v42  ;;  %v607_v45 = vadd.f32 %v889_v42, %v886_v36  ;;  %v629_v46 = vmul.f32 %v889_v42, %v889_v42  ;;  %600 = vst [vmem:[%s1302_s10 + $0x48] sm:$0xff] %v1309_v43  ;;  %v637_v41 = vmul.f32 %v1309_v43, %v1309_v43 }
 0x12f   : > { %v644_v47 = vadd.f32 %v629_v46, %v628_v44  ;;  %v890_v48 = vpop.f32.mrb[4].mxu0  ;;  %v914_v49 = vpop.f32.mrb[4].mxu1 }
 0x130   : > { %v891_v50 = vpop.f32.mrb[5].mxu0  ;;  %v915_v51 = vpop.f32.mrb[5].mxu1 }
 0x131   : > { %v892_v52 = vadd.f32 %v891_v50, %v890_v48  ;;  %v893_v53 = vpop.f32.mrb[6].mxu0  ;;  %v1314_v54 = vadd.f32 %v915_v51, %v914_v49  ;;  %v917_v55 = vpop.f32.mrb[6].mxu1 }
 0x132   : > { %v894_v56 = vpop.f32.mrb[7].mxu0  ;;  %v918_v57 = vpop.f32.mrb[7].mxu1 }
 0x133   : > { %593 = vst [vmem:[%s1302_s10 + $0x10] sm:$0xff] %v892_v52  ;;  %v608_v58 = vadd.f32 %v892_v52, %v607_v45  ;;  %v630_v59 = vmul.f32 %v892_v52, %v892_v52  ;;  %v895_v60 = vadd.f32 %v894_v56, %v893_v53  ;;  %601 = vst [vmem:[%s1302_s10 + $0x50] sm:$0xff] %v1314_v54 }
 0x134   : > { %v919_v61 = vadd.f32 %v918_v57, %v917_v55  ;;  %v638_v45 = vmul.f32 %v1314_v54, %v1314_v54 }
 0x135   : > { %v645_v62 = vadd.f32 %v644_v47, %v630_v59  ;;  %594 = vst [vmem:[%s1302_s10 + $0x18] sm:$0xff] %v895_v60  ;;  %v609_v63 = vadd.f32 %v895_v60, %v608_v58  ;;  %v631_v0 = vmul.f32 %v895_v60, %v895_v60 }
 0x136   : > { %602 = vst [vmem:[%s1302_s10 + $0x58] sm:$0xff] %v919_v61  ;;  %v639_v48 = vmul.f32 %v919_v61, %v919_v61 }
 0x137   : > { %v646_v1 = vadd.f32 %v645_v62, %v631_v0  ;;  %v896_v2 = vpop.f32.mrb[8].mxu0  ;;  %v920_v3 = vpop.f32.mrb[8].mxu1 }
 0x138   : > { %v897_v4 = vpop.f32.mrb[9].mxu0  ;;  %v921_v5 = vpop.f32.mrb[9].mxu1 }
 0x139   : > { %v898_v6 = vadd.f32 %v897_v4, %v896_v2  ;;  %v899_v7 = vpop.f32.mrb[10].mxu0  ;;  %v922_v8 = vadd.f32 %v921_v5, %v920_v3  ;;  %v923_v9 = vpop.f32.mrb[10].mxu1 }
 0x13a   : > { %v900_v10 = vpop.f32.mrb[11].mxu0  ;;  %v924_v11 = vpop.f32.mrb[11].mxu1 }
 0x13b   : > { %595 = vst [vmem:[%s1302_s10 + $0x20] sm:$0xff] %v898_v6  ;;  %v610_v12 = vadd.f32 %v898_v6, %v609_v63  ;;  %v632_v13 = vmul.f32 %v898_v6, %v898_v6  ;;  %v901_v14 = vadd.f32 %v900_v10, %v899_v7  ;;  %603 = vst [vmem:[%s1302_s10 + $0x60] sm:$0xff] %v922_v8 }
 0x13c   : > { %v925_v15 = vadd.f32 %v924_v11, %v923_v9  ;;  %v640_v52 = vmul.f32 %v922_v8, %v922_v8 }
 0x13d   : > { %v647_v16 = vadd.f32 %v646_v1, %v632_v13  ;;  %596 = vst [vmem:[%s1302_s10 + $0x28] sm:$0xff] %v901_v14  ;;  %v611_v17 = vadd.f32 %v901_v14, %v610_v12  ;;  %v633_v18 = vmul.f32 %v901_v14, %v901_v14 }
 0x13e   : > { %604 = vst [vmem:[%s1302_s10 + $0x68] sm:$0xff] %v925_v15  ;;  %v641_v56 = vmul.f32 %v925_v15, %v925_v15 }
 0x13f   : > { %v648_v19 = vadd.f32 %v647_v16, %v633_v18  ;;  %v902_v20 = vpop.f32.mrb[12].mxu0  ;;  %v926_v21 = vpop.f32.mrb[12].mxu1 }
 0x140   : > { %v903_v22 = vpop.f32.mrb[13].mxu0  ;;  %v927_v23 = vpop.f32.mrb[13].mxu1 }
 0x141   : > { %v904_v24 = vadd.f32 %v903_v22, %v902_v20  ;;  %v905_v25 = vpop.f32.mrb[14].mxu0  ;;  %v928_v26 = vadd.f32 %v927_v23, %v926_v21  ;;  %v929_v27 = vpop.f32.mrb[14].mxu1 }
 0x142   : > { %v906_v28 = vpop.f32.mrb[15].mxu0  ;;  %v930_v29 = vpop.f32.mrb[15].mxu1 }
 0x143   : > { %597 = vst [vmem:[%s1302_s10 + $0x30] sm:$0xff] %v904_v24  ;;  %v612_v30 = vadd.f32 %v904_v24, %v611_v17  ;;  %v634_v31 = vmul.f32 %v904_v24, %v904_v24  ;;  %v907_v32 = vadd.f32 %v906_v28, %v905_v25  ;;  %605 = vst [vmem:[%s1302_s10 + $0x70] sm:$0xff] %v928_v26 }
 0x144   : > { %v931_v33 = vadd.f32 %v930_v29, %v929_v27  ;;  %v642_v57 = vmul.f32 %v928_v26, %v928_v26 }
 0x145   : > { %v649_v34 = vadd.f32 %v648_v19, %v634_v31  ;;  %598 = vst [vmem:[%s1302_s10 + $0x38] sm:$0xff] %v907_v32  ;;  %v613_v35 = vadd.f32 %v907_v32, %v612_v30  ;;  %v635_v36 = vmul.f32 %v907_v32, %v907_v32 }
 0x146   : > { %606 = vst [vmem:[%s1302_s10 + $0x78] sm:$0xff] %v931_v33  ;;  %v643_v62 = vmul.f32 %v931_v33, %v931_v33 }
 0x147   : > { %v614_v39 = vadd.f32 %v1304_v38, %v613_v35  ;;  %v650_v40 = vadd.f32 %v649_v34, %v635_v36 }
 0x149   : > { %v615_v42 = vadd.f32 %v1309_v43, %v614_v39  ;;  %v651_v44 = vadd.f32 %v650_v40, %v636_v37 }
 0x14b   : > { %v652_v46 = vadd.f32 %v651_v44, %v637_v41  ;;  %v616_v47 = vadd.f32 %v1314_v54, %v615_v42 }
 0x14d   : > { %v617_v49 = vadd.f32 %v919_v61, %v616_v47  ;;  %v653_v50 = vadd.f32 %v652_v46, %v638_v45 }
 0x14f   : > { %v618_v51 = vadd.f32 %v922_v8, %v617_v49  ;;  %v654_v53 = vadd.f32 %v653_v50, %v639_v48 }
 0x151   : > { %v655_v38 = vadd.f32 %v654_v53, %v640_v52  ;;  %v619_v55 = vadd.f32 %v925_v15, %v618_v51 }
 0x153   : > { %v656_v58 = vadd.f32 %v655_v38, %v641_v56  ;;  %v620_v43 = vadd.f32 %v928_v26, %v619_v55 }
 0x155   : > { %v657_v59 = vadd.f32 %v656_v58, %v642_v57  ;;  %v621_v60 = vadd.f32 %v931_v33, %v620_v43 }
 0x157   : > { %v622_v63 = vrot.slane %v621_v60, 4  ;;  %v658_v0 = vadd.f32 %v657_v59, %v643_v62 }
 0x159   : > { %v623_v1 = vadd.f32 %v622_v63, %v621_v60  ;;  %v659_v54 = vrot.slane %v658_v0, 4 }
 0x15b   : > { %v624_v2 = vrot.slane %v623_v1, 2  ;;  %v660_v61 = vadd.f32 %v659_v54, %v658_v0 }
 0x15d   : > { %v625_v3 = vadd.f32 %v624_v2, %v623_v1  ;;  %v661_v4 = vrot.slane %v660_v61, 2 }
 0x15f   : > { %v626_v5 = vrot.slane %v625_v3, 1  ;;  %v662_v6 = vadd.f32 %v661_v4, %v660_v61 }
 0x161   : > { %v663_v7 = vrot.slane %v662_v6, 1  ;;  %v627_v8 = vadd.f32 %v626_v5, %v625_v3 }
 0x163   : > { %v664_v9 = vadd.f32 %v663_v7, %v662_v6 }
 0x165   : > { %v666_v10 = vsel %vm665_vm0, %v627_v8, %v664_v9 }
 0x166   : > { %v668_v11 = vsel %vm667_vm1, %v666_v10, 0.0 }
 0x167   : > { %669 = vst [vmem:[%s267_s20] sm:$0xff] %v668_v11 }
 0x168 PF: > { %s17_s17 = sadd.s32 1, %s1125_s17   ;;  %s1367_s12 = smov %s1109_s13 }
 0x169   : > { %p14_p7 = scmp.ge.s32.totalorder %s17_s17, 6   ;;  %s1368_s13 = smov %s1113_s14 }
 0x16a   : > { %s1369_s14 = smov %s1199_s24  ;;  %s1370_s15 = smov %s1121_s16 }
 0x16b   : > { %s1371_s16 = smov %s1373_s19  ;;  %16 = sbr.rel (!%p14_p7) target bundleno = 4 (0x4), region = 83 }
 0x172   :  { %717 = vsyncpa [#allocation3], 1 }
 0x173   :  { %719 = vsyncpa [#allocation3 + $0x1], 1 }

// kernel: forward.9
= control target key start
LH: loop header
LB: loop body
LE: loop exit
PB: predicated region body
PF: predicated region fallthrough
CT: control target
= control target key end

     0   :  { %v1655_v3 = vmov 0   ;;  %vm1519_vm0 = vcmask 1040384   ;;  %vm1528_vm1 = vcmask 1041408   ;;  %s2414_s1 = inlined_call_operand.vmem [shape: bf16[1,128,1024], index: 1, kind: input, shape index: {}]   ;;  %s2415_s0 = inlined_call_operand.vmem [shape: bf16[1,128,128], index: 0, kind: input, shape index: {}]   ;;  %s2416_s2 = inlined_call_operand.vmem [shape: f32[1,128,1024], index: 2, kind: output, shape index: {0}]   ;;  %s2417_s3 = inlined_call_operand.vmem [shape: f32[1,8,1024], index: 3, kind: output, shape index: {1}]  }
   0x1   :  { %v43_v0 = vld [vmem:[%s2414_s1] sm:$0xff]  ;;  %v44_v2 = vld [vmem:[%s2414_s1 + $0x8] sm:$0xff]  ;;  %507 = vmatprep.mubr.bf16.mxu0 %v1655_v3  ;;  %620 = vmatprep.mubr.bf16.mxu1 %v1655_v3  ;;  %v45_v63 = vld [vmem:[%s2414_s1 + $0x10] sm:$0xff] }
   0x2   :  { %v47_v1 = vld [vmem:[%s2414_s1 + $0x20] sm:$0xff]  ;;  %v48_v5 = vld [vmem:[%s2414_s1 + $0x28] sm:$0xff] }
   0x3   :  { %v1583_v4 = vcombine.high %v43_v0, %v47_v1  ;;  %v1582_v6 = vcombine.low %v43_v0, %v47_v1  ;;  %v51_v7 = vld [vmem:[%s2414_s1 + $0x40] sm:$0xff]  ;;  %v1585_v9 = vcombine.high %v44_v2, %v48_v5  ;;  %v1584_v10 = vcombine.low %v44_v2, %v48_v5  ;;  %v52_v12 = vld [vmem:[%s2414_s1 + $0x48] sm:$0xff]  ;;  %v49_v0 = vld [vmem:[%s2414_s1 + $0x30] sm:$0xff] }
   0x4   :  { %v55_v8 = vld [vmem:[%s2414_s1 + $0x60] sm:$0xff]  ;;  %v56_v13 = vld [vmem:[%s2414_s1 + $0x68] sm:$0xff]  ;;  %v46_v1 = vld [vmem:[%s2414_s1 + $0x18] sm:$0xff] }
   0x5   :  { %v1591_v11 = vcombine.high %v51_v7, %v55_v8  ;;  %v59_v14 = vld [vmem:[%s2414_s1 + $0x80] sm:$0xff]  ;;  %475 = vmatprep.subr.bf16.mxu0 %v1583_v4  ;;  %v1593_v15 = vcombine.high %v52_v12, %v56_v13  ;;  %v60_v17 = vld [vmem:[%s2414_s1 + $0x88] sm:$0xff]  ;;  %588 = vmatprep.subr.bf16.mxu1 %v1585_v9  ;;  %v1590_v19 = vcombine.low %v51_v7, %v55_v8  ;;  %v50_v2 = vld [vmem:[%s2414_s1 + $0x38] sm:$0xff] }
   0x6   :  { %v63_v16 = vld [vmem:[%s2414_s1 + $0xa0] sm:$0xff]  ;;  %v64_v18 = vld [vmem:[%s2414_s1 + $0xa8] sm:$0xff]  ;;  %476 = vmatpush1.bf16.msra.mxu0 %v1582_v6  ;;  %589 = vmatpush1.bf16.msra.mxu1 %v1584_v10  ;;  %v1592_v20 = vcombine.low %v52_v12, %v56_v13  ;;  %v1587_v6 = vcombine.high %v45_v63, %v49_v0  ;;  %v1589_v7 = vcombine.high %v46_v1, %v50_v2  ;;  %v53_v9 = vld [vmem:[%s2414_s1 + $0x50] sm:$0xff] }
   0x7   :  { %477 = vmatprep.subr.bf16.mxu0 %v1591_v11  ;;  %v1599_v21 = vcombine.high %v59_v14, %v63_v16  ;;  %590 = vmatprep.subr.bf16.mxu1 %v1593_v15  ;;  %v1601_v22 = vcombine.high %v60_v17, %v64_v18  ;;  %v67_v23 = vld [vmem:[%s2414_s1 + $0xc0] sm:$0xff]  ;;  %v68_v25 = vld [vmem:[%s2414_s1 + $0xc8] sm:$0xff]  ;;  %v1598_v27 = vcombine.low %v59_v14, %v63_v16  ;;  %v57_v10 = vld [vmem:[%s2414_s1 + $0x70] sm:$0xff] }
   0x8   :  { %v71_v24 = vld [vmem:[%s2414_s1 + $0xe0] sm:$0xff]  ;;  %v72_v26 = vld [vmem:[%s2414_s1 + $0xe8] sm:$0xff]  ;;  %v1600_v28 = vcombine.low %v60_v17, %v64_v18  ;;  %v1586_v11 = vcombine.low %v45_v63, %v49_v0  ;;  %v54_v12 = vld [vmem:[%s2414_s1 + $0x58] sm:$0xff]  ;;  %v1588_v14 = vcombine.low %v46_v1, %v50_v2  ;;  %v1595_v15 = vcombine.high %v53_v9, %v57_v10 }
   0x9   :  { %v1607_v29 = vcombine.high %v67_v23, %v71_v24  ;;  %v1609_v30 = vcombine.high %v68_v25, %v72_v26  ;;  %v75_v31 = vld [vmem:[%s2414_s1 + $0x100] sm:$0xff]  ;;  %v76_v33 = vld [vmem:[%s2414_s1 + $0x108] sm:$0xff]  ;;  %v1606_v35 = vcombine.low %v67_v23, %v71_v24  ;;  %v1608_v36 = vcombine.low %v68_v25, %v72_v26  ;;  %v58_v13 = vld [vmem:[%s2414_s1 + $0x78] sm:$0xff] }
   0xa   :  { %478 = vmatpush1.bf16.msra.mxu0 %v1590_v19  ;;  %591 = vmatpush1.bf16.msra.mxu1 %v1592_v20  ;;  %v79_v32 = vld [vmem:[%s2414_s1 + $0x120] sm:$0xff]  ;;  %v80_v34 = vld [vmem:[%s2414_s1 + $0x128] sm:$0xff]  ;;  %v61_v16 = vld [vmem:[%s2414_s1 + $0x90] sm:$0xff]  ;;  %v1597_v18 = vcombine.high %v54_v12, %v58_v13 }
   0xb   :  { %479 = vmatprep.subr.bf16.mxu0 %v1599_v21  ;;  %592 = vmatprep.subr.bf16.mxu1 %v1601_v22  ;;  %v1615_v37 = vcombine.high %v75_v31, %v79_v32  ;;  %v1617_v38 = vcombine.high %v76_v33, %v80_v34  ;;  %v83_v39 = vld [vmem:[%s2414_s1 + $0x140] sm:$0xff]  ;;  %v84_v41 = vld [vmem:[%s2414_s1 + $0x148] sm:$0xff]  ;;  %v1614_v43 = vcombine.low %v75_v31, %v79_v32  ;;  %v65_v17 = vld [vmem:[%s2414_s1 + $0xb0] sm:$0xff] }
   0xc   :  { %v87_v40 = vld [vmem:[%s2414_s1 + $0x160] sm:$0xff]  ;;  %v88_v42 = vld [vmem:[%s2414_s1 + $0x168] sm:$0xff]  ;;  %v1616_v44 = vcombine.low %v76_v33, %v80_v34  ;;  %v62_v19 = vld [vmem:[%s2414_s1 + $0x98] sm:$0xff]  ;;  %v1594_v21 = vcombine.low %v53_v9, %v57_v10  ;;  %v1596_v22 = vcombine.low %v54_v12, %v58_v13  ;;  %v1603_v23 = vcombine.high %v61_v16, %v65_v17 }
   0xd   :  { %v1623_v45 = vcombine.high %v83_v39, %v87_v40  ;;  %v1625_v46 = vcombine.high %v84_v41, %v88_v42  ;;  %v91_v47 = vld [vmem:[%s2414_s1 + $0x180] sm:$0xff]  ;;  %v92_v49 = vld [vmem:[%s2414_s1 + $0x188] sm:$0xff]  ;;  %v1622_v51 = vcombine.low %v83_v39, %v87_v40  ;;  %v1624_v52 = vcombine.low %v84_v41, %v88_v42  ;;  %v66_v20 = vld [vmem:[%s2414_s1 + $0xb8] sm:$0xff] }
   0xe   :  { %480 = vmatpush1.bf16.msra.mxu0 %v1598_v27  ;;  %593 = vmatpush1.bf16.msra.mxu1 %v1600_v28  ;;  %v95_v48 = vld [vmem:[%s2414_s1 + $0x1a0] sm:$0xff]  ;;  %v96_v50 = vld [vmem:[%s2414_s1 + $0x1a8] sm:$0xff]  ;;  %v1605_v24 = vcombine.high %v62_v19, %v66_v20  ;;  %v69_v26 = vld [vmem:[%s2414_s1 + $0xd0] sm:$0xff]  ;;  %v1604_v31 = vcombine.low %v62_v19, %v66_v20 }
   0xf   :  { %481 = vmatprep.subr.bf16.mxu0 %v1607_v29  ;;  %594 = vmatprep.subr.bf16.mxu1 %v1609_v30  ;;  %v1631_v53 = vcombine.high %v91_v47, %v95_v48  ;;  %v99_v54 = vld [vmem:[%s2414_s1 + $0x1c0] sm:$0xff]  ;;  %v1633_v55 = vcombine.high %v92_v49, %v96_v50  ;;  %v100_v57 = vld [vmem:[%s2414_s1 + $0x1c8] sm:$0xff]  ;;  %v1630_v59 = vcombine.low %v91_v47, %v95_v48  ;;  %v73_v27 = vld [vmem:[%s2414_s1 + $0xf0] sm:$0xff] }
  0x10   :  { %v103_v56 = vld [vmem:[%s2414_s1 + $0x1e0] sm:$0xff]  ;;  %v104_v58 = vld [vmem:[%s2414_s1 + $0x1e8] sm:$0xff]  ;;  %v1632_v60 = vcombine.low %v92_v49, %v96_v50  ;;  %v70_v28 = vld [vmem:[%s2414_s1 + $0xd8] sm:$0xff]  ;;  %v1602_v30 = vcombine.low %v61_v16, %v65_v17  ;;  %v1611_v32 = vcombine.high %v69_v26, %v73_v27 }
  0x11   :  { %v1639_v61 = vcombine.high %v99_v54, %v103_v56  ;;  %v1641_v62 = vcombine.high %v100_v57, %v104_v58  ;;  %v1638_v4 = vcombine.low %v99_v54, %v103_v56  ;;  %v1640_v5 = vcombine.low %v100_v57, %v104_v58  ;;  %v1789_v8 = vld [vmem:[%s2415_s0] sm:$0xff]   ;;  %v1822_v25 = vld [vmem:[%s2415_s0 + $0x8] sm:$0xff]   ;;  %v74_v29 = vld [vmem:[%s2414_s1 + $0xf8] sm:$0xff] }
  0x12   :  { %482 = vmatpush1.bf16.msra.mxu0 %v1606_v35  ;;  %595 = vmatpush1.bf16.msra.mxu1 %v1608_v36  ;;  %v1613_v33 = vcombine.high %v70_v28, %v74_v29  ;;  %v77_v34 = vld [vmem:[%s2414_s1 + $0x110] sm:$0xff]  ;;  %v78_v36 = vld [vmem:[%s2414_s1 + $0x118] sm:$0xff]  ;;  %v1612_v39 = vcombine.low %v70_v28, %v74_v29  ;;  %v1652_v9 = vld [vmem:[%s2415_s0 + $0x28] sm:$0xff]  }
  0x13   :  { %483 = vmatprep.subr.bf16.mxu0 %v1615_v37  ;;  %596 = vmatprep.subr.bf16.mxu1 %v1617_v38  ;;  %v81_v35 = vld [vmem:[%s2414_s1 + $0x130] sm:$0xff]  ;;  %v82_v37 = vld [vmem:[%s2414_s1 + $0x138] sm:$0xff]  ;;  %v1610_v38 = vcombine.low %v69_v26, %v73_v27 }
  0x14   :  { %v1619_v40 = vcombine.high %v77_v34, %v81_v35  ;;  %v1855_v41 = vld [vmem:[%s2415_s0 + $0x10] sm:$0xff]   ;;  %v1621_v42 = vcombine.high %v78_v36, %v82_v37  ;;  %v1618_v47 = vcombine.low %v77_v34, %v81_v35  ;;  %v1620_v48 = vcombine.low %v78_v36, %v82_v37  ;;  %v98_v54 = vld [vmem:[%s2414_s1 + $0x1b8] sm:$0xff] }
  0x15   :  { %v1650_v58 = vld [vmem:[%s2415_s0 + $0x18] sm:$0xff]   ;;  %v1653_v10 = vld [vmem:[%s2415_s0 + $0x30] sm:$0xff]  }
  0x16   :  { %484 = vmatpush1.bf16.msra.mxu0 %v1614_v43  ;;  %597 = vmatpush1.bf16.msra.mxu1 %v1616_v44  ;;  %v85_v43 = vld [vmem:[%s2414_s1 + $0x150] sm:$0xff]  ;;  %v106_v63 = vld [vmem:[%s2414_s1 + $0x1f8] sm:$0xff] }
  0x17   :  { %485 = vmatprep.subr.bf16.mxu0 %v1623_v45  ;;  %598 = vmatprep.subr.bf16.mxu1 %v1625_v46  ;;  %v89_v44 = vld [vmem:[%s2414_s1 + $0x170] sm:$0xff]  ;;  %v86_v45 = vld [vmem:[%s2414_s1 + $0x158] sm:$0xff] }
  0x18   :  { %v90_v46 = vld [vmem:[%s2414_s1 + $0x178] sm:$0xff]  ;;  %v1627_v49 = vcombine.high %v85_v43, %v89_v44 }
  0x19   :  { %v1629_v50 = vcombine.high %v86_v45, %v90_v46  ;;  %v1628_v56 = vcombine.low %v86_v45, %v90_v46 }
  0x1a   :  { %486 = vmatpush1.bf16.msra.mxu0 %v1622_v51  ;;  %599 = vmatpush1.bf16.msra.mxu1 %v1624_v52  ;;  %v93_v51 = vld [vmem:[%s2414_s1 + $0x190] sm:$0xff] }
  0x1b   :  { %487 = vmatprep.subr.bf16.mxu0 %v1631_v53  ;;  %600 = vmatprep.subr.bf16.mxu1 %v1633_v55  ;;  %v97_v52 = vld [vmem:[%s2414_s1 + $0x1b0] sm:$0xff]  ;;  %v94_v53 = vld [vmem:[%s2414_s1 + $0x198] sm:$0xff]  ;;  %v1626_v55 = vcombine.low %v85_v43, %v89_v44 }
  0x1c   :  { %v1635_v57 = vcombine.high %v93_v51, %v97_v52  ;;  %v1634_v0 = vcombine.low %v93_v51, %v97_v52  ;;  %v1636_v1 = vcombine.low %v94_v53, %v98_v54 }
  0x1e   :  { %488 = vmatpush1.bf16.msra.mxu0 %v1630_v59  ;;  %601 = vmatpush1.bf16.msra.mxu1 %v1632_v60  ;;  %v1637_v59 = vcombine.high %v94_v53, %v98_v54  ;;  %v101_v60 = vld [vmem:[%s2414_s1 + $0x1d0] sm:$0xff] }
  0x1f   :  { %489 = vmatprep.subr.bf16.mxu0 %v1639_v61  ;;  %602 = vmatprep.subr.bf16.mxu1 %v1641_v62  ;;  %v105_v61 = vld [vmem:[%s2414_s1 + $0x1f0] sm:$0xff]  ;;  %v102_v62 = vld [vmem:[%s2414_s1 + $0x1d8] sm:$0xff] }
  0x20   :  { %v1643_v2 = vcombine.high %v101_v60, %v105_v61 }
  0x22   :  { %490 = vmatpush1.bf16.msra.mxu0 %v1638_v4  ;;  %603 = vmatpush1.bf16.msra.mxu1 %v1640_v5  ;;  %v1645_v4 = vcombine.high %v102_v62, %v106_v63  ;;  %v1642_v5 = vcombine.low %v101_v60, %v105_v61 }
  0x23   :  { %701 = vmatprep.subr.bf16.mxu0 %v1587_v6  ;;  %814 = vmatprep.subr.bf16.mxu1 %v1589_v7  ;;  %v1644_v6 = vcombine.low %v102_v62, %v106_v63  ;;  %v1651_v7 = vld [vmem:[%s2415_s0 + $0x20] sm:$0xff]  }
  0x25   :  { %508 = vmatmul.mubr.bf16.vlgmr.msra.gmra.mrb[0].mxu0 %v1789_v8  ;;  %621 = vmatmul.mubr.bf16.vlgmr.msra.gmra.mrb[0].mxu1 %v1789_v8 }
  0x26   :  { %702 = vmatpush1.bf16.msra.mxu0 %v1586_v11  ;;  %815 = vmatpush1.bf16.msra.mxu1 %v1588_v14  ;;  %v1654_v11 = vld [vmem:[%s2415_s0 + $0x38] sm:$0xff]  }
  0x27   :  { %517 = vmatprep.mubr.bf16.mxu0 %v1655_v3  ;;  %630 = vmatprep.mubr.bf16.mxu1 %v1655_v3 }
  0x28   :  { %703 = vmatprep.subr.bf16.mxu0 %v1595_v15  ;;  %816 = vmatprep.subr.bf16.mxu1 %v1597_v18 }
  0x2a   :  { %704 = vmatpush1.bf16.msra.mxu0 %v1594_v21  ;;  %817 = vmatpush1.bf16.msra.mxu1 %v1596_v22 }
  0x2b   :  { %705 = vmatprep.subr.bf16.mxu0 %v1603_v23  ;;  %818 = vmatprep.subr.bf16.mxu1 %v1605_v24 }
  0x2d   :  { %518 = vmatmul.mubr.bf16.gmra.mrb[4].mxu0 %v1822_v25  ;;  %631 = vmatmul.mubr.bf16.gmra.mrb[4].mxu1 %v1822_v25 }
  0x2e   :  { %527 = vmatprep.mubr.bf16.mxu0 %v1655_v3  ;;  %640 = vmatprep.mubr.bf16.mxu1 %v1655_v3 }
  0x2f   :  { %706 = vmatpush1.bf16.msra.mxu0 %v1602_v30  ;;  %819 = vmatpush1.bf16.msra.mxu1 %v1604_v31 }
  0x30   :  { %707 = vmatprep.subr.bf16.mxu0 %v1611_v32  ;;  %820 = vmatprep.subr.bf16.mxu1 %v1613_v33 }
  0x33   :  { %708 = vmatpush1.bf16.msra.mxu0 %v1610_v38  ;;  %821 = vmatpush1.bf16.msra.mxu1 %v1612_v39 }
  0x34   :  { %709 = vmatprep.subr.bf16.mxu0 %v1619_v40  ;;  %822 = vmatprep.subr.bf16.mxu1 %v1621_v42 }
  0x35   :  { %528 = vmatmul.mubr.bf16.gmra.mrb[8].mxu0 %v1855_v41  ;;  %641 = vmatmul.mubr.bf16.gmra.mrb[8].mxu1 %v1855_v41 }
  0x36   :  { %537 = vmatprep.mubr.bf16.mxu0 %v1655_v3  ;;  %650 = vmatprep.mubr.bf16.mxu1 %v1655_v3 }
  0x37   :  { %710 = vmatpush1.bf16.msra.mxu0 %v1618_v47  ;;  %823 = vmatpush1.bf16.msra.mxu1 %v1620_v48 }
  0x38   :  { %711 = vmatprep.subr.bf16.mxu0 %v1627_v49  ;;  %824 = vmatprep.subr.bf16.mxu1 %v1629_v50 }
  0x3b   :  { %712 = vmatpush1.bf16.msra.mxu0 %v1626_v55  ;;  %825 = vmatpush1.bf16.msra.mxu1 %v1628_v56 }
  0x3c   :  { %713 = vmatprep.subr.bf16.mxu0 %v1635_v57  ;;  %826 = vmatprep.subr.bf16.mxu1 %v1637_v59 }
  0x3d   :  { %538 = vmatmul.mubr.bf16.gmra.mrb[12].mxu0 %v1650_v58  ;;  %651 = vmatmul.mubr.bf16.gmra.mrb[12].mxu1 %v1650_v58 }
  0x3e   :  { %547 = vmatprep.mubr.bf16.mxu0 %v1655_v3  ;;  %660 = vmatprep.mubr.bf16.mxu1 %v1655_v3 }
  0x3f   :  { %714 = vmatpush1.bf16.msra.mxu0 %v1634_v0  ;;  %827 = vmatpush1.bf16.msra.mxu1 %v1636_v1 }
  0x40   :  { %715 = vmatprep.subr.bf16.mxu0 %v1643_v2  ;;  %828 = vmatprep.subr.bf16.mxu1 %v1645_v4 }
  0x43   :  { %716 = vmatpush1.bf16.msra.mxu0 %v1642_v5  ;;  %829 = vmatpush1.bf16.msra.mxu1 %v1644_v6 }
  0x45   :  { %548 = vmatmul.mubr.bf16.gmra.mrb[16].mxu0 %v1651_v7  ;;  %661 = vmatmul.mubr.bf16.gmra.mrb[16].mxu1 %v1651_v7 }
  0x46   :  { %557 = vmatprep.mubr.bf16.mxu0 %v1655_v3  ;;  %670 = vmatprep.mubr.bf16.mxu1 %v1655_v3 }
  0x4d   :  { %558 = vmatmul.mubr.bf16.gmra.mrb[20].mxu0 %v1652_v9  ;;  %671 = vmatmul.mubr.bf16.gmra.mrb[20].mxu1 %v1652_v9 }
  0x4e   :  { %567 = vmatprep.mubr.bf16.mxu0 %v1655_v3  ;;  %680 = vmatprep.mubr.bf16.mxu1 %v1655_v3 }
  0x55   :  { %568 = vmatmul.mubr.bf16.gmra.mrb[24].mxu0 %v1653_v10  ;;  %681 = vmatmul.mubr.bf16.gmra.mrb[24].mxu1 %v1653_v10 }
  0x56   :  { %577 = vmatprep.mubr.bf16.mxu0 %v1655_v3  ;;  %690 = vmatprep.mubr.bf16.mxu1 %v1655_v3 }
  0x5d   :  { %578 = vmatmul.mubr.bf16.gmra.mrb[28].mxu0 %v1654_v11  ;;  %691 = vmatmul.mubr.bf16.gmra.mrb[28].mxu1 %v1654_v11 }
  0x5e   :  { %733 = vmatprep.mubr.bf16.mxu0 %v1655_v3  ;;  %846 = vmatprep.mubr.bf16.mxu1 %v1655_v3 }
  0x65   :  { %734 = vmatmul.mubr.bf16.vlgmr.msra.gmra.mrb[32].mxu0 %v1789_v8  ;;  %847 = vmatmul.mubr.bf16.vlgmr.msra.gmra.mrb[32].mxu1 %v1789_v8 }
  0x66   :  { %743 = vmatprep.mubr.bf16.mxu0 %v1655_v3  ;;  %856 = vmatprep.mubr.bf16.mxu1 %v1655_v3 }
  0x6d   :  { %744 = vmatmul.mubr.bf16.gmra.mrb[36].mxu0 %v1822_v25  ;;  %857 = vmatmul.mubr.bf16.gmra.mrb[36].mxu1 %v1822_v25 }
  0x6e   :  { %753 = vmatprep.mubr.bf16.mxu0 %v1655_v3  ;;  %866 = vmatprep.mubr.bf16.mxu1 %v1655_v3 }
  0x75   :  { %754 = vmatmul.mubr.bf16.gmra.mrb[40].mxu0 %v1855_v41  ;;  %867 = vmatmul.mubr.bf16.gmra.mrb[40].mxu1 %v1855_v41 }
  0x76   :  { %763 = vmatprep.mubr.bf16.mxu0 %v1655_v3  ;;  %876 = vmatprep.mubr.bf16.mxu1 %v1655_v3 }
  0x7d   :  { %764 = vmatmul.mubr.bf16.gmra.mrb[44].mxu0 %v1650_v58  ;;  %877 = vmatmul.mubr.bf16.gmra.mrb[44].mxu1 %v1650_v58 }
  0x7e   :  { %773 = vmatprep.mubr.bf16.mxu0 %v1655_v3  ;;  %886 = vmatprep.mubr.bf16.mxu1 %v1655_v3 }
  0x85   :  { %774 = vmatmul.mubr.bf16.gmra.mrb[48].mxu0 %v1651_v7  ;;  %887 = vmatmul.mubr.bf16.gmra.mrb[48].mxu1 %v1651_v7 }
  0x86   :  { %783 = vmatprep.mubr.bf16.mxu0 %v1655_v3  ;;  %896 = vmatprep.mubr.bf16.mxu1 %v1655_v3 }
  0x8d   :  { %784 = vmatmul.mubr.bf16.gmra.mrb[52].mxu0 %v1652_v9  ;;  %897 = vmatmul.mubr.bf16.gmra.mrb[52].mxu1 %v1652_v9 }
  0x8e   :  { %793 = vmatprep.mubr.bf16.mxu0 %v1655_v3  ;;  %906 = vmatprep.mubr.bf16.mxu1 %v1655_v3 }
  0x95   :  { %794 = vmatmul.mubr.bf16.gmra.mrb[56].mxu0 %v1653_v10  ;;  %907 = vmatmul.mubr.bf16.gmra.mrb[56].mxu1 %v1653_v10 }
  0x96   :  { %803 = vmatprep.mubr.bf16.mxu0 %v1655_v3  ;;  %916 = vmatprep.mubr.bf16.mxu1 %v1655_v3 }
  0x9d   :  { %804 = vmatmul.mubr.bf16.gmra.mrb[60].mxu0 %v1654_v11  ;;  %917 = vmatmul.mubr.bf16.gmra.mrb[60].mxu1 %v1654_v11 }
  0xf8   :  { %v509_v8 = vpop.f32.mrb[0].mxu0  ;;  %v622_v12 = vpop.f32.mrb[0].mxu1 }
  0xf9   :  { %927 = vst [vmem:[%s2416_s2] sm:$0xff] %v509_v8  ;;  %v511_v13 = vpop.f32.mrb[1].mxu0  ;;  %v1223_v14 = vmul.f32 %v509_v8, %v509_v8  ;;  %929 = vst [vmem:[%s2416_s2 + $0x10] sm:$0xff] %v622_v12  ;;  %v624_v15 = vpop.f32.mrb[1].mxu1  ;;  %v1225_v16 = vmul.f32 %v622_v12, %v622_v12 }
  0xfa   :  { %928 = vst [vmem:[%s2416_s2 + $0x8] sm:$0xff] %v511_v13  ;;  %v513_v3 = vpop.f32.mrb[2].mxu0  ;;  %v1224_v17 = vmul.f32 %v511_v13, %v511_v13  ;;  %930 = vst [vmem:[%s2416_s2 + $0x18] sm:$0xff] %v624_v15  ;;  %v626_v20 = vpop.f32.mrb[2].mxu1  ;;  %v1226_v27 = vmul.f32 %v624_v15, %v624_v15 }
  0xfb   :  { %935 = vst [vmem:[%s2416_s2 + $0x40] sm:$0xff] %v513_v3  ;;  %v1055_v18 = vadd.f32 %v513_v3, %v509_v8  ;;  %v1231_v19 = vmul.f32 %v513_v3, %v513_v3  ;;  %v515_v21 = vpop.f32.mrb[3].mxu0  ;;  %937 = vst [vmem:[%s2416_s2 + $0x50] sm:$0xff] %v626_v20  ;;  %v1097_v22 = vadd.f32 %v626_v20, %v622_v12  ;;  %v628_v26 = vpop.f32.mrb[3].mxu1 }
  0xfc   :  { %v1233_v23 = vmul.f32 %v626_v20, %v626_v20  ;;  %936 = vst [vmem:[%s2416_s2 + $0x48] sm:$0xff] %v515_v21  ;;  %v1076_v24 = vadd.f32 %v515_v21, %v511_v13  ;;  %v1232_v25 = vmul.f32 %v515_v21, %v515_v21  ;;  %938 = vst [vmem:[%s2416_s2 + $0x58] sm:$0xff] %v628_v26 }
  0xfd   :  { %v1351_v28 = vadd.f32 %v1231_v19, %v1223_v14  ;;  %v1118_v29 = vadd.f32 %v628_v26, %v624_v15  ;;  %v1234_v30 = vmul.f32 %v628_v26, %v628_v26 }
  0xfe   :  { %v1393_v31 = vadd.f32 %v1233_v23, %v1225_v16  ;;  %v1372_v32 = vadd.f32 %v1232_v25, %v1224_v17 }
  0xff   :  { %v1414_v33 = vadd.f32 %v1234_v30, %v1226_v27 }
 0x100   :  { %v519_v34 = vpop.f32.mrb[4].mxu0  ;;  %v632_v37 = vpop.f32.mrb[4].mxu1 }
 0x101   :  { %943 = vst [vmem:[%s2416_s2 + $0x80] sm:$0xff] %v519_v34  ;;  %v1056_v35 = vadd.f32 %v1055_v18, %v519_v34  ;;  %v1239_v36 = vmul.f32 %v519_v34, %v519_v34  ;;  %v521_v38 = vpop.f32.mrb[5].mxu0  ;;  %945 = vst [vmem:[%s2416_s2 + $0x90] sm:$0xff] %v632_v37  ;;  %v1098_v39 = vadd.f32 %v1097_v22, %v632_v37  ;;  %v634_v43 = vpop.f32.mrb[5].mxu1 }
 0x102   :  { %v1241_v40 = vmul.f32 %v632_v37, %v632_v37  ;;  %944 = vst [vmem:[%s2416_s2 + $0x88] sm:$0xff] %v521_v38  ;;  %v1077_v41 = vadd.f32 %v1076_v24, %v521_v38  ;;  %v1240_v42 = vmul.f32 %v521_v38, %v521_v38  ;;  %v523_v44 = vpop.f32.mrb[6].mxu0  ;;  %946 = vst [vmem:[%s2416_s2 + $0x98] sm:$0xff] %v634_v43  ;;  %v636_v49 = vpop.f32.mrb[6].mxu1 }
 0x103   :  { %v1352_v45 = vadd.f32 %v1351_v28, %v1239_v36  ;;  %v1119_v46 = vadd.f32 %v1118_v29, %v634_v43  ;;  %v1242_v47 = vmul.f32 %v634_v43, %v634_v43  ;;  %951 = vst [vmem:[%s2416_s2 + $0xc0] sm:$0xff] %v523_v44  ;;  %v1057_v48 = vadd.f32 %v1056_v35, %v523_v44  ;;  %v525_v50 = vpop.f32.mrb[7].mxu0  ;;  %v638_v55 = vpop.f32.mrb[7].mxu1 }
 0x104   :  { %v1394_v51 = vadd.f32 %v1393_v31, %v1241_v40  ;;  %v1373_v52 = vadd.f32 %v1372_v32, %v1240_v42  ;;  %v1247_v53 = vmul.f32 %v523_v44, %v523_v44  ;;  %953 = vst [vmem:[%s2416_s2 + $0xd0] sm:$0xff] %v636_v49  ;;  %v1099_v54 = vadd.f32 %v1098_v39, %v636_v49 }
 0x105   :  { %952 = vst [vmem:[%s2416_s2 + $0xc8] sm:$0xff] %v525_v50  ;;  %v1415_v56 = vadd.f32 %v1414_v33, %v1242_v47  ;;  %v1249_v57 = vmul.f32 %v636_v49, %v636_v49  ;;  %v1078_v58 = vadd.f32 %v1077_v41, %v525_v50  ;;  %v1248_v59 = vmul.f32 %v525_v50, %v525_v50 }
 0x106   :  { %954 = vst [vmem:[%s2416_s2 + $0xd8] sm:$0xff] %v638_v55  ;;  %v1353_v60 = vadd.f32 %v1352_v45, %v1247_v53  ;;  %v1120_v61 = vadd.f32 %v1119_v46, %v638_v55  ;;  %v1250_v62 = vmul.f32 %v638_v55, %v638_v55 }
 0x107   :  { %v1395_v63 = vadd.f32 %v1394_v51, %v1249_v57  ;;  %v1374_v0 = vadd.f32 %v1373_v52, %v1248_v59 }
 0x108   :  { %v1416_v1 = vadd.f32 %v1415_v56, %v1250_v62  ;;  %v529_v2 = vpop.f32.mrb[8].mxu0  ;;  %v642_v6 = vpop.f32.mrb[8].mxu1 }
 0x109   :  { %959 = vst [vmem:[%s2416_s2 + $0x100] sm:$0xff] %v529_v2  ;;  %v1058_v4 = vadd.f32 %v1057_v48, %v529_v2  ;;  %v1255_v5 = vmul.f32 %v529_v2, %v529_v2  ;;  %v531_v7 = vpop.f32.mrb[9].mxu0  ;;  %961 = vst [vmem:[%s2416_s2 + $0x110] sm:$0xff] %v642_v6  ;;  %v1100_v9 = vadd.f32 %v1099_v54, %v642_v6  ;;  %v644_v12 = vpop.f32.mrb[9].mxu1 }
 0x10a   :  { %v1257_v10 = vmul.f32 %v642_v6, %v642_v6  ;;  %960 = vst [vmem:[%s2416_s2 + $0x108] sm:$0xff] %v531_v7  ;;  %v1079_v11 = vadd.f32 %v1078_v58, %v531_v7  ;;  %v1256_v8 = vmul.f32 %v531_v7, %v531_v7  ;;  %v533_v13 = vpop.f32.mrb[10].mxu0  ;;  %962 = vst [vmem:[%s2416_s2 + $0x118] sm:$0xff] %v644_v12  ;;  %v646_v17 = vpop.f32.mrb[10].mxu1 }
 0x10b   :  { %v1354_v14 = vadd.f32 %v1353_v60, %v1255_v5  ;;  %v1121_v15 = vadd.f32 %v1120_v61, %v644_v12  ;;  %v1258_v3 = vmul.f32 %v644_v12, %v644_v12  ;;  %967 = vst [vmem:[%s2416_s2 + $0x140] sm:$0xff] %v533_v13  ;;  %v1059_v16 = vadd.f32 %v1058_v4, %v533_v13  ;;  %v535_v18 = vpop.f32.mrb[11].mxu0  ;;  %v648_v23 = vpop.f32.mrb[11].mxu1 }
 0x10c   :  { %v1396_v19 = vadd.f32 %v1395_v63, %v1257_v10  ;;  %v1375_v20 = vadd.f32 %v1374_v0, %v1256_v8  ;;  %v1263_v21 = vmul.f32 %v533_v13, %v533_v13  ;;  %969 = vst [vmem:[%s2416_s2 + $0x150] sm:$0xff] %v646_v17  ;;  %v1101_v22 = vadd.f32 %v1100_v9, %v646_v17 }
 0x10d   :  { %968 = vst [vmem:[%s2416_s2 + $0x148] sm:$0xff] %v535_v18  ;;  %v1417_v24 = vadd.f32 %v1416_v1, %v1258_v3  ;;  %v1265_v25 = vmul.f32 %v646_v17, %v646_v17  ;;  %v1080_v26 = vadd.f32 %v1079_v11, %v535_v18  ;;  %v1264_v27 = vmul.f32 %v535_v18, %v535_v18 }
 0x10e   :  { %970 = vst [vmem:[%s2416_s2 + $0x158] sm:$0xff] %v648_v23  ;;  %v1355_v28 = vadd.f32 %v1354_v14, %v1263_v21  ;;  %v1122_v29 = vadd.f32 %v1121_v15, %v648_v23  ;;  %v1266_v30 = vmul.f32 %v648_v23, %v648_v23 }
 0x10f   :  { %v1397_v31 = vadd.f32 %v1396_v19, %v1265_v25  ;;  %v1376_v32 = vadd.f32 %v1375_v20, %v1264_v27 }
 0x110   :  { %v1418_v33 = vadd.f32 %v1417_v24, %v1266_v30  ;;  %v539_v34 = vpop.f32.mrb[12].mxu0  ;;  %v652_v37 = vpop.f32.mrb[12].mxu1 }
 0x111   :  { %975 = vst [vmem:[%s2416_s2 + $0x180] sm:$0xff] %v539_v34  ;;  %v1060_v35 = vadd.f32 %v1059_v16, %v539_v34  ;;  %v1271_v36 = vmul.f32 %v539_v34, %v539_v34  ;;  %v541_v38 = vpop.f32.mrb[13].mxu0  ;;  %977 = vst [vmem:[%s2416_s2 + $0x190] sm:$0xff] %v652_v37  ;;  %v1102_v39 = vadd.f32 %v1101_v22, %v652_v37  ;;  %v654_v43 = vpop.f32.mrb[13].mxu1 }
 0x112   :  { %v1273_v40 = vmul.f32 %v652_v37, %v652_v37  ;;  %976 = vst [vmem:[%s2416_s2 + $0x188] sm:$0xff] %v541_v38  ;;  %v1081_v41 = vadd.f32 %v1080_v26, %v541_v38  ;;  %v1272_v42 = vmul.f32 %v541_v38, %v541_v38  ;;  %v543_v44 = vpop.f32.mrb[14].mxu0  ;;  %978 = vst [vmem:[%s2416_s2 + $0x198] sm:$0xff] %v654_v43  ;;  %v656_v49 = vpop.f32.mrb[14].mxu1 }
 0x113   :  { %v1356_v45 = vadd.f32 %v1355_v28, %v1271_v36  ;;  %v1123_v46 = vadd.f32 %v1122_v29, %v654_v43  ;;  %v1274_v47 = vmul.f32 %v654_v43, %v654_v43  ;;  %983 = vst [vmem:[%s2416_s2 + $0x1c0] sm:$0xff] %v543_v44  ;;  %v1061_v48 = vadd.f32 %v1060_v35, %v543_v44  ;;  %v545_v50 = vpop.f32.mrb[15].mxu0  ;;  %v658_v55 = vpop.f32.mrb[15].mxu1 }
 0x114   :  { %v1398_v51 = vadd.f32 %v1397_v31, %v1273_v40  ;;  %v1377_v52 = vadd.f32 %v1376_v32, %v1272_v42  ;;  %v1279_v53 = vmul.f32 %v543_v44, %v543_v44  ;;  %985 = vst [vmem:[%s2416_s2 + $0x1d0] sm:$0xff] %v656_v49  ;;  %v1103_v54 = vadd.f32 %v1102_v39, %v656_v49 }
 0x115   :  { %984 = vst [vmem:[%s2416_s2 + $0x1c8] sm:$0xff] %v545_v50  ;;  %v1419_v56 = vadd.f32 %v1418_v33, %v1274_v47  ;;  %v1281_v57 = vmul.f32 %v656_v49, %v656_v49  ;;  %v1082_v58 = vadd.f32 %v1081_v41, %v545_v50  ;;  %v1280_v59 = vmul.f32 %v545_v50, %v545_v50 }
 0x116   :  { %986 = vst [vmem:[%s2416_s2 + $0x1d8] sm:$0xff] %v658_v55  ;;  %v1357_v60 = vadd.f32 %v1356_v45, %v1279_v53  ;;  %v1124_v61 = vadd.f32 %v1123_v46, %v658_v55  ;;  %v1282_v62 = vmul.f32 %v658_v55, %v658_v55 }
 0x117   :  { %v1399_v63 = vadd.f32 %v1398_v51, %v1281_v57  ;;  %v1378_v0 = vadd.f32 %v1377_v52, %v1280_v59 }
 0x118   :  { %v1420_v1 = vadd.f32 %v1419_v56, %v1282_v62  ;;  %v549_v2 = vpop.f32.mrb[16].mxu0  ;;  %v662_v6 = vpop.f32.mrb[16].mxu1 }
 0x119   :  { %991 = vst [vmem:[%s2416_s2 + $0x200] sm:$0xff] %v549_v2  ;;  %v1062_v4 = vadd.f32 %v1061_v48, %v549_v2  ;;  %v1287_v5 = vmul.f32 %v549_v2, %v549_v2  ;;  %v551_v7 = vpop.f32.mrb[17].mxu0  ;;  %993 = vst [vmem:[%s2416_s2 + $0x210] sm:$0xff] %v662_v6  ;;  %v1104_v9 = vadd.f32 %v1103_v54, %v662_v6  ;;  %v664_v12 = vpop.f32.mrb[17].mxu1 }
 0x11a   :  { %v1289_v10 = vmul.f32 %v662_v6, %v662_v6  ;;  %992 = vst [vmem:[%s2416_s2 + $0x208] sm:$0xff] %v551_v7  ;;  %v1083_v11 = vadd.f32 %v1082_v58, %v551_v7  ;;  %v1288_v8 = vmul.f32 %v551_v7, %v551_v7  ;;  %v553_v13 = vpop.f32.mrb[18].mxu0  ;;  %994 = vst [vmem:[%s2416_s2 + $0x218] sm:$0xff] %v664_v12  ;;  %v666_v17 = vpop.f32.mrb[18].mxu1 }
 0x11b   :  { %v1358_v14 = vadd.f32 %v1357_v60, %v1287_v5  ;;  %v1125_v15 = vadd.f32 %v1124_v61, %v664_v12  ;;  %v1290_v3 = vmul.f32 %v664_v12, %v664_v12  ;;  %999 = vst [vmem:[%s2416_s2 + $0x240] sm:$0xff] %v553_v13  ;;  %v1063_v16 = vadd.f32 %v1062_v4, %v553_v13  ;;  %v555_v18 = vpop.f32.mrb[19].mxu0  ;;  %v668_v23 = vpop.f32.mrb[19].mxu1 }
 0x11c   :  { %v1400_v19 = vadd.f32 %v1399_v63, %v1289_v10  ;;  %v1379_v20 = vadd.f32 %v1378_v0, %v1288_v8  ;;  %v1295_v21 = vmul.f32 %v553_v13, %v553_v13  ;;  %1001 = vst [vmem:[%s2416_s2 + $0x250] sm:$0xff] %v666_v17  ;;  %v1105_v22 = vadd.f32 %v1104_v9, %v666_v17 }
 0x11d   :  { %1000 = vst [vmem:[%s2416_s2 + $0x248] sm:$0xff] %v555_v18  ;;  %v1421_v24 = vadd.f32 %v1420_v1, %v1290_v3  ;;  %v1297_v25 = vmul.f32 %v666_v17, %v666_v17  ;;  %v1084_v26 = vadd.f32 %v1083_v11, %v555_v18  ;;  %v1296_v27 = vmul.f32 %v555_v18, %v555_v18 }
 0x11e   :  { %1002 = vst [vmem:[%s2416_s2 + $0x258] sm:$0xff] %v668_v23  ;;  %v1359_v28 = vadd.f32 %v1358_v14, %v1295_v21  ;;  %v1126_v29 = vadd.f32 %v1125_v15, %v668_v23  ;;  %v1298_v30 = vmul.f32 %v668_v23, %v668_v23 }
 0x11f   :  { %v1401_v31 = vadd.f32 %v1400_v19, %v1297_v25  ;;  %v1380_v32 = vadd.f32 %v1379_v20, %v1296_v27 }
 0x120   :  { %v1422_v33 = vadd.f32 %v1421_v24, %v1298_v30  ;;  %v559_v34 = vpop.f32.mrb[20].mxu0  ;;  %v672_v37 = vpop.f32.mrb[20].mxu1 }
 0x121   :  { %1007 = vst [vmem:[%s2416_s2 + $0x280] sm:$0xff] %v559_v34  ;;  %v1064_v35 = vadd.f32 %v1063_v16, %v559_v34  ;;  %v1303_v36 = vmul.f32 %v559_v34, %v559_v34  ;;  %v561_v38 = vpop.f32.mrb[21].mxu0  ;;  %1009 = vst [vmem:[%s2416_s2 + $0x290] sm:$0xff] %v672_v37  ;;  %v1106_v39 = vadd.f32 %v1105_v22, %v672_v37  ;;  %v674_v43 = vpop.f32.mrb[21].mxu1 }
 0x122   :  { %v1305_v40 = vmul.f32 %v672_v37, %v672_v37  ;;  %1008 = vst [vmem:[%s2416_s2 + $0x288] sm:$0xff] %v561_v38  ;;  %v1085_v41 = vadd.f32 %v1084_v26, %v561_v38  ;;  %v1304_v42 = vmul.f32 %v561_v38, %v561_v38  ;;  %v563_v44 = vpop.f32.mrb[22].mxu0  ;;  %1010 = vst [vmem:[%s2416_s2 + $0x298] sm:$0xff] %v674_v43  ;;  %v676_v49 = vpop.f32.mrb[22].mxu1 }
 0x123   :  { %v1360_v45 = vadd.f32 %v1359_v28, %v1303_v36  ;;  %v1127_v46 = vadd.f32 %v1126_v29, %v674_v43  ;;  %v1306_v47 = vmul.f32 %v674_v43, %v674_v43  ;;  %1015 = vst [vmem:[%s2416_s2 + $0x2c0] sm:$0xff] %v563_v44  ;;  %v1065_v48 = vadd.f32 %v1064_v35, %v563_v44  ;;  %v565_v50 = vpop.f32.mrb[23].mxu0  ;;  %v678_v55 = vpop.f32.mrb[23].mxu1 }
 0x124   :  { %v1402_v51 = vadd.f32 %v1401_v31, %v1305_v40  ;;  %v1381_v52 = vadd.f32 %v1380_v32, %v1304_v42  ;;  %v1311_v53 = vmul.f32 %v563_v44, %v563_v44  ;;  %1017 = vst [vmem:[%s2416_s2 + $0x2d0] sm:$0xff] %v676_v49  ;;  %v1107_v54 = vadd.f32 %v1106_v39, %v676_v49 }
 0x125   :  { %1016 = vst [vmem:[%s2416_s2 + $0x2c8] sm:$0xff] %v565_v50  ;;  %v1423_v56 = vadd.f32 %v1422_v33, %v1306_v47  ;;  %v1313_v57 = vmul.f32 %v676_v49, %v676_v49  ;;  %v1086_v58 = vadd.f32 %v1085_v41, %v565_v50  ;;  %v1312_v59 = vmul.f32 %v565_v50, %v565_v50 }
 0x126   :  { %1018 = vst [vmem:[%s2416_s2 + $0x2d8] sm:$0xff] %v678_v55  ;;  %v1361_v60 = vadd.f32 %v1360_v45, %v1311_v53  ;;  %v1128_v61 = vadd.f32 %v1127_v46, %v678_v55  ;;  %v1314_v62 = vmul.f32 %v678_v55, %v678_v55 }
 0x127   :  { %v1403_v63 = vadd.f32 %v1402_v51, %v1313_v57  ;;  %v1382_v0 = vadd.f32 %v1381_v52, %v1312_v59 }
 0x128   :  { %v1424_v1 = vadd.f32 %v1423_v56, %v1314_v62  ;;  %v569_v2 = vpop.f32.mrb[24].mxu0  ;;  %v682_v6 = vpop.f32.mrb[24].mxu1 }
 0x129   :  { %1023 = vst [vmem:[%s2416_s2 + $0x300] sm:$0xff] %v569_v2  ;;  %v1066_v4 = vadd.f32 %v1065_v48, %v569_v2  ;;  %v1319_v5 = vmul.f32 %v569_v2, %v569_v2  ;;  %v571_v7 = vpop.f32.mrb[25].mxu0  ;;  %1025 = vst [vmem:[%s2416_s2 + $0x310] sm:$0xff] %v682_v6  ;;  %v1108_v9 = vadd.f32 %v1107_v54, %v682_v6  ;;  %v684_v12 = vpop.f32.mrb[25].mxu1 }
 0x12a   :  { %v1321_v10 = vmul.f32 %v682_v6, %v682_v6  ;;  %1024 = vst [vmem:[%s2416_s2 + $0x308] sm:$0xff] %v571_v7  ;;  %v1087_v11 = vadd.f32 %v1086_v58, %v571_v7  ;;  %v1320_v8 = vmul.f32 %v571_v7, %v571_v7  ;;  %v573_v13 = vpop.f32.mrb[26].mxu0  ;;  %1026 = vst [vmem:[%s2416_s2 + $0x318] sm:$0xff] %v684_v12  ;;  %v686_v17 = vpop.f32.mrb[26].mxu1 }
 0x12b   :  { %v1362_v14 = vadd.f32 %v1361_v60, %v1319_v5  ;;  %v1129_v15 = vadd.f32 %v1128_v61, %v684_v12  ;;  %v1322_v3 = vmul.f32 %v684_v12, %v684_v12  ;;  %1031 = vst [vmem:[%s2416_s2 + $0x340] sm:$0xff] %v573_v13  ;;  %v1067_v16 = vadd.f32 %v1066_v4, %v573_v13  ;;  %v575_v18 = vpop.f32.mrb[27].mxu0  ;;  %v688_v23 = vpop.f32.mrb[27].mxu1 }
 0x12c   :  { %v1404_v19 = vadd.f32 %v1403_v63, %v1321_v10  ;;  %v1383_v20 = vadd.f32 %v1382_v0, %v1320_v8  ;;  %v1327_v21 = vmul.f32 %v573_v13, %v573_v13  ;;  %1033 = vst [vmem:[%s2416_s2 + $0x350] sm:$0xff] %v686_v17  ;;  %v1109_v22 = vadd.f32 %v1108_v9, %v686_v17 }
 0x12d   :  { %1032 = vst [vmem:[%s2416_s2 + $0x348] sm:$0xff] %v575_v18  ;;  %v1425_v24 = vadd.f32 %v1424_v1, %v1322_v3  ;;  %v1329_v25 = vmul.f32 %v686_v17, %v686_v17  ;;  %v1088_v26 = vadd.f32 %v1087_v11, %v575_v18  ;;  %v1328_v27 = vmul.f32 %v575_v18, %v575_v18 }
 0x12e   :  { %1034 = vst [vmem:[%s2416_s2 + $0x358] sm:$0xff] %v688_v23  ;;  %v1363_v28 = vadd.f32 %v1362_v14, %v1327_v21  ;;  %v1130_v29 = vadd.f32 %v1129_v15, %v688_v23  ;;  %v1330_v30 = vmul.f32 %v688_v23, %v688_v23 }
 0x12f   :  { %v1405_v31 = vadd.f32 %v1404_v19, %v1329_v25  ;;  %v1384_v32 = vadd.f32 %v1383_v20, %v1328_v27 }
 0x130   :  { %v1426_v33 = vadd.f32 %v1425_v24, %v1330_v30  ;;  %v579_v34 = vpop.f32.mrb[28].mxu0  ;;  %v692_v37 = vpop.f32.mrb[28].mxu1 }
 0x131   :  { %1039 = vst [vmem:[%s2416_s2 + $0x380] sm:$0xff] %v579_v34  ;;  %v1068_v35 = vadd.f32 %v1067_v16, %v579_v34  ;;  %v1335_v36 = vmul.f32 %v579_v34, %v579_v34  ;;  %v581_v38 = vpop.f32.mrb[29].mxu0  ;;  %1041 = vst [vmem:[%s2416_s2 + $0x390] sm:$0xff] %v692_v37  ;;  %v1110_v39 = vadd.f32 %v1109_v22, %v692_v37  ;;  %v694_v43 = vpop.f32.mrb[29].mxu1 }
 0x132   :  { %v1337_v40 = vmul.f32 %v692_v37, %v692_v37  ;;  %1040 = vst [vmem:[%s2416_s2 + $0x388] sm:$0xff] %v581_v38  ;;  %v1089_v41 = vadd.f32 %v1088_v26, %v581_v38  ;;  %v1336_v42 = vmul.f32 %v581_v38, %v581_v38  ;;  %v583_v44 = vpop.f32.mrb[30].mxu0  ;;  %1042 = vst [vmem:[%s2416_s2 + $0x398] sm:$0xff] %v694_v43  ;;  %v696_v49 = vpop.f32.mrb[30].mxu1 }
 0x133   :  { %v1364_v45 = vadd.f32 %v1363_v28, %v1335_v36  ;;  %v1131_v46 = vadd.f32 %v1130_v29, %v694_v43  ;;  %v1338_v47 = vmul.f32 %v694_v43, %v694_v43  ;;  %1047 = vst [vmem:[%s2416_s2 + $0x3c0] sm:$0xff] %v583_v44  ;;  %v1069_v48 = vadd.f32 %v1068_v35, %v583_v44  ;;  %v585_v50 = vpop.f32.mrb[31].mxu0  ;;  %v698_v55 = vpop.f32.mrb[31].mxu1 }
 0x134   :  { %v1406_v51 = vadd.f32 %v1405_v31, %v1337_v40  ;;  %v1385_v52 = vadd.f32 %v1384_v32, %v1336_v42  ;;  %v1343_v53 = vmul.f32 %v583_v44, %v583_v44  ;;  %1049 = vst [vmem:[%s2416_s2 + $0x3d0] sm:$0xff] %v696_v49  ;;  %v1111_v54 = vadd.f32 %v1110_v39, %v696_v49 }
 0x135   :  { %1048 = vst [vmem:[%s2416_s2 + $0x3c8] sm:$0xff] %v585_v50  ;;  %v1427_v56 = vadd.f32 %v1426_v33, %v1338_v47  ;;  %v1070_v57 = vrot.slane %v1069_v48, 4  ;;  %v1345_v58 = vmul.f32 %v696_v49, %v696_v49  ;;  %v1090_v59 = vadd.f32 %v1089_v41, %v585_v50  ;;  %1050 = vst [vmem:[%s2416_s2 + $0x3d8] sm:$0xff] %v698_v55 }
 0x136   :  { %v1365_v60 = vadd.f32 %v1364_v45, %v1343_v53  ;;  %v1112_v61 = vrot.slane %v1111_v54, 4  ;;  %v1344_v62 = vmul.f32 %v585_v50, %v585_v50  ;;  %v1132_v63 = vadd.f32 %v1131_v46, %v698_v55 }
 0x137   :  { %v1071_v0 = vadd.f32 %v1070_v57, %v1069_v48  ;;  %v1407_v1 = vadd.f32 %v1406_v51, %v1345_v58  ;;  %v1091_v2 = vrot.slane %v1090_v59, 4  ;;  %v1346_v4 = vmul.f32 %v698_v55, %v698_v55 }
 0x138   :  { %v1366_v5 = vrot.slane %v1365_v60, 4  ;;  %v1113_v6 = vadd.f32 %v1112_v61, %v1111_v54  ;;  %v1386_v7 = vadd.f32 %v1385_v52, %v1344_v62  ;;  %v1133_v9 = vrot.slane %v1132_v63, 4  ;;  %v2134_v10 = vpop.f32.mrb[32].mxu0  ;;  %v2140_v14 = vpop.f32.mrb[32].mxu1 }
 0x139   :  { %v1072_v11 = vrot.slane %v1071_v0, 2  ;;  %v1408_v8 = vrot.slane %v1407_v1, 4  ;;  %v1092_v12 = vadd.f32 %v1091_v2, %v1090_v59  ;;  %v1428_v13 = vadd.f32 %v1427_v56, %v1346_v4  ;;  %931 = vst [vmem:[%s2416_s2 + $0x20] sm:$0xff] %v2134_v10  ;;  %v2142_v15 = vpop.f32.mrb[33].mxu0  ;;  %933 = vst [vmem:[%s2416_s2 + $0x30] sm:$0xff] %v2140_v14  ;;  %v2152_v19 = vpop.f32.mrb[33].mxu1 }
 0x13a   :  { %v1367_v3 = vadd.f32 %v1366_v5, %v1365_v60  ;;  %v1114_v16 = vrot.slane %v1113_v6, 2  ;;  %v1387_v17 = vrot.slane %v1386_v7, 4  ;;  %v1134_v18 = vadd.f32 %v1133_v9, %v1132_v63  ;;  %932 = vst [vmem:[%s2416_s2 + $0x28] sm:$0xff] %v2142_v15  ;;  %v739_v20 = vpop.f32.mrb[34].mxu0  ;;  %934 = vst [vmem:[%s2416_s2 + $0x38] sm:$0xff] %v2152_v19  ;;  %v2161_v25 = vpop.f32.mrb[34].mxu1 }
 0x13b   :  { %v1073_v21 = vadd.f32 %v1072_v11, %v1071_v0  ;;  %v1409_v22 = vadd.f32 %v1408_v8, %v1407_v1  ;;  %v1093_v23 = vrot.slane %v1092_v12, 2  ;;  %v1429_v24 = vrot.slane %v1428_v13, 4  ;;  %939 = vst [vmem:[%s2416_s2 + $0x60] sm:$0xff] %v739_v20  ;;  %v2163_v26 = vpop.f32.mrb[35].mxu0  ;;  %941 = vst [vmem:[%s2416_s2 + $0x70] sm:$0xff] %v2161_v25  ;;  %v2173_v31 = vpop.f32.mrb[35].mxu1 }
 0x13c   :  { %v1368_v27 = vrot.slane %v1367_v3, 2  ;;  %v1115_v28 = vadd.f32 %v1114_v16, %v1113_v6  ;;  %v1388_v29 = vadd.f32 %v1387_v17, %v1386_v7  ;;  %v1135_v30 = vrot.slane %v1134_v18, 2  ;;  %940 = vst [vmem:[%s2416_s2 + $0x68] sm:$0xff] %v2163_v26  ;;  %942 = vst [vmem:[%s2416_s2 + $0x78] sm:$0xff] %v2173_v31 }
 0x13d   :  { %v1074_v32 = vrot.slane %v1073_v21, 1  ;;  %v1410_v33 = vrot.slane %v1409_v22, 2  ;;  %v1094_v34 = vadd.f32 %v1093_v23, %v1092_v12  ;;  %v1430_v35 = vadd.f32 %v1429_v24, %v1428_v13 }
 0x13e   :  { %v1369_v36 = vadd.f32 %v1368_v27, %v1367_v3  ;;  %v1116_v37 = vrot.slane %v1115_v28, 1  ;;  %v1389_v38 = vrot.slane %v1388_v29, 2  ;;  %v1136_v39 = vadd.f32 %v1135_v30, %v1134_v18 }
 0x13f   :  { %v1075_v40 = vadd.f32 %v1074_v32, %v1073_v21  ;;  %v1411_v41 = vadd.f32 %v1410_v33, %v1409_v22  ;;  %v1095_v42 = vrot.slane %v1094_v34, 1  ;;  %v1431_v43 = vrot.slane %v1430_v35, 2 }
 0x140   :  { %v1370_v44 = vrot.slane %v1369_v36, 1  ;;  %v1117_v45 = vadd.f32 %v1116_v37, %v1115_v28  ;;  %v1390_v46 = vadd.f32 %v1389_v38, %v1388_v29  ;;  %v1137_v47 = vrot.slane %v1136_v39, 1  ;;  %v745_v48 = vpop.f32.mrb[36].mxu0  ;;  %v858_v53 = vpop.f32.mrb[36].mxu1 }
 0x141   :  { %v1412_v49 = vrot.slane %v1411_v41, 1  ;;  %v1096_v50 = vadd.f32 %v1095_v42, %v1094_v34  ;;  %v1432_v51 = vadd.f32 %v1431_v43, %v1430_v35  ;;  %v1227_v52 = vmul.f32 %v2134_v10, %v2134_v10  ;;  %947 = vst [vmem:[%s2416_s2 + $0xa0] sm:$0xff] %v745_v48  ;;  %v747_v54 = vpop.f32.mrb[37].mxu0  ;;  %949 = vst [vmem:[%s2416_s2 + $0xb0] sm:$0xff] %v858_v53  ;;  %v860_v59 = vpop.f32.mrb[37].mxu1 }
 0x142   :  { %v1371_v55 = vadd.f32 %v1370_v44, %v1369_v36  ;;  %v1391_v56 = vrot.slane %v1390_v46, 1  ;;  %v1138_v57 = vadd.f32 %v1137_v47, %v1136_v39  ;;  %v1229_v58 = vmul.f32 %v2140_v14, %v2140_v14  ;;  %948 = vst [vmem:[%s2416_s2 + $0xa8] sm:$0xff] %v747_v54  ;;  %v2192_v60 = vpop.f32.mrb[38].mxu0  ;;  %950 = vst [vmem:[%s2416_s2 + $0xb8] sm:$0xff] %v860_v59  ;;  %v862_v1 = vpop.f32.mrb[38].mxu1 }
 0x143   :  { %v1413_v61 = vadd.f32 %v1412_v49, %v1411_v41  ;;  %v1433_v62 = vrot.slane %v1432_v51, 1  ;;  %v1228_v63 = vmul.f32 %v2142_v15, %v2142_v15  ;;  %v1230_v0 = vmul.f32 %v2152_v19, %v2152_v19  ;;  %955 = vst [vmem:[%s2416_s2 + $0xe0] sm:$0xff] %v2192_v60  ;;  %v751_v2 = vpop.f32.mrb[39].mxu0  ;;  %957 = vst [vmem:[%s2416_s2 + $0xf0] sm:$0xff] %v862_v1  ;;  %v864_v9 = vpop.f32.mrb[39].mxu1 }
 0x144   :  { %v1520_v4 = vsel %vm1519_vm0, %v1075_v40, %v1371_v55  ;;  %v1392_v5 = vadd.f32 %v1391_v56, %v1390_v46  ;;  %v1139_v6 = vadd.f32 %v739_v20, %v2134_v10  ;;  %v1235_v7 = vmul.f32 %v739_v20, %v739_v20  ;;  %956 = vst [vmem:[%s2416_s2 + $0xe8] sm:$0xff] %v751_v2 }
 0x145   :  { %v1529_v11 = vsel %vm1528_vm1, %v1520_v4, 0.0  ;;  %v1522_v8 = vsel %vm1519_vm0, %v1117_v45, %v1413_v61  ;;  %v1434_v12 = vadd.f32 %v1433_v62, %v1432_v51  ;;  %v1181_v13 = vadd.f32 %v2161_v25, %v2140_v14  ;;  %958 = vst [vmem:[%s2416_s2 + $0xf8] sm:$0xff] %v864_v9 }
 0x146   :  { %1537 = vst [vmem:[%s2417_s3] sm:$0xff] %v1529_v11  ;;  %v1531_v10 = vsel %vm1528_vm1, %v1522_v8, 0.0  ;;  %v1521_v3 = vsel %vm1519_vm0, %v1096_v50, %v1392_v5  ;;  %v1435_v16 = vadd.f32 %v1235_v7, %v1227_v52  ;;  %v1237_v17 = vmul.f32 %v2161_v25, %v2161_v25 }
 0x147   :  { %1539 = vst [vmem:[%s2417_s3 + $0x10] sm:$0xff] %v1531_v10  ;;  %v1530_v14 = vsel %vm1528_vm1, %v1521_v3, 0.0  ;;  %v1523_v18 = vsel %vm1519_vm0, %v1138_v57, %v1434_v12  ;;  %v1160_v20 = vadd.f32 %v2163_v26, %v2142_v15  ;;  %v1236_v21 = vmul.f32 %v2163_v26, %v2163_v26 }
 0x148   :  { %1538 = vst [vmem:[%s2417_s3 + $0x8] sm:$0xff] %v1530_v14  ;;  %v1532_v22 = vsel %vm1528_vm1, %v1523_v18, 0.0  ;;  %v1477_v23 = vadd.f32 %v1237_v17, %v1229_v58  ;;  %v1202_v24 = vadd.f32 %v2173_v31, %v2152_v19  ;;  %v1238_v25 = vmul.f32 %v2173_v31, %v2173_v31  ;;  %v755_v27 = vpop.f32.mrb[40].mxu0  ;;  %v868_v30 = vpop.f32.mrb[40].mxu1 }
 0x149   :  { %1540 = vst [vmem:[%s2417_s3 + $0x18] sm:$0xff] %v1532_v22  ;;  %v1456_v15 = vadd.f32 %v1236_v21, %v1228_v63  ;;  %v1140_v26 = vadd.f32 %v1139_v6, %v745_v48  ;;  %v1243_v28 = vmul.f32 %v745_v48, %v745_v48  ;;  %v1182_v29 = vadd.f32 %v1181_v13, %v858_v53  ;;  %v757_v32 = vpop.f32.mrb[41].mxu0  ;;  %v870_v31 = vpop.f32.mrb[41].mxu1 }
 0x14a   :  { %963 = vst [vmem:[%s2416_s2 + $0x120] sm:$0xff] %v755_v27  ;;  %v1498_v33 = vadd.f32 %v1238_v25, %v1230_v0  ;;  %v1245_v19 = vmul.f32 %v858_v53, %v858_v53  ;;  %v1161_v34 = vadd.f32 %v1160_v20, %v747_v54  ;;  %v1244_v35 = vmul.f32 %v747_v54, %v747_v54  ;;  %v759_v36 = vpop.f32.mrb[42].mxu0  ;;  %v872_v41 = vpop.f32.mrb[42].mxu1 }
 0x14b   :  { %965 = vst [vmem:[%s2416_s2 + $0x130] sm:$0xff] %v868_v30  ;;  %964 = vst [vmem:[%s2416_s2 + $0x128] sm:$0xff] %v757_v32  ;;  %v1436_v37 = vadd.f32 %v1435_v16, %v1243_v28  ;;  %v1203_v38 = vadd.f32 %v1202_v24, %v860_v59  ;;  %v1246_v39 = vmul.f32 %v860_v59, %v860_v59  ;;  %v761_v42 = vpop.f32.mrb[43].mxu0  ;;  %v874_v47 = vpop.f32.mrb[43].mxu1 }
 0x14c   :  { %v1141_v40 = vadd.f32 %v1140_v26, %v2192_v60  ;;  %966 = vst [vmem:[%s2416_s2 + $0x138] sm:$0xff] %v870_v31  ;;  %971 = vst [vmem:[%s2416_s2 + $0x160] sm:$0xff] %v759_v36  ;;  %v1478_v43 = vadd.f32 %v1477_v23, %v1245_v19  ;;  %v1457_v44 = vadd.f32 %v1456_v15, %v1244_v35 }
 0x14d   :  { %v1251_v45 = vmul.f32 %v2192_v60, %v2192_v60  ;;  %v1183_v46 = vadd.f32 %v1182_v29, %v862_v1  ;;  %973 = vst [vmem:[%s2416_s2 + $0x170] sm:$0xff] %v872_v41  ;;  %972 = vst [vmem:[%s2416_s2 + $0x168] sm:$0xff] %v761_v42  ;;  %v1499_v48 = vadd.f32 %v1498_v33, %v1246_v39 }
 0x14e   :  { %v1253_v49 = vmul.f32 %v862_v1, %v862_v1  ;;  %v1162_v50 = vadd.f32 %v1161_v34, %v751_v2  ;;  %v1252_v51 = vmul.f32 %v751_v2, %v751_v2  ;;  %974 = vst [vmem:[%s2416_s2 + $0x178] sm:$0xff] %v874_v47  ;;  %v1204_v53 = vadd.f32 %v1203_v38, %v864_v9 }
 0x14f   :  { %v1437_v52 = vadd.f32 %v1436_v37, %v1251_v45  ;;  %v1254_v54 = vmul.f32 %v864_v9, %v864_v9  ;;  %v1142_v55 = vadd.f32 %v1141_v40, %v755_v27  ;;  %v1259_v58 = vmul.f32 %v755_v27, %v755_v27 }
 0x150   :  { %v1479_v56 = vadd.f32 %v1478_v43, %v1253_v49  ;;  %v1458_v57 = vadd.f32 %v1457_v44, %v1252_v51  ;;  %v1184_v59 = vadd.f32 %v1183_v46, %v868_v30  ;;  %v1261_v61 = vmul.f32 %v868_v30, %v868_v30  ;;  %v765_v0 = vpop.f32.mrb[44].mxu0  ;;  %v878_v6 = vpop.f32.mrb[44].mxu1 }
 0x151   :  { %v1500_v60 = vadd.f32 %v1499_v48, %v1254_v54  ;;  %v1163_v62 = vadd.f32 %v1162_v50, %v757_v32  ;;  %v1260_v63 = vmul.f32 %v757_v32, %v757_v32  ;;  %v1438_v1 = vadd.f32 %v1437_v52, %v1259_v58  ;;  %979 = vst [vmem:[%s2416_s2 + $0x1a0] sm:$0xff] %v765_v0  ;;  %v767_v7 = vpop.f32.mrb[45].mxu0  ;;  %v880_v13 = vpop.f32.mrb[45].mxu1 }
 0x152   :  { %v1205_v4 = vadd.f32 %v1204_v53, %v870_v31  ;;  %v1262_v2 = vmul.f32 %v870_v31, %v870_v31  ;;  %v1143_v5 = vadd.f32 %v1142_v55, %v759_v36  ;;  %v1480_v9 = vadd.f32 %v1479_v56, %v1261_v61  ;;  %981 = vst [vmem:[%s2416_s2 + $0x1b0] sm:$0xff] %v878_v6  ;;  %v769_v10 = vpop.f32.mrb[46].mxu0  ;;  %v882_v18 = vpop.f32.mrb[46].mxu1 }
 0x153   :  { %v1459_v11 = vadd.f32 %v1458_v57, %v1260_v63  ;;  %v1267_v8 = vmul.f32 %v759_v36, %v759_v36  ;;  %v1185_v12 = vadd.f32 %v1184_v59, %v872_v41  ;;  %980 = vst [vmem:[%s2416_s2 + $0x1a8] sm:$0xff] %v767_v7  ;;  %v1269_v16 = vmul.f32 %v872_v41, %v872_v41  ;;  %v771_v20 = vpop.f32.mrb[47].mxu0  ;;  %v884_v25 = vpop.f32.mrb[47].mxu1 }
 0x154   :  { %v1501_v3 = vadd.f32 %v1500_v60, %v1262_v2  ;;  %v1164_v17 = vadd.f32 %v1163_v62, %v761_v42  ;;  %v1268_v14 = vmul.f32 %v761_v42, %v761_v42  ;;  %982 = vst [vmem:[%s2416_s2 + $0x1b8] sm:$0xff] %v880_v13  ;;  %987 = vst [vmem:[%s2416_s2 + $0x1e0] sm:$0xff] %v769_v10 }
 0x155   :  { %v1439_v21 = vadd.f32 %v1438_v1, %v1267_v8  ;;  %v1206_v22 = vadd.f32 %v1205_v4, %v874_v47  ;;  %v1270_v23 = vmul.f32 %v874_v47, %v874_v47  ;;  %v1144_v24 = vadd.f32 %v1143_v5, %v765_v0  ;;  %989 = vst [vmem:[%s2416_s2 + $0x1f0] sm:$0xff] %v882_v18 }
 0x156   :  { %988 = vst [vmem:[%s2416_s2 + $0x1e8] sm:$0xff] %v771_v20  ;;  %v1481_v27 = vadd.f32 %v1480_v9, %v1269_v16  ;;  %v1460_v15 = vadd.f32 %v1459_v11, %v1268_v14  ;;  %v1275_v26 = vmul.f32 %v765_v0, %v765_v0  ;;  %v1186_v28 = vadd.f32 %v1185_v12, %v878_v6 }
 0x157   :  { %990 = vst [vmem:[%s2416_s2 + $0x1f8] sm:$0xff] %v884_v25  ;;  %v1502_v29 = vadd.f32 %v1501_v3, %v1270_v23  ;;  %v1277_v30 = vmul.f32 %v878_v6, %v878_v6  ;;  %v1165_v32 = vadd.f32 %v1164_v17, %v767_v7  ;;  %v1276_v33 = vmul.f32 %v767_v7, %v767_v7 }
 0x158   :  { %v1440_v19 = vadd.f32 %v1439_v21, %v1275_v26  ;;  %v1207_v34 = vadd.f32 %v1206_v22, %v880_v13  ;;  %v1278_v35 = vmul.f32 %v880_v13, %v880_v13  ;;  %v1145_v31 = vadd.f32 %v1144_v24, %v769_v10  ;;  %v775_v40 = vpop.f32.mrb[48].mxu0  ;;  %v888_v45 = vpop.f32.mrb[48].mxu1 }
 0x159   :  { %v1482_v36 = vadd.f32 %v1481_v27, %v1277_v30  ;;  %v1461_v37 = vadd.f32 %v1460_v15, %v1276_v33  ;;  %v1283_v38 = vmul.f32 %v769_v10, %v769_v10  ;;  %v1187_v39 = vadd.f32 %v1186_v28, %v882_v18  ;;  %995 = vst [vmem:[%s2416_s2 + $0x220] sm:$0xff] %v775_v40  ;;  %v777_v46 = vpop.f32.mrb[49].mxu0  ;;  %v890_v51 = vpop.f32.mrb[49].mxu1 }
 0x15a   :  { %v1503_v41 = vadd.f32 %v1502_v29, %v1278_v35  ;;  %v1285_v42 = vmul.f32 %v882_v18, %v882_v18  ;;  %v1166_v43 = vadd.f32 %v1165_v32, %v771_v20  ;;  %v1284_v44 = vmul.f32 %v771_v20, %v771_v20  ;;  %997 = vst [vmem:[%s2416_s2 + $0x230] sm:$0xff] %v888_v45  ;;  %v779_v52 = vpop.f32.mrb[50].mxu0  ;;  %v892_v57 = vpop.f32.mrb[50].mxu1 }
 0x15b   :  { %v1441_v47 = vadd.f32 %v1440_v19, %v1283_v38  ;;  %v1208_v48 = vadd.f32 %v1207_v34, %v884_v25  ;;  %v1286_v49 = vmul.f32 %v884_v25, %v884_v25  ;;  %v1146_v50 = vadd.f32 %v1145_v31, %v775_v40  ;;  %996 = vst [vmem:[%s2416_s2 + $0x228] sm:$0xff] %v777_v46  ;;  %v781_v58 = vpop.f32.mrb[51].mxu0  ;;  %v894_v63 = vpop.f32.mrb[51].mxu1 }
 0x15c   :  { %v1483_v53 = vadd.f32 %v1482_v36, %v1285_v42  ;;  %v1462_v54 = vadd.f32 %v1461_v37, %v1284_v44  ;;  %v1291_v55 = vmul.f32 %v775_v40, %v775_v40  ;;  %v1188_v56 = vadd.f32 %v1187_v39, %v888_v45  ;;  %998 = vst [vmem:[%s2416_s2 + $0x238] sm:$0xff] %v890_v51 }
 0x15d   :  { %1003 = vst [vmem:[%s2416_s2 + $0x260] sm:$0xff] %v779_v52  ;;  %v1504_v59 = vadd.f32 %v1503_v41, %v1286_v49  ;;  %v1293_v60 = vmul.f32 %v888_v45, %v888_v45  ;;  %v1167_v61 = vadd.f32 %v1166_v43, %v777_v46  ;;  %v1292_v62 = vmul.f32 %v777_v46, %v777_v46 }
 0x15e   :  { %1005 = vst [vmem:[%s2416_s2 + $0x270] sm:$0xff] %v892_v57  ;;  %1004 = vst [vmem:[%s2416_s2 + $0x268] sm:$0xff] %v781_v58  ;;  %v1442_v0 = vadd.f32 %v1441_v47, %v1291_v55  ;;  %v1209_v1 = vadd.f32 %v1208_v48, %v890_v51  ;;  %v1294_v4 = vmul.f32 %v890_v51, %v890_v51 }
 0x15f   :  { %v1147_v2 = vadd.f32 %v1146_v50, %v779_v52  ;;  %1006 = vst [vmem:[%s2416_s2 + $0x278] sm:$0xff] %v894_v63  ;;  %v1484_v5 = vadd.f32 %v1483_v53, %v1293_v60  ;;  %v1463_v6 = vadd.f32 %v1462_v54, %v1292_v62  ;;  %v1299_v7 = vmul.f32 %v779_v52, %v779_v52 }
 0x160   :  { %v1189_v9 = vadd.f32 %v1188_v56, %v892_v57  ;;  %v1505_v11 = vadd.f32 %v1504_v59, %v1294_v4  ;;  %v1301_v8 = vmul.f32 %v892_v57, %v892_v57  ;;  %v1168_v12 = vadd.f32 %v1167_v61, %v781_v58  ;;  %v785_v17 = vpop.f32.mrb[52].mxu0  ;;  %v898_v22 = vpop.f32.mrb[52].mxu1 }
 0x161   :  { %v1300_v13 = vmul.f32 %v781_v58, %v781_v58  ;;  %v1443_v10 = vadd.f32 %v1442_v0, %v1299_v7  ;;  %v1210_v3 = vadd.f32 %v1209_v1, %v894_v63  ;;  %v1302_v16 = vmul.f32 %v894_v63, %v894_v63  ;;  %1011 = vst [vmem:[%s2416_s2 + $0x2a0] sm:$0xff] %v785_v17  ;;  %v787_v23 = vpop.f32.mrb[53].mxu0  ;;  %v900_v26 = vpop.f32.mrb[53].mxu1 }
 0x162   :  { %v1485_v14 = vadd.f32 %v1484_v5, %v1301_v8  ;;  %v1148_v20 = vadd.f32 %v1147_v2, %v785_v17  ;;  %v1307_v21 = vmul.f32 %v785_v17, %v785_v17  ;;  %1013 = vst [vmem:[%s2416_s2 + $0x2b0] sm:$0xff] %v898_v22  ;;  %v1190_v25 = vadd.f32 %v1189_v9, %v898_v22  ;;  %v789_v28 = vpop.f32.mrb[54].mxu0  ;;  %v902_v19 = vpop.f32.mrb[54].mxu1 }
 0x163   :  { %v1464_v18 = vadd.f32 %v1463_v6, %v1300_v13  ;;  %v1506_v24 = vadd.f32 %v1505_v11, %v1302_v16  ;;  %v1309_v27 = vmul.f32 %v898_v22, %v898_v22  ;;  %1012 = vst [vmem:[%s2416_s2 + $0x2a8] sm:$0xff] %v787_v23  ;;  %v1169_v15 = vadd.f32 %v1168_v12, %v787_v23  ;;  %v791_v34 = vpop.f32.mrb[55].mxu0  ;;  %v904_v38 = vpop.f32.mrb[55].mxu1 }
 0x164   :  { %v1444_v29 = vadd.f32 %v1443_v10, %v1307_v21  ;;  %v1308_v30 = vmul.f32 %v787_v23, %v787_v23  ;;  %1014 = vst [vmem:[%s2416_s2 + $0x2b8] sm:$0xff] %v900_v26  ;;  %v1211_v32 = vadd.f32 %v1210_v3, %v900_v26  ;;  %v1310_v33 = vmul.f32 %v900_v26, %v900_v26 }
 0x165   :  { %1019 = vst [vmem:[%s2416_s2 + $0x2e0] sm:$0xff] %v789_v28  ;;  %v1486_v35 = vadd.f32 %v1485_v14, %v1309_v27  ;;  %v1149_v31 = vadd.f32 %v1148_v20, %v789_v28  ;;  %v1315_v36 = vmul.f32 %v789_v28, %v789_v28  ;;  %1021 = vst [vmem:[%s2416_s2 + $0x2f0] sm:$0xff] %v902_v19 }
 0x166   :  { %v1191_v37 = vadd.f32 %v1190_v25, %v902_v19  ;;  %1020 = vst [vmem:[%s2416_s2 + $0x2e8] sm:$0xff] %v791_v34  ;;  %v1465_v39 = vadd.f32 %v1464_v18, %v1308_v30  ;;  %v1507_v40 = vadd.f32 %v1506_v24, %v1310_v33  ;;  %v1317_v41 = vmul.f32 %v902_v19, %v902_v19 }
 0x167   :  { %v1170_v42 = vadd.f32 %v1169_v15, %v791_v34  ;;  %1022 = vst [vmem:[%s2416_s2 + $0x2f8] sm:$0xff] %v904_v38  ;;  %v1445_v43 = vadd.f32 %v1444_v29, %v1315_v36  ;;  %v1316_v44 = vmul.f32 %v791_v34, %v791_v34  ;;  %v1212_v45 = vadd.f32 %v1211_v32, %v904_v38 }
 0x168   :  { %v1318_v46 = vmul.f32 %v904_v38, %v904_v38  ;;  %v1487_v47 = vadd.f32 %v1486_v35, %v1317_v41  ;;  %v795_v50 = vpop.f32.mrb[56].mxu0  ;;  %v908_v53 = vpop.f32.mrb[56].mxu1 }
 0x169   :  { %v1466_v48 = vadd.f32 %v1465_v39, %v1316_v44  ;;  %1027 = vst [vmem:[%s2416_s2 + $0x320] sm:$0xff] %v795_v50  ;;  %v1150_v51 = vadd.f32 %v1149_v31, %v795_v50  ;;  %v1323_v52 = vmul.f32 %v795_v50, %v795_v50  ;;  %v797_v54 = vpop.f32.mrb[57].mxu0  ;;  %1029 = vst [vmem:[%s2416_s2 + $0x330] sm:$0xff] %v908_v53  ;;  %v910_v59 = vpop.f32.mrb[57].mxu1 }
 0x16a   :  { %v1508_v49 = vadd.f32 %v1507_v40, %v1318_v46  ;;  %v1192_v55 = vadd.f32 %v1191_v37, %v908_v53  ;;  %v1325_v56 = vmul.f32 %v908_v53, %v908_v53  ;;  %1028 = vst [vmem:[%s2416_s2 + $0x328] sm:$0xff] %v797_v54  ;;  %v1171_v57 = vadd.f32 %v1170_v42, %v797_v54  ;;  %v799_v60 = vpop.f32.mrb[58].mxu0  ;;  %v912_v1 = vpop.f32.mrb[58].mxu1 }
 0x16b   :  { %v1324_v58 = vmul.f32 %v797_v54, %v797_v54  ;;  %v1446_v61 = vadd.f32 %v1445_v43, %v1323_v52  ;;  %1030 = vst [vmem:[%s2416_s2 + $0x338] sm:$0xff] %v910_v59  ;;  %v1213_v62 = vadd.f32 %v1212_v45, %v910_v59  ;;  %v1326_v63 = vmul.f32 %v910_v59, %v910_v59  ;;  %v801_v4 = vpop.f32.mrb[59].mxu0  ;;  %v914_v9 = vpop.f32.mrb[59].mxu1 }
 0x16c   :  { %1035 = vst [vmem:[%s2416_s2 + $0x360] sm:$0xff] %v799_v60  ;;  %v1151_v0 = vadd.f32 %v1150_v51, %v799_v60  ;;  %v1488_v2 = vadd.f32 %v1487_v47, %v1325_v56  ;;  %v1331_v6 = vmul.f32 %v799_v60, %v799_v60  ;;  %1037 = vst [vmem:[%s2416_s2 + $0x370] sm:$0xff] %v912_v1 }
 0x16d   :  { %v1467_v5 = vadd.f32 %v1466_v48, %v1324_v58  ;;  %v1193_v7 = vadd.f32 %v1192_v55, %v912_v1  ;;  %1036 = vst [vmem:[%s2416_s2 + $0x368] sm:$0xff] %v801_v4  ;;  %v1509_v11 = vadd.f32 %v1508_v49, %v1326_v63  ;;  %v1333_v8 = vmul.f32 %v912_v1, %v912_v1 }
 0x16e   :  { %v1172_v12 = vadd.f32 %v1171_v57, %v801_v4  ;;  %v1332_v13 = vmul.f32 %v801_v4, %v801_v4  ;;  %1038 = vst [vmem:[%s2416_s2 + $0x378] sm:$0xff] %v914_v9  ;;  %v1447_v10 = vadd.f32 %v1446_v61, %v1331_v6  ;;  %v1214_v3 = vadd.f32 %v1213_v62, %v914_v9 }
 0x16f   :  { %v1334_v16 = vmul.f32 %v914_v9, %v914_v9  ;;  %v1489_v17 = vadd.f32 %v1488_v2, %v1333_v8 }
 0x170   :  { %v1468_v14 = vadd.f32 %v1467_v5, %v1332_v13  ;;  %v805_v20 = vpop.f32.mrb[60].mxu0  ;;  %v918_v23 = vpop.f32.mrb[60].mxu1 }
 0x171   :  { %v1510_v18 = vadd.f32 %v1509_v11, %v1334_v16  ;;  %1043 = vst [vmem:[%s2416_s2 + $0x3a0] sm:$0xff] %v805_v20  ;;  %v1152_v21 = vadd.f32 %v1151_v0, %v805_v20  ;;  %v1339_v22 = vmul.f32 %v805_v20, %v805_v20  ;;  %v807_v24 = vpop.f32.mrb[61].mxu0  ;;  %1045 = vst [vmem:[%s2416_s2 + $0x3b0] sm:$0xff] %v918_v23  ;;  %v920_v28 = vpop.f32.mrb[61].mxu1 }
 0x172   :  { %v1194_v25 = vadd.f32 %v1193_v7, %v918_v23  ;;  %v1341_v27 = vmul.f32 %v918_v23, %v918_v23  ;;  %1044 = vst [vmem:[%s2416_s2 + $0x3a8] sm:$0xff] %v807_v24  ;;  %v1173_v15 = vadd.f32 %v1172_v12, %v807_v24  ;;  %v1340_v26 = vmul.f32 %v807_v24, %v807_v24  ;;  %v809_v29 = vpop.f32.mrb[62].mxu0  ;;  %v922_v34 = vpop.f32.mrb[62].mxu1 }
 0x173   :  { %v1448_v30 = vadd.f32 %v1447_v10, %v1339_v22  ;;  %1046 = vst [vmem:[%s2416_s2 + $0x3b8] sm:$0xff] %v920_v28  ;;  %v1215_v32 = vadd.f32 %v1214_v3, %v920_v28  ;;  %v1342_v33 = vmul.f32 %v920_v28, %v920_v28  ;;  %1051 = vst [vmem:[%s2416_s2 + $0x3e0] sm:$0xff] %v809_v29  ;;  %v811_v35 = vpop.f32.mrb[63].mxu0  ;;  %v924_v39 = vpop.f32.mrb[63].mxu1 }
 0x174   :  { %v1153_v19 = vadd.f32 %v1152_v21, %v809_v29  ;;  %v1490_v31 = vadd.f32 %v1489_v17, %v1341_v27  ;;  %v1469_v36 = vadd.f32 %v1468_v14, %v1340_v26  ;;  %v1347_v37 = vmul.f32 %v809_v29, %v809_v29  ;;  %1053 = vst [vmem:[%s2416_s2 + $0x3f0] sm:$0xff] %v922_v34 }
 0x175   :  { %v1195_v38 = vadd.f32 %v1194_v25, %v922_v34  ;;  %1052 = vst [vmem:[%s2416_s2 + $0x3e8] sm:$0xff] %v811_v35  ;;  %v1511_v40 = vadd.f32 %v1510_v18, %v1342_v33  ;;  %v1349_v42 = vmul.f32 %v922_v34, %v922_v34  ;;  %v1174_v43 = vadd.f32 %v1173_v15, %v811_v35 }
 0x176   :  { %v1154_v41 = vrot.slane %v1153_v19, 4  ;;  %1054 = vst [vmem:[%s2416_s2 + $0x3f8] sm:$0xff] %v924_v39  ;;  %v1449_v44 = vadd.f32 %v1448_v30, %v1347_v37  ;;  %v1348_v46 = vmul.f32 %v811_v35, %v811_v35  ;;  %v1216_v47 = vadd.f32 %v1215_v32, %v924_v39 }
 0x177   :  { %v1196_v45 = vrot.slane %v1195_v38, 4  ;;  %v1491_v49 = vadd.f32 %v1490_v31, %v1349_v42  ;;  %v1175_v50 = vrot.slane %v1174_v43, 4  ;;  %v1350_v51 = vmul.f32 %v924_v39, %v924_v39 }
 0x178   :  { %v1155_v48 = vadd.f32 %v1154_v41, %v1153_v19  ;;  %v1450_v52 = vrot.slane %v1449_v44, 4  ;;  %v1470_v54 = vadd.f32 %v1469_v36, %v1348_v46  ;;  %v1217_v55 = vrot.slane %v1216_v47, 4 }
 0x179   :  { %v1197_v53 = vadd.f32 %v1196_v45, %v1195_v38  ;;  %v1492_v57 = vrot.slane %v1491_v49, 4  ;;  %v1176_v58 = vadd.f32 %v1175_v50, %v1174_v43  ;;  %v1512_v59 = vadd.f32 %v1511_v40, %v1350_v51 }
 0x17a   :  { %v1156_v56 = vrot.slane %v1155_v48, 2  ;;  %v1451_v60 = vadd.f32 %v1450_v52, %v1449_v44  ;;  %v1471_v62 = vrot.slane %v1470_v54, 4  ;;  %v1218_v63 = vadd.f32 %v1217_v55, %v1216_v47 }
 0x17b   :  { %v1198_v61 = vrot.slane %v1197_v53, 2  ;;  %v1493_v1 = vadd.f32 %v1492_v57, %v1491_v49  ;;  %v1177_v4 = vrot.slane %v1176_v58, 2  ;;  %v1513_v2 = vrot.slane %v1512_v59, 4 }
 0x17c   :  { %v1157_v0 = vadd.f32 %v1156_v56, %v1155_v48  ;;  %v1452_v5 = vrot.slane %v1451_v60, 2  ;;  %v1472_v7 = vadd.f32 %v1471_v62, %v1470_v54  ;;  %v1219_v9 = vrot.slane %v1218_v63, 2 }
 0x17d   :  { %v1199_v6 = vadd.f32 %v1198_v61, %v1197_v53  ;;  %v1494_v11 = vrot.slane %v1493_v1, 2  ;;  %v1178_v8 = vadd.f32 %v1177_v4, %v1176_v58  ;;  %v1514_v12 = vadd.f32 %v1513_v2, %v1512_v59 }
 0x17e   :  { %v1158_v13 = vrot.slane %v1157_v0, 1  ;;  %v1453_v10 = vadd.f32 %v1452_v5, %v1451_v60  ;;  %v1473_v3 = vrot.slane %v1472_v7, 2  ;;  %v1220_v16 = vadd.f32 %v1219_v9, %v1218_v63 }
 0x17f   :  { %v1200_v17 = vrot.slane %v1199_v6, 1  ;;  %v1495_v14 = vadd.f32 %v1494_v11, %v1493_v1  ;;  %v1515_v18 = vrot.slane %v1514_v12, 2  ;;  %v1179_v21 = vrot.slane %v1178_v8, 1 }
 0x180   :  { %v1454_v20 = vrot.slane %v1453_v10, 1  ;;  %v1474_v22 = vadd.f32 %v1473_v3, %v1472_v7  ;;  %v1221_v24 = vrot.slane %v1220_v16, 1  ;;  %v1159_v27 = vadd.f32 %v1158_v13, %v1157_v0 }
 0x181   :  { %v1496_v23 = vrot.slane %v1495_v14, 1  ;;  %v1516_v25 = vadd.f32 %v1515_v18, %v1514_v12  ;;  %v1201_v28 = vadd.f32 %v1200_v17, %v1199_v6  ;;  %v1180_v33 = vadd.f32 %v1179_v21, %v1178_v8 }
 0x182   :  { %v1455_v15 = vadd.f32 %v1454_v20, %v1453_v10  ;;  %v1475_v26 = vrot.slane %v1474_v22, 1  ;;  %v1222_v31 = vadd.f32 %v1221_v24, %v1220_v16 }
 0x183   :  { %v1497_v29 = vadd.f32 %v1496_v23, %v1495_v14  ;;  %v1517_v30 = vrot.slane %v1516_v25, 1 }
 0x184   :  { %v1524_v32 = vsel %vm1519_vm0, %v1159_v27, %v1455_v15  ;;  %v1476_v19 = vadd.f32 %v1475_v26, %v1474_v22 }
 0x185   :  { %v1533_v34 = vsel %vm1528_vm1, %v1524_v32, 0.0  ;;  %v1526_v35 = vsel %vm1519_vm0, %v1201_v28, %v1497_v29  ;;  %v1518_v36 = vadd.f32 %v1517_v30, %v1516_v25 }
 0x186   :  { %1541 = vst [vmem:[%s2417_s3 + $0x20] sm:$0xff] %v1533_v34  ;;  %v1535_v37 = vsel %vm1528_vm1, %v1526_v35, 0.0  ;;  %v1525_v38 = vsel %vm1519_vm0, %v1180_v33, %v1476_v19 }
 0x187   :  { %1543 = vst [vmem:[%s2417_s3 + $0x30] sm:$0xff] %v1535_v37  ;;  %v1534_v39 = vsel %vm1528_vm1, %v1525_v38, 0.0  ;;  %v1527_v40 = vsel %vm1519_vm0, %v1222_v31, %v1518_v36 }
 0x188   :  { %1542 = vst [vmem:[%s2417_s3 + $0x28] sm:$0xff] %v1534_v39  ;;  %v1536_v41 = vsel %vm1528_vm1, %v1527_v40, 0.0 }
 0x189   :  { %1544 = vst [vmem:[%s2417_s3 + $0x38] sm:$0xff] %v1536_v41 }

// kernel: forward.12
= control target key start
LH: loop header
LB: loop body
LE: loop exit
PB: predicated region body
PF: predicated region fallthrough
CT: control target
= control target key end

     0   :  { %s453_s12 = smov 0   ;;  %s612_s0 = inlined_call_operand.vmem [shape: f32[512,128], index: 0, kind: input, shape index: {}]   ;;  %s613_s1 = inlined_call_operand.vmem [shape: f32[1,128], index: 1, kind: input, shape index: {}]   ;;  %s614_s2 = inlined_call_operand.vmem [shape: f32[1,128], index: 2, kind: input, shape index: {}]   ;;  %s615_s3 = inlined_call_operand.vmem [shape: f32[512,128], index: 3, kind: output, shape index: {}]  }
   0x1 LB: > { %s404_s13 = sadd.s32 4294967295, %s431_s12   ;;  %p408_p0 = scmp.ge.s32.totalorder %s431_s12, 1  ;;  %s431_s12 = sphi %s453_s12, %s13_s12  }
   0x2   : > { %p138_p1 = scmp.lt.s32.totalorder %s431_s12, 3 }
   0x4   : > { %p139_p2 = pnand %p408_p0, %p138_p1 }
   0x5   : > { %s409_s14 = sshll.u32 (!%p139_p2), %s404_s13, 5  ;;  %v464_v0 = vld [vmem:[%s613_s1] ss:$0 sm:$0xff] (!%p139_p2) }
   0x6   : > { %142 = sbr.rel (%p139_p2) target bundleno = 46 (0x2e), region = 32  ;;  %p163_p3 = scmp.lt.s32.totalorder (!%p139_p2), %s409_s14, 63  ;;  %v474_v1 = vld [vmem:[%s614_s2] ss:$0 sm:$0xff] (!%p139_p2) }
   0xd   : > { %s617_s14 = smov (!%p163_p3, %s409_s14), 63 }
   0xe   : > { %s410_s15 = sshll.u32 %s617_s14, 3 }
   0xf   : > { %s469_s20 = scalar_lea.vmem %s612_s0, %s410_s15  ;;  %s497_s25 = scalar_lea.vmem %s615_s3, %s410_s15 }
  0x10   : > { %v174_v2 = vld [vmem:[%s469_s20] sm:$0xff]  ;;  %v175_v3 = vld [vmem:[%s469_s20 + $0x8] sm:$0xff]  ;;  %v176_v4 = vld [vmem:[%s469_s20 + $0x10] sm:$0xff] }
  0x11   : > { %v213_v5 = vmul.f32 %v464_v0, %v174_v2  ;;  %v214_v6 = vmul.f32 %v464_v0, %v175_v3  ;;  %v215_v7 = vmul.f32 %v464_v0, %v176_v4  ;;  %v177_v8 = vld [vmem:[%s469_s20 + $0x18] sm:$0xff]  ;;  %v178_v9 = vld [vmem:[%s469_s20 + $0x20] sm:$0xff]  ;;  %v179_v10 = vld [vmem:[%s469_s20 + $0x28] sm:$0xff] }
  0x12   : > { %v216_v11 = vmul.f32 %v464_v0, %v177_v8  ;;  %v217_v12 = vmul.f32 %v464_v0, %v178_v9  ;;  %v218_v13 = vmul.f32 %v464_v0, %v179_v10  ;;  %v180_v14 = vld [vmem:[%s469_s20 + $0x30] sm:$0xff]  ;;  %v181_v15 = vld [vmem:[%s469_s20 + $0x38] sm:$0xff]  ;;  %v182_v24 = vld [vmem:[%s469_s20 + $0x40] sm:$0xff] }
  0x13   : > { %v252_v16 = vadd.f32 %v474_v1, %v213_v5  ;;  %v253_v17 = vadd.f32 %v474_v1, %v214_v6  ;;  %v254_v18 = vadd.f32 %v474_v1, %v215_v7  ;;  %v219_v19 = vmul.f32 %v464_v0, %v180_v14  ;;  %v183_v25 = vld [vmem:[%s469_s20 + $0x48] sm:$0xff]  ;;  %v184_v26 = vld [vmem:[%s469_s20 + $0x50] sm:$0xff]  ;;  %v185_v31 = vld [vmem:[%s469_s20 + $0x58] sm:$0xff] }
  0x14   : > { %v255_v20 = vadd.f32 %v474_v1, %v216_v11  ;;  %v256_v21 = vadd.f32 %v474_v1, %v217_v12  ;;  %v257_v22 = vadd.f32 %v474_v1, %v218_v13  ;;  %v220_v23 = vmul.f32 %v464_v0, %v181_v15  ;;  %v186_v32 = vld [vmem:[%s469_s20 + $0x60] sm:$0xff]  ;;  %v187_v33 = vld [vmem:[%s469_s20 + $0x68] sm:$0xff]  ;;  %v188_v38 = vld [vmem:[%s469_s20 + $0x70] sm:$0xff] }
  0x15   : > { %v284_v27 = vmax.f32 %v252_v16, 0.0  ;;  %v285_v28 = vmax.f32 %v253_v17, 0.0  ;;  %v286_v29 = vmax.f32 %v254_v18, 0.0  ;;  %v258_v30 = vadd.f32 %v474_v1, %v219_v19  ;;  %v189_v43 = vld [vmem:[%s469_s20 + $0x78] sm:$0xff]  ;;  %v190_v56 = vld [vmem:[%s469_s20 + $0x80] sm:$0xff]  ;;  %v191_v57 = vld [vmem:[%s469_s20 + $0x88] sm:$0xff] }
  0x16   : > { %v287_v34 = vmax.f32 %v255_v20, 0.0  ;;  %v288_v35 = vmax.f32 %v256_v21, 0.0  ;;  %v289_v36 = vmax.f32 %v257_v22, 0.0  ;;  %v259_v37 = vadd.f32 %v474_v1, %v220_v23  ;;  %v192_v58 = vld [vmem:[%s469_s20 + $0x90] sm:$0xff]  ;;  %v193_v63 = vld [vmem:[%s469_s20 + $0x98] sm:$0xff]  ;;  %v194_v2 = vld [vmem:[%s469_s20 + $0xa0] sm:$0xff] }
  0x17   : > { %316 = vst [vmem:[%s497_s25] sm:$0xff] %v284_v27  ;;  %317 = vst [vmem:[%s497_s25 + $0x8] sm:$0xff] %v285_v28  ;;  %v290_v39 = vmax.f32 %v258_v30, 0.0  ;;  %v221_v40 = vmul.f32 %v464_v0, %v182_v24  ;;  %v222_v41 = vmul.f32 %v464_v0, %v183_v25  ;;  %v223_v42 = vmul.f32 %v464_v0, %v184_v26  ;;  %v195_v3 = vld [vmem:[%s469_s20 + $0xa8] sm:$0xff]  ;;  %v196_v8 = vld [vmem:[%s469_s20 + $0xb0] sm:$0xff] }
  0x18   : > { %318 = vst [vmem:[%s497_s25 + $0x10] sm:$0xff] %v286_v29  ;;  %319 = vst [vmem:[%s497_s25 + $0x18] sm:$0xff] %v287_v34  ;;  %v291_v44 = vmax.f32 %v259_v37, 0.0  ;;  %v224_v45 = vmul.f32 %v464_v0, %v185_v31  ;;  %v225_v46 = vmul.f32 %v464_v0, %v186_v32  ;;  %v226_v47 = vmul.f32 %v464_v0, %v187_v33  ;;  %v197_v13 = vld [vmem:[%s469_s20 + $0xb8] sm:$0xff]  ;;  %v198_v26 = vld [vmem:[%s469_s20 + $0xc0] sm:$0xff] }
  0x19   : > { %320 = vst [vmem:[%s497_s25 + $0x20] sm:$0xff] %v288_v35  ;;  %321 = vst [vmem:[%s497_s25 + $0x28] sm:$0xff] %v289_v36  ;;  %v260_v48 = vadd.f32 %v474_v1, %v221_v40  ;;  %v261_v49 = vadd.f32 %v474_v1, %v222_v41  ;;  %v262_v50 = vadd.f32 %v474_v1, %v223_v42  ;;  %v199_v27 = vld [vmem:[%s469_s20 + $0xc8] sm:$0xff]  ;;  %v200_v28 = vld [vmem:[%s469_s20 + $0xd0] sm:$0xff] }
  0x1a   : > { %322 = vst [vmem:[%s497_s25 + $0x30] sm:$0xff] %v290_v39  ;;  %v227_v51 = vmul.f32 %v464_v0, %v188_v38  ;;  %323 = vst [vmem:[%s497_s25 + $0x38] sm:$0xff] %v291_v44  ;;  %v263_v52 = vadd.f32 %v474_v1, %v224_v45  ;;  %v264_v53 = vadd.f32 %v474_v1, %v225_v46  ;;  %v201_v33 = vld [vmem:[%s469_s20 + $0xd8] sm:$0xff]  ;;  %v202_v34 = vld [vmem:[%s469_s20 + $0xe0] sm:$0xff] }
  0x1b   : > { %v265_v54 = vadd.f32 %v474_v1, %v226_v47  ;;  %v228_v55 = vmul.f32 %v464_v0, %v189_v43  ;;  %v292_v59 = vmax.f32 %v260_v48, 0.0  ;;  %v293_v60 = vmax.f32 %v261_v49, 0.0  ;;  %v203_v35 = vld [vmem:[%s469_s20 + $0xe8] sm:$0xff]  ;;  %v204_v40 = vld [vmem:[%s469_s20 + $0xf0] sm:$0xff]  ;;  %v205_v45 = vld [vmem:[%s469_s20 + $0xf8] sm:$0xff] }
  0x1c   : > { %v294_v61 = vmax.f32 %v262_v50, 0.0  ;;  %v266_v62 = vadd.f32 %v474_v1, %v227_v51  ;;  %v295_v4 = vmax.f32 %v263_v52, 0.0  ;;  %v296_v5 = vmax.f32 %v264_v53, 0.0 }
  0x1d   : > { %v297_v6 = vmax.f32 %v265_v54, 0.0  ;;  %v267_v7 = vadd.f32 %v474_v1, %v228_v55  ;;  %324 = vst [vmem:[%s497_s25 + $0x40] sm:$0xff] %v292_v59  ;;  %325 = vst [vmem:[%s497_s25 + $0x48] sm:$0xff] %v293_v60  ;;  %v229_v10 = vmul.f32 %v464_v0, %v190_v56  ;;  %v230_v11 = vmul.f32 %v464_v0, %v191_v57 }
  0x1e   : > { %326 = vst [vmem:[%s497_s25 + $0x50] sm:$0xff] %v294_v61  ;;  %v298_v9 = vmax.f32 %v266_v62, 0.0  ;;  %v231_v12 = vmul.f32 %v464_v0, %v192_v58  ;;  %327 = vst [vmem:[%s497_s25 + $0x58] sm:$0xff] %v295_v4  ;;  %v232_v15 = vmul.f32 %v464_v0, %v193_v63  ;;  %v233_v16 = vmul.f32 %v464_v0, %v194_v2 }
  0x1f   : > { %328 = vst [vmem:[%s497_s25 + $0x60] sm:$0xff] %v296_v5  ;;  %329 = vst [vmem:[%s497_s25 + $0x68] sm:$0xff] %v297_v6  ;;  %v299_v14 = vmax.f32 %v267_v7, 0.0  ;;  %v234_v17 = vmul.f32 %v464_v0, %v195_v3  ;;  %v268_v18 = vadd.f32 %v474_v1, %v229_v10  ;;  %v269_v19 = vadd.f32 %v474_v1, %v230_v11 }
  0x20   : > { %330 = vst [vmem:[%s497_s25 + $0x70] sm:$0xff] %v298_v9  ;;  %v270_v20 = vadd.f32 %v474_v1, %v231_v12  ;;  %v235_v21 = vmul.f32 %v464_v0, %v196_v8  ;;  %v271_v22 = vadd.f32 %v474_v1, %v232_v15  ;;  %v272_v23 = vadd.f32 %v474_v1, %v233_v16 }
  0x21   : > { %331 = vst [vmem:[%s497_s25 + $0x78] sm:$0xff] %v299_v14  ;;  %v273_v24 = vadd.f32 %v474_v1, %v234_v17  ;;  %v236_v25 = vmul.f32 %v464_v0, %v197_v13  ;;  %v300_v29 = vmax.f32 %v268_v18, 0.0  ;;  %v301_v30 = vmax.f32 %v269_v19, 0.0 }
  0x22   : > { %v302_v31 = vmax.f32 %v270_v20, 0.0  ;;  %v274_v32 = vadd.f32 %v474_v1, %v235_v21  ;;  %v303_v36 = vmax.f32 %v271_v22, 0.0  ;;  %v304_v37 = vmax.f32 %v272_v23, 0.0 }
  0x23   : > { %v305_v38 = vmax.f32 %v273_v24, 0.0  ;;  %v275_v39 = vadd.f32 %v474_v1, %v236_v25  ;;  %332 = vst [vmem:[%s497_s25 + $0x80] sm:$0xff] %v300_v29  ;;  %333 = vst [vmem:[%s497_s25 + $0x88] sm:$0xff] %v301_v30  ;;  %v237_v42 = vmul.f32 %v464_v0, %v198_v26  ;;  %v238_v43 = vmul.f32 %v464_v0, %v199_v27 }
  0x24   : > { %334 = vst [vmem:[%s497_s25 + $0x90] sm:$0xff] %v302_v31  ;;  %v306_v41 = vmax.f32 %v274_v32, 0.0  ;;  %v239_v44 = vmul.f32 %v464_v0, %v200_v28  ;;  %335 = vst [vmem:[%s497_s25 + $0x98] sm:$0xff] %v303_v36  ;;  %v240_v47 = vmul.f32 %v464_v0, %v201_v33  ;;  %v241_v48 = vmul.f32 %v464_v0, %v202_v34 }
  0x25   : > { %336 = vst [vmem:[%s497_s25 + $0xa0] sm:$0xff] %v304_v37  ;;  %337 = vst [vmem:[%s497_s25 + $0xa8] sm:$0xff] %v305_v38  ;;  %v307_v46 = vmax.f32 %v275_v39, 0.0  ;;  %v242_v49 = vmul.f32 %v464_v0, %v203_v35  ;;  %v276_v50 = vadd.f32 %v474_v1, %v237_v42  ;;  %v277_v51 = vadd.f32 %v474_v1, %v238_v43 }
  0x26   : > { %338 = vst [vmem:[%s497_s25 + $0xb0] sm:$0xff] %v306_v41  ;;  %v278_v52 = vadd.f32 %v474_v1, %v239_v44  ;;  %v243_v53 = vmul.f32 %v464_v0, %v204_v40  ;;  %v279_v54 = vadd.f32 %v474_v1, %v240_v47  ;;  %v280_v55 = vadd.f32 %v474_v1, %v241_v48 }
  0x27   : > { %339 = vst [vmem:[%s497_s25 + $0xb8] sm:$0xff] %v307_v46  ;;  %v281_v56 = vadd.f32 %v474_v1, %v242_v49  ;;  %v244_v57 = vmul.f32 %v464_v0, %v205_v45  ;;  %v308_v58 = vmax.f32 %v276_v50, 0.0  ;;  %v309_v59 = vmax.f32 %v277_v51, 0.0 }
  0x28   : > { %v310_v60 = vmax.f32 %v278_v52, 0.0  ;;  %v282_v61 = vadd.f32 %v474_v1, %v243_v53  ;;  %v311_v62 = vmax.f32 %v279_v54, 0.0  ;;  %v312_v63 = vmax.f32 %v280_v55, 0.0 }
  0x29   : > { %v313_v2 = vmax.f32 %v281_v56, 0.0  ;;  %v283_v3 = vadd.f32 %v474_v1, %v244_v57  ;;  %340 = vst [vmem:[%s497_s25 + $0xc0] sm:$0xff] %v308_v58  ;;  %341 = vst [vmem:[%s497_s25 + $0xc8] sm:$0xff] %v309_v59 }
  0x2a   : > { %342 = vst [vmem:[%s497_s25 + $0xd0] sm:$0xff] %v310_v60  ;;  %v314_v4 = vmax.f32 %v282_v61, 0.0  ;;  %343 = vst [vmem:[%s497_s25 + $0xd8] sm:$0xff] %v311_v62 }
  0x2b   : > { %344 = vst [vmem:[%s497_s25 + $0xe0] sm:$0xff] %v312_v63  ;;  %345 = vst [vmem:[%s497_s25 + $0xe8] sm:$0xff] %v313_v2  ;;  %v315_v0 = vmax.f32 %v283_v3, 0.0 }
  0x2c   : > { %346 = vst [vmem:[%s497_s25 + $0xf0] sm:$0xff] %v314_v4 }
  0x2d   : > { %347 = vst [vmem:[%s497_s25 + $0xf8] sm:$0xff] %v315_v0 }
  0x2e PF: > { %s13_s12 = sadd.s32 1, %s431_s12  }
  0x2f   : > { %p10_p4 = scmp.ge.s32.totalorder %s13_s12, 4  }
  0x31   :  { %12 = sbr.rel (!%p10_p4) target bundleno = 1 (0x1), region = 62 }

// kernel: forward.13
= control target key start
LH: loop header
LB: loop body
LE: loop exit
PB: predicated region body
PF: predicated region fallthrough
CT: control target
= control target key end

     0   :  { %s865_s12 = smov 0   ;;  %s867_s13 = smov 0   ;;  %s947_s0 = inlined_call_operand.vmem [shape: bf16[4,128,128], index: 0, kind: input, shape index: {}]   ;;  %s948_s1 = inlined_call_operand.vmem [shape: bf16[4,128,128], index: 1, kind: input, shape index: {}]   ;;  %s949_s2 = inlined_call_operand.vmem [shape: f32[4,128,128], index: 2, kind: output, shape index: {0}]   ;;  %s950_s3 = inlined_call_operand.vmem [shape: f32[4,8,128], index: 3, kind: output, shape index: {1}]  }
   0x1   :  { %s869_s14 = smov 0  }
   0x2 LB: > { %s26_s15 = sadd.s32 1, %s839_s13  ;;  %p688_p0 = scmp.ge.s32.totalorder %s843_s14, 1  ;;  %s843_s14 = sphi %s869_s14, %s14_s14   ;;  %s839_s13 = sphi %s867_s13, %s952_s13   ;;  %s835_s12 = sphi %s865_s12, %s951_s12  }
   0x3   : > { %p28_p1 = scmp.ge.s32.totalorder %s26_s15, 4  ;;  %p173_p2 = scmp.lt.s32.totalorder %s843_s14, 5 }
   0x5   : > { %s954_s15 = smov (%p28_p1, %s26_s15), 0  ;;  %p174_p3 = pnand %p688_p0, %p173_p2 }
   0x6   : > { %p216_p4 = scmp.lt.s32.totalorder (!%p174_p3), %s835_s12, 3  ;;  %vm546_vm0 = vcmask (!%p174_p3), 1040384   ;;  %vm548_vm1 = vcmask (!%p174_p3), 1041408  }
   0x7   : > { %177 = sbr.rel (%p174_p3) target bundleno = 312 (0x138), region = 28 }
   0xe   : > { %s956_s12 = smov (!%p216_p4, %s835_s12), 3 }
   0xf   : > { %s714_s16 = sshll.u32 %s956_s12, 6  ;;  %s716_s23 = sshll.u32 %s956_s12, 7 }
  0x10   : > { %s889_s19 = scalar_lea.vmem %s948_s1, %s714_s16  ;;  %s897_s22 = scalar_lea.vmem %s947_s0, %s714_s16 }
  0x11   : > { %v805_v0 = vld [vmem:[%s889_s19] sm:$0xff]   ;;  %v806_v1 = vld [vmem:[%s889_s19 + $0x8] sm:$0xff]   ;;  %v807_v2 = vld [vmem:[%s889_s19 + $0x10] sm:$0xff]   ;;  %s916_s26 = scalar_lea.vmem %s949_s2, %s716_s23  ;;  %s695_s27 = sshll.u32 %s956_s12, 3 }
  0x12   : > { %733 = vmatprep.subr.bf16.mxu0 %v805_v0  ;;  %765 = vmatprep.subr.bf16.mxu1 %v805_v0  ;;  %v808_v3 = vld [vmem:[%s889_s19 + $0x18] sm:$0xff]   ;;  %v813_v4 = vld [vmem:[%s897_s22] sm:$0xff]   ;;  %v810_v7 = vld [vmem:[%s889_s19 + $0x28] sm:$0xff]   ;;  %s244_s30 = scalar_lea.vmem %s950_s3, %s695_s27 }
  0x13   : > { %734 = vmatpush3.bf16.msra.mxu0 %v805_v0  ;;  %773 = vmatpush3.bf16.msra.mxu1 %v805_v0  ;;  %v809_v5 = vld [vmem:[%s889_s19 + $0x20] sm:$0xff]   ;;  %v811_v8 = vld [vmem:[%s889_s19 + $0x30] sm:$0xff]   ;;  %v812_v9 = vld [vmem:[%s889_s19 + $0x38] sm:$0xff]  }
  0x14   : > { %735 = vmatprep.subr.bf16.mxu0 %v806_v1  ;;  %766 = vmatprep.subr.bf16.mxu1 %v806_v1  ;;  %v817_v6 = vld [vmem:[%s897_s22 + $0x20] sm:$0xff]   ;;  %v814_v10 = vld [vmem:[%s897_s22 + $0x8] sm:$0xff]   ;;  %v815_v12 = vld [vmem:[%s897_s22 + $0x10] sm:$0xff]  }
  0x15   : > { %749 = vmatprep.mubr.bf16.mxu0 %v813_v4  ;;  %757 = vmatprep.mubr.bf16.mxu1 %v817_v6  ;;  %v818_v11 = vld [vmem:[%s897_s22 + $0x28] sm:$0xff]   ;;  %v819_v13 = vld [vmem:[%s897_s22 + $0x30] sm:$0xff]   ;;  %v816_v14 = vld [vmem:[%s897_s22 + $0x18] sm:$0xff]  }
  0x16   : > { %v820_v15 = vld [vmem:[%s897_s22 + $0x38] sm:$0xff]  }
  0x17   : > { %736 = vmatpush3.bf16.msra.mxu0 %v806_v1  ;;  %774 = vmatpush3.bf16.msra.mxu1 %v806_v1 }
  0x18   : > { %737 = vmatprep.subr.bf16.mxu0 %v807_v2  ;;  %767 = vmatprep.subr.bf16.mxu1 %v807_v2 }
  0x1b   : > { %738 = vmatpush3.bf16.msra.mxu0 %v807_v2  ;;  %775 = vmatpush3.bf16.msra.mxu1 %v807_v2 }
  0x1c   : > { %739 = vmatprep.subr.bf16.mxu0 %v808_v3  ;;  %768 = vmatprep.subr.bf16.mxu1 %v808_v3 }
  0x1f   : > { %740 = vmatpush3.bf16.msra.mxu0 %v808_v3  ;;  %776 = vmatpush3.bf16.msra.mxu1 %v808_v3 }
  0x20   : > { %741 = vmatprep.subr.bf16.mxu0 %v809_v5  ;;  %769 = vmatprep.subr.bf16.mxu1 %v809_v5 }
  0x23   : > { %742 = vmatpush3.bf16.msra.mxu0 %v809_v5  ;;  %777 = vmatpush3.bf16.msra.mxu1 %v809_v5 }
  0x24   : > { %743 = vmatprep.subr.bf16.mxu0 %v810_v7  ;;  %770 = vmatprep.subr.bf16.mxu1 %v810_v7 }
  0x27   : > { %744 = vmatpush3.bf16.msra.mxu0 %v810_v7  ;;  %778 = vmatpush3.bf16.msra.mxu1 %v810_v7 }
  0x28   : > { %745 = vmatprep.subr.bf16.mxu0 %v811_v8  ;;  %771 = vmatprep.subr.bf16.mxu1 %v811_v8 }
  0x2b   : > { %746 = vmatpush3.bf16.msra.mxu0 %v811_v8  ;;  %779 = vmatpush3.bf16.msra.mxu1 %v811_v8 }
  0x2c   : > { %747 = vmatprep.subr.bf16.mxu0 %v812_v9  ;;  %772 = vmatprep.subr.bf16.mxu1 %v812_v9 }
  0x2f   : > { %748 = vmatpush3.bf16.msra.mxu0 %v812_v9  ;;  %780 = vmatpush3.bf16.msra.mxu1 %v812_v9 }
  0x32   : > { %750 = vmatmul.mubr.bf16.vlgmr.msra.gmra.mrb[0].mxu0 %v814_v10  ;;  %758 = vmatmul.mubr.bf16.vlgmr.msra.gmra.mrb[0].mxu1 %v818_v11 }
  0x33   : > { %753 = vmatprep.mubr.bf16.mxu0 %v815_v12  ;;  %761 = vmatprep.mubr.bf16.mxu1 %v819_v13 }
  0x3a   : > { %754 = vmatmul.mubr.bf16.gmra.mrb[4].mxu0 %v816_v14  ;;  %762 = vmatmul.mubr.bf16.gmra.mrb[4].mxu1 %v820_v15 }
 0x105   : > { %v751_v16 = vpop.f32.mrb[0].mxu0  ;;  %v759_v17 = vpop.f32.mrb[0].mxu1 }
 0x106   : > { %474 = vst [vmem:[%s916_s26 + $0x10] sm:$0xff] %v751_v16  ;;  %v409_v18 = vpop.f32.mrb[1].mxu0  ;;  %482 = vst [vmem:[%s916_s26 + $0x50] sm:$0xff] %v759_v17  ;;  %v441_v19 = vpop.f32.mrb[1].mxu1  ;;  %v511_v27 = vmul.f32 %v751_v16, %v751_v16  ;;  %v519_v59 = vmul.f32 %v759_v17, %v759_v17 }
 0x107   : > { %472 = vst [vmem:[%s916_s26] sm:$0xff] %v409_v18  ;;  %v752_v20 = vpop.f32.mrb[2].mxu0  ;;  %480 = vst [vmem:[%s916_s26 + $0x40] sm:$0xff] %v441_v19  ;;  %v760_v21 = vpop.f32.mrb[2].mxu1  ;;  %v509_v24 = vmul.f32 %v409_v18, %v409_v18  ;;  %v517_v53 = vmul.f32 %v441_v19, %v441_v19 }
 0x108   : > { %475 = vst [vmem:[%s916_s26 + $0x18] sm:$0xff] %v752_v20  ;;  %v412_v22 = vpop.f32.mrb[3].mxu0  ;;  %483 = vst [vmem:[%s916_s26 + $0x58] sm:$0xff] %v760_v21  ;;  %v444_v23 = vpop.f32.mrb[3].mxu1  ;;  %v512_v30 = vmul.f32 %v752_v20, %v752_v20  ;;  %v520_v62 = vmul.f32 %v760_v21, %v760_v21 }
 0x109   : > { %473 = vst [vmem:[%s916_s26 + $0x8] sm:$0xff] %v412_v22  ;;  %v488_v25 = vadd.f32 %v412_v22, %v409_v18  ;;  %v510_v26 = vmul.f32 %v412_v22, %v412_v22  ;;  %481 = vst [vmem:[%s916_s26 + $0x48] sm:$0xff] %v444_v23  ;;  %v518_v58 = vmul.f32 %v444_v23, %v444_v23 }
 0x10b   : > { %v489_v28 = vadd.f32 %v751_v16, %v488_v25  ;;  %v525_v29 = vadd.f32 %v510_v26, %v509_v24 }
 0x10d   : > { %v526_v31 = vadd.f32 %v525_v29, %v511_v27  ;;  %v755_v32 = vpop.f32.mrb[4].mxu0  ;;  %v490_v33 = vadd.f32 %v752_v20, %v489_v28  ;;  %v763_v34 = vpop.f32.mrb[4].mxu1 }
 0x10e   : > { %478 = vst [vmem:[%s916_s26 + $0x30] sm:$0xff] %v755_v32  ;;  %v425_v35 = vpop.f32.mrb[5].mxu0  ;;  %486 = vst [vmem:[%s916_s26 + $0x70] sm:$0xff] %v763_v34  ;;  %v457_v36 = vpop.f32.mrb[5].mxu1  ;;  %v515_v47 = vmul.f32 %v755_v32, %v755_v32  ;;  %v523_v7 = vmul.f32 %v763_v34, %v763_v34 }
 0x10f   : > { %476 = vst [vmem:[%s916_s26 + $0x20] sm:$0xff] %v425_v35  ;;  %v491_v37 = vadd.f32 %v490_v33, %v425_v35  ;;  %v513_v38 = vmul.f32 %v425_v35, %v425_v35  ;;  %v527_v39 = vadd.f32 %v526_v31, %v512_v30  ;;  %v756_v40 = vpop.f32.mrb[6].mxu0  ;;  %484 = vst [vmem:[%s916_s26 + $0x60] sm:$0xff] %v457_v36  ;;  %v764_v41 = vpop.f32.mrb[6].mxu1 }
 0x110   : > { %479 = vst [vmem:[%s916_s26 + $0x38] sm:$0xff] %v756_v40  ;;  %v428_v42 = vpop.f32.mrb[7].mxu0  ;;  %487 = vst [vmem:[%s916_s26 + $0x78] sm:$0xff] %v764_v41  ;;  %v460_v43 = vpop.f32.mrb[7].mxu1  ;;  %v516_v50 = vmul.f32 %v756_v40, %v756_v40  ;;  %v521_v1 = vmul.f32 %v457_v36, %v457_v36  ;;  %v524_v10 = vmul.f32 %v764_v41, %v764_v41 }
 0x111   : > { %v528_v44 = vadd.f32 %v527_v39, %v513_v38  ;;  %477 = vst [vmem:[%s916_s26 + $0x28] sm:$0xff] %v428_v42  ;;  %v492_v45 = vadd.f32 %v491_v37, %v428_v42  ;;  %v514_v46 = vmul.f32 %v428_v42, %v428_v42  ;;  %485 = vst [vmem:[%s916_s26 + $0x68] sm:$0xff] %v460_v43 }
 0x112   : > { %v522_v6 = vmul.f32 %v460_v43, %v460_v43 }
 0x113   : > { %v493_v48 = vadd.f32 %v755_v32, %v492_v45  ;;  %v529_v49 = vadd.f32 %v528_v44, %v514_v46 }
 0x115   : > { %v530_v51 = vadd.f32 %v529_v49, %v515_v47  ;;  %v494_v52 = vadd.f32 %v756_v40, %v493_v48 }
 0x117   : > { %v495_v54 = vadd.f32 %v494_v52, %v441_v19  ;;  %v531_v55 = vadd.f32 %v530_v51, %v516_v50 }
 0x119   : > { %v532_v56 = vadd.f32 %v531_v55, %v517_v53  ;;  %v496_v57 = vadd.f32 %v495_v54, %v444_v23 }
 0x11b   : > { %v497_v60 = vadd.f32 %v759_v17, %v496_v57  ;;  %v533_v61 = vadd.f32 %v532_v56, %v518_v58 }
 0x11d   : > { %v534_v63 = vadd.f32 %v533_v61, %v519_v59  ;;  %v498_v0 = vadd.f32 %v760_v21, %v497_v60 }
 0x11f   : > { %v499_v2 = vadd.f32 %v498_v0, %v457_v36  ;;  %v535_v3 = vadd.f32 %v534_v63, %v520_v62 }
 0x121   : > { %v536_v4 = vadd.f32 %v535_v3, %v521_v1  ;;  %v500_v5 = vadd.f32 %v499_v2, %v460_v43 }
 0x123   : > { %v501_v8 = vadd.f32 %v763_v34, %v500_v5  ;;  %v537_v9 = vadd.f32 %v536_v4, %v522_v6 }
 0x125   : > { %v502_v11 = vadd.f32 %v764_v41, %v501_v8  ;;  %v538_v12 = vadd.f32 %v537_v9, %v523_v7 }
 0x127   : > { %v503_v13 = vrot.slane %v502_v11, 4  ;;  %v539_v14 = vadd.f32 %v538_v12, %v524_v10 }
 0x129   : > { %v504_v15 = vadd.f32 %v503_v13, %v502_v11  ;;  %v540_v16 = vrot.slane %v539_v14, 4 }
 0x12b   : > { %v505_v17 = vrot.slane %v504_v15, 2  ;;  %v541_v18 = vadd.f32 %v540_v16, %v539_v14 }
 0x12d   : > { %v506_v19 = vadd.f32 %v505_v17, %v504_v15  ;;  %v542_v20 = vrot.slane %v541_v18, 2 }
 0x12f   : > { %v507_v21 = vrot.slane %v506_v19, 1  ;;  %v543_v22 = vadd.f32 %v542_v20, %v541_v18 }
 0x131   : > { %v544_v23 = vrot.slane %v543_v22, 1  ;;  %v508_v24 = vadd.f32 %v507_v21, %v506_v19 }
 0x133   : > { %v545_v25 = vadd.f32 %v544_v23, %v543_v22 }
 0x135   : > { %v547_v26 = vsel %vm546_vm0, %v508_v24, %v545_v25 }
 0x136   : > { %v549_v27 = vsel %vm548_vm1, %v547_v26, 0.0 }
 0x137   : > { %550 = vst [vmem:[%s244_s30] sm:$0xff] %v549_v27 }
 0x138 PF: > { %s14_s14 = sadd.s32 1, %s843_s14   ;;  %s951_s12 = smov %s839_s13 }
 0x139   : > { %p11_p5 = scmp.ge.s32.totalorder %s14_s14, 6   ;;  %s952_s13 = smov %s954_s15 }
 0x13b   :  { %13 = sbr.rel (!%p11_p5) target bundleno = 2 (0x2), region = 73 }

// kernel: forward.15
= control target key start
LH: loop header
LB: loop body
LE: loop exit
PB: predicated region body
PF: predicated region fallthrough
CT: control target
= control target key end

     0   :  { %s1143_s12 = smov 0   ;;  %s1145_s13 = smov 0   ;;  %s1359_s0 = inlined_call_operand.vmem [shape: bf16[4,512,128], index: 0, kind: input, shape index: {}]   ;;  %s1360_s1 = inlined_call_operand.vmem [shape: bf16[4,128,128], index: 1, kind: input, shape index: {}]   ;;  %s1361_s2 = inlined_call_operand.vmem [shape: f32[4,512,128], index: 2, kind: output, shape index: {0}]   ;;  %s1362_s3 = inlined_call_operand.vmem [shape: f32[8,8,128], index: 3, kind: output, shape index: {1}]  }
   0x1   :  { %s1147_s14 = smov 0   ;;  %s1149_s15 = smov 0  }
   0x2   :  { %s1151_s16 = smov 0  }
   0x3 LB: > { %s23_s17 = sadd.s32 1, %s1113_s14  ;;  %s26_s18 = sadd.s32 1, %s1117_s15  ;;  %s1121_s16 = sphi %s1151_s16, %s14_s16   ;;  %s1117_s15 = sphi %s1149_s15, %s1366_s15   ;;  %s1113_s14 = sphi %s1147_s14, %s1365_s14   ;;  %s1109_s13 = sphi %s1145_s13, %s1364_s13   ;;  %s1105_s12 = sphi %s1143_s12, %s1363_s12  }
   0x4   : > { %p24_p0 = scmp.ge.s32.totalorder %s23_s17, 2  ;;  %p893_p1 = scmp.ge.s32.totalorder %s1121_s16, 1 }
   0x5   : > { %p175_p2 = scmp.lt.s32.totalorder %s1121_s16, 9 }
   0x6   : > { %s1368_s17 = smov (%p24_p0, %s23_s17), 0  ;;  %s1370_s18 = smov (!%p24_p0, %s26_s18), %s1117_s15 }
   0x7   : > { %p176_p3 = pnand %p893_p1, %p175_p2  ;;  %p28_p4 = scmp.ge.s32.totalorder %s1370_s18, 4 }
   0x8   : > { %s894_s19 = sshll.u32 (!%p176_p3), %s1105_s12, 5  ;;  %p219_p5 = scmp.lt.s32.totalorder (!%p176_p3), %s1109_s13, 3  ;;  %vm743_vm0 = vcmask (!%p176_p3), 1040384   ;;  %vm745_vm1 = vcmask (!%p176_p3), 1041408  }
   0x9   : > { %s1372_s18 = smov (%p28_p4, %s1370_s18), 0  ;;  %179 = sbr.rel (%p176_p3) target bundleno = 347 (0x15b), region = 28 }
   0xa   : > { %p221_p6 = scmp.lt.s32.totalorder (!%p176_p3), %s894_s19, 63  ;;  %s902_s7 = sshll.u32 (!%p176_p3), %s1109_s13, 1 }
   0xb   : > { %s244_s8 = sadd.s32 (!%p176_p3), %s1105_s12, %s902_s7 }
   0xc   : > { %p245_p7 = scmp.lt.s32.totalorder (!%p176_p3), %s244_s8, 7 }
  0x10   : > { %s220_s20 = scalar_select %p219_p5, %s1109_s13, 3 }
  0x11   : > { %s1374_s19 = smov (!%p221_p6, %s894_s19), 63  ;;  %s1376_s8 = smov (!%p245_p7, %s244_s8), 7 }
  0x12   : > { %s895_s21 = sshll.u32 %s220_s20, 6  ;;  %s903_s9 = sshll.u32 %s1376_s8, 3 }
  0x13   : > { %s1183_s24 = scalar_lea.vmem %s1360_s1, %s895_s21  ;;  %s1185_s25 = sadd.s32 %s895_s21, %s1374_s19 }
  0x14   : > { %v1059_v0 = vld [vmem:[%s1183_s24] sm:$0xff]   ;;  %v1060_v1 = vld [vmem:[%s1183_s24 + $0x8] sm:$0xff]   ;;  %s896_s26 = sshll.u32 %s1185_s25, 2  ;;  %v1061_v2 = vld [vmem:[%s1183_s24 + $0x10] sm:$0xff]   ;;  %s901_s30 = sshll.u32 %s1185_s25, 3 }
  0x15   : > { %955 = vmatprep.subr.bf16.mxu0 %v1059_v0  ;;  %1003 = vmatprep.subr.bf16.mxu1 %v1059_v0  ;;  %s1194_s29 = scalar_lea.vmem %s1359_s0, %s896_s26  ;;  %v1062_v3 = vld [vmem:[%s1183_s24 + $0x18] sm:$0xff]   ;;  %v1063_v5 = vld [vmem:[%s1183_s24 + $0x20] sm:$0xff]   ;;  %v1064_v6 = vld [vmem:[%s1183_s24 + $0x28] sm:$0xff]   ;;  %s1221_s6 = scalar_lea.vmem %s1361_s2, %s901_s30 }
  0x16   : > { %956 = vmatpush3.bf16.msra.mxu0 %v1059_v0  ;;  %1011 = vmatpush3.bf16.msra.mxu1 %v1059_v0  ;;  %v1067_v4 = vld [vmem:[%s1194_s29] sm:$0xff]   ;;  %v1065_v8 = vld [vmem:[%s1183_s24 + $0x30] sm:$0xff]   ;;  %v1066_v9 = vld [vmem:[%s1183_s24 + $0x38] sm:$0xff]   ;;  %s248_s12 = scalar_lea.vmem %s1362_s3, %s903_s9 }
  0x17   : > { %957 = vmatprep.subr.bf16.mxu0 %v1060_v1  ;;  %1004 = vmatprep.subr.bf16.mxu1 %v1060_v1  ;;  %v1075_v7 = vld [vmem:[%s1194_s29 + $0x40] sm:$0xff]   ;;  %v1068_v10 = vld [vmem:[%s1194_s29 + $0x8] sm:$0xff]   ;;  %v1069_v12 = vld [vmem:[%s1194_s29 + $0x10] sm:$0xff]  }
  0x18   : > { %971 = vmatprep.mubr.bf16.mxu0 %v1067_v4  ;;  %987 = vmatprep.mubr.bf16.mxu1 %v1075_v7  ;;  %v1076_v11 = vld [vmem:[%s1194_s29 + $0x48] sm:$0xff]   ;;  %v1077_v13 = vld [vmem:[%s1194_s29 + $0x50] sm:$0xff]   ;;  %v1070_v14 = vld [vmem:[%s1194_s29 + $0x18] sm:$0xff]  }
  0x19   : > { %v1078_v15 = vld [vmem:[%s1194_s29 + $0x58] sm:$0xff]   ;;  %v1071_v16 = vld [vmem:[%s1194_s29 + $0x20] sm:$0xff]   ;;  %v1072_v18 = vld [vmem:[%s1194_s29 + $0x28] sm:$0xff]  }
  0x1a   : > { %958 = vmatpush3.bf16.msra.mxu0 %v1060_v1  ;;  %1012 = vmatpush3.bf16.msra.mxu1 %v1060_v1  ;;  %v1079_v17 = vld [vmem:[%s1194_s29 + $0x60] sm:$0xff]   ;;  %v1080_v19 = vld [vmem:[%s1194_s29 + $0x68] sm:$0xff]   ;;  %v1073_v20 = vld [vmem:[%s1194_s29 + $0x30] sm:$0xff]  }
  0x1b   : > { %959 = vmatprep.subr.bf16.mxu0 %v1061_v2  ;;  %1005 = vmatprep.subr.bf16.mxu1 %v1061_v2  ;;  %v1081_v21 = vld [vmem:[%s1194_s29 + $0x70] sm:$0xff]   ;;  %v1074_v22 = vld [vmem:[%s1194_s29 + $0x38] sm:$0xff]  }
  0x1c   : > { %v1082_v23 = vld [vmem:[%s1194_s29 + $0x78] sm:$0xff]  }
  0x1e   : > { %960 = vmatpush3.bf16.msra.mxu0 %v1061_v2  ;;  %1013 = vmatpush3.bf16.msra.mxu1 %v1061_v2 }
  0x1f   : > { %961 = vmatprep.subr.bf16.mxu0 %v1062_v3  ;;  %1006 = vmatprep.subr.bf16.mxu1 %v1062_v3 }
  0x22   : > { %962 = vmatpush3.bf16.msra.mxu0 %v1062_v3  ;;  %1014 = vmatpush3.bf16.msra.mxu1 %v1062_v3 }
  0x23   : > { %963 = vmatprep.subr.bf16.mxu0 %v1063_v5  ;;  %1007 = vmatprep.subr.bf16.mxu1 %v1063_v5 }
  0x26   : > { %964 = vmatpush3.bf16.msra.mxu0 %v1063_v5  ;;  %1015 = vmatpush3.bf16.msra.mxu1 %v1063_v5 }
  0x27   : > { %965 = vmatprep.subr.bf16.mxu0 %v1064_v6  ;;  %1008 = vmatprep.subr.bf16.mxu1 %v1064_v6 }
  0x2a   : > { %966 = vmatpush3.bf16.msra.mxu0 %v1064_v6  ;;  %1016 = vmatpush3.bf16.msra.mxu1 %v1064_v6 }
  0x2b   : > { %967 = vmatprep.subr.bf16.mxu0 %v1065_v8  ;;  %1009 = vmatprep.subr.bf16.mxu1 %v1065_v8 }
  0x2e   : > { %968 = vmatpush3.bf16.msra.mxu0 %v1065_v8  ;;  %1017 = vmatpush3.bf16.msra.mxu1 %v1065_v8 }
  0x2f   : > { %969 = vmatprep.subr.bf16.mxu0 %v1066_v9  ;;  %1010 = vmatprep.subr.bf16.mxu1 %v1066_v9 }
  0x32   : > { %970 = vmatpush3.bf16.msra.mxu0 %v1066_v9  ;;  %1018 = vmatpush3.bf16.msra.mxu1 %v1066_v9 }
  0x35   : > { %972 = vmatmul.mubr.bf16.vlgmr.msra.gmra.mrb[0].mxu0 %v1068_v10  ;;  %988 = vmatmul.mubr.bf16.vlgmr.msra.gmra.mrb[0].mxu1 %v1076_v11 }
  0x36   : > { %975 = vmatprep.mubr.bf16.mxu0 %v1069_v12  ;;  %991 = vmatprep.mubr.bf16.mxu1 %v1077_v13 }
  0x3d   : > { %976 = vmatmul.mubr.bf16.gmra.mrb[4].mxu0 %v1070_v14  ;;  %992 = vmatmul.mubr.bf16.gmra.mrb[4].mxu1 %v1078_v15 }
  0x3e   : > { %979 = vmatprep.mubr.bf16.mxu0 %v1071_v16  ;;  %995 = vmatprep.mubr.bf16.mxu1 %v1079_v17 }
  0x45   : > { %980 = vmatmul.mubr.bf16.gmra.mrb[8].mxu0 %v1072_v18  ;;  %996 = vmatmul.mubr.bf16.gmra.mrb[8].mxu1 %v1080_v19 }
  0x46   : > { %983 = vmatprep.mubr.bf16.mxu0 %v1073_v20  ;;  %999 = vmatprep.mubr.bf16.mxu1 %v1081_v21 }
  0x4d   : > { %984 = vmatmul.mubr.bf16.gmra.mrb[12].mxu0 %v1074_v22  ;;  %1000 = vmatmul.mubr.bf16.gmra.mrb[12].mxu1 %v1082_v23 }
 0x108   : > { %v973_v24 = vpop.f32.mrb[0].mxu0  ;;  %v1223_v25 = vpop.f32.mrb[0].mxu1 }
 0x109   : > { %607 = vst [vmem:[%s1221_s6 + $0x10] sm:$0xff] %v973_v24  ;;  %v478_v26 = vpop.f32.mrb[1].mxu0  ;;  %623 = vst [vmem:[%s1221_s6 + $0x90] sm:$0xff] %v1223_v25  ;;  %v1228_v27 = vpop.f32.mrb[1].mxu1  ;;  %v676_v35 = vmul.f32 %v973_v24, %v973_v24 }
 0x10a   : > { %605 = vst [vmem:[%s1221_s6] sm:$0xff] %v478_v26  ;;  %v974_v28 = vpop.f32.mrb[2].mxu0  ;;  %621 = vst [vmem:[%s1221_s6 + $0x80] sm:$0xff] %v1228_v27  ;;  %v1233_v29 = vpop.f32.mrb[2].mxu1  ;;  %v674_v32 = vmul.f32 %v478_v26, %v478_v26 }
 0x10b   : > { %608 = vst [vmem:[%s1221_s6 + $0x18] sm:$0xff] %v974_v28  ;;  %v481_v30 = vpop.f32.mrb[3].mxu0  ;;  %624 = vst [vmem:[%s1221_s6 + $0x98] sm:$0xff] %v1233_v29  ;;  %v1238_v31 = vpop.f32.mrb[3].mxu1  ;;  %v677_v38 = vmul.f32 %v974_v28, %v974_v28 }
 0x10c   : > { %606 = vst [vmem:[%s1221_s6 + $0x8] sm:$0xff] %v481_v30  ;;  %v637_v33 = vadd.f32 %v481_v30, %v478_v26  ;;  %v675_v34 = vmul.f32 %v481_v30, %v481_v30  ;;  %622 = vst [vmem:[%s1221_s6 + $0x88] sm:$0xff] %v1238_v31 }
 0x10e   : > { %v638_v36 = vadd.f32 %v973_v24, %v637_v33  ;;  %v706_v37 = vadd.f32 %v675_v34, %v674_v32 }
 0x110   : > { %v707_v39 = vadd.f32 %v706_v37, %v676_v35  ;;  %v977_v40 = vpop.f32.mrb[4].mxu0  ;;  %v639_v41 = vadd.f32 %v974_v28, %v638_v36  ;;  %v1243_v42 = vpop.f32.mrb[4].mxu1 }
 0x111   : > { %611 = vst [vmem:[%s1221_s6 + $0x30] sm:$0xff] %v977_v40  ;;  %v494_v43 = vpop.f32.mrb[5].mxu0  ;;  %627 = vst [vmem:[%s1221_s6 + $0xb0] sm:$0xff] %v1243_v42  ;;  %v1248_v44 = vpop.f32.mrb[5].mxu1  ;;  %v680_v55 = vmul.f32 %v977_v40, %v977_v40 }
 0x112   : > { %609 = vst [vmem:[%s1221_s6 + $0x20] sm:$0xff] %v494_v43  ;;  %v640_v45 = vadd.f32 %v639_v41, %v494_v43  ;;  %v678_v46 = vmul.f32 %v494_v43, %v494_v43  ;;  %v708_v47 = vadd.f32 %v707_v39, %v677_v38  ;;  %v978_v48 = vpop.f32.mrb[6].mxu0  ;;  %625 = vst [vmem:[%s1221_s6 + $0xa0] sm:$0xff] %v1248_v44  ;;  %v1253_v49 = vpop.f32.mrb[6].mxu1 }
 0x113   : > { %612 = vst [vmem:[%s1221_s6 + $0x38] sm:$0xff] %v978_v48  ;;  %v497_v50 = vpop.f32.mrb[7].mxu0  ;;  %628 = vst [vmem:[%s1221_s6 + $0xb8] sm:$0xff] %v1253_v49  ;;  %v1258_v51 = vpop.f32.mrb[7].mxu1  ;;  %v681_v58 = vmul.f32 %v978_v48, %v978_v48  ;;  %v690_v41 = vmul.f32 %v1228_v27, %v1228_v27 }
 0x114   : > { %v709_v52 = vadd.f32 %v708_v47, %v678_v46  ;;  %610 = vst [vmem:[%s1221_s6 + $0x28] sm:$0xff] %v497_v50  ;;  %v641_v53 = vadd.f32 %v640_v45, %v497_v50  ;;  %v679_v54 = vmul.f32 %v497_v50, %v497_v50  ;;  %626 = vst [vmem:[%s1221_s6 + $0xa8] sm:$0xff] %v1258_v51 }
 0x115   : > { %v692_v50 = vmul.f32 %v1223_v25, %v1223_v25 }
 0x116   : > { %v642_v56 = vadd.f32 %v977_v40, %v641_v53  ;;  %v710_v57 = vadd.f32 %v709_v52, %v679_v54  ;;  %v693_v54 = vmul.f32 %v1233_v29, %v1233_v29 }
 0x118   : > { %v711_v59 = vadd.f32 %v710_v57, %v680_v55  ;;  %v981_v60 = vpop.f32.mrb[8].mxu0  ;;  %v643_v61 = vadd.f32 %v978_v48, %v642_v56  ;;  %v1263_v62 = vpop.f32.mrb[8].mxu1  ;;  %v691_v48 = vmul.f32 %v1238_v31, %v1238_v31 }
 0x119   : > { %615 = vst [vmem:[%s1221_s6 + $0x50] sm:$0xff] %v981_v60  ;;  %v510_v63 = vpop.f32.mrb[9].mxu0  ;;  %631 = vst [vmem:[%s1221_s6 + $0xd0] sm:$0xff] %v1263_v62  ;;  %v1268_v0 = vpop.f32.mrb[9].mxu1  ;;  %v684_v11 = vmul.f32 %v981_v60, %v981_v60 }
 0x11a   : > { %613 = vst [vmem:[%s1221_s6 + $0x40] sm:$0xff] %v510_v63  ;;  %v644_v1 = vadd.f32 %v643_v61, %v510_v63  ;;  %v682_v2 = vmul.f32 %v510_v63, %v510_v63  ;;  %v712_v3 = vadd.f32 %v711_v59, %v681_v58  ;;  %v982_v4 = vpop.f32.mrb[10].mxu0  ;;  %629 = vst [vmem:[%s1221_s6 + $0xc0] sm:$0xff] %v1268_v0  ;;  %v1273_v5 = vpop.f32.mrb[10].mxu1 }
 0x11b   : > { %616 = vst [vmem:[%s1221_s6 + $0x58] sm:$0xff] %v982_v4  ;;  %v513_v6 = vpop.f32.mrb[11].mxu0  ;;  %632 = vst [vmem:[%s1221_s6 + $0xd8] sm:$0xff] %v1273_v5  ;;  %v1278_v7 = vpop.f32.mrb[11].mxu1  ;;  %v685_v14 = vmul.f32 %v982_v4, %v982_v4 }
 0x11c   : > { %v713_v8 = vadd.f32 %v712_v3, %v682_v2  ;;  %614 = vst [vmem:[%s1221_s6 + $0x48] sm:$0xff] %v513_v6  ;;  %v645_v9 = vadd.f32 %v644_v1, %v513_v6  ;;  %v683_v10 = vmul.f32 %v513_v6, %v513_v6  ;;  %630 = vst [vmem:[%s1221_s6 + $0xc8] sm:$0xff] %v1278_v7 }
 0x11e   : > { %v646_v12 = vadd.f32 %v981_v60, %v645_v9  ;;  %v714_v13 = vadd.f32 %v713_v8, %v683_v10  ;;  %v695_v60 = vmul.f32 %v1258_v51, %v1258_v51  ;;  %v700_v8 = vmul.f32 %v1263_v62, %v1263_v62 }
 0x120   : > { %v715_v15 = vadd.f32 %v714_v13, %v684_v11  ;;  %v985_v16 = vpop.f32.mrb[12].mxu0  ;;  %v647_v17 = vadd.f32 %v982_v4, %v646_v12  ;;  %v1283_v18 = vpop.f32.mrb[12].mxu1 }
 0x121   : > { %619 = vst [vmem:[%s1221_s6 + $0x70] sm:$0xff] %v985_v16  ;;  %v526_v19 = vpop.f32.mrb[13].mxu0  ;;  %635 = vst [vmem:[%s1221_s6 + $0xf0] sm:$0xff] %v1283_v18  ;;  %v590_v20 = vpop.f32.mrb[13].mxu1  ;;  %v688_v35 = vmul.f32 %v985_v16, %v985_v16 }
 0x122   : > { %617 = vst [vmem:[%s1221_s6 + $0x60] sm:$0xff] %v526_v19  ;;  %v648_v21 = vadd.f32 %v647_v17, %v526_v19  ;;  %v686_v22 = vmul.f32 %v526_v19, %v526_v19  ;;  %v716_v23 = vadd.f32 %v715_v15, %v685_v14  ;;  %v986_v24 = vpop.f32.mrb[14].mxu0  ;;  %633 = vst [vmem:[%s1221_s6 + $0xe0] sm:$0xff] %v590_v20  ;;  %v1290_v26 = vpop.f32.mrb[14].mxu1 }
 0x123   : > { %620 = vst [vmem:[%s1221_s6 + $0x78] sm:$0xff] %v986_v24  ;;  %v529_v28 = vpop.f32.mrb[15].mxu0  ;;  %636 = vst [vmem:[%s1221_s6 + $0xf8] sm:$0xff] %v1290_v26  ;;  %v593_v30 = vpop.f32.mrb[15].mxu1  ;;  %v689_v38 = vmul.f32 %v986_v24, %v986_v24  ;;  %v702_v12 = vmul.f32 %v590_v20, %v590_v20 }
 0x124   : > { %v717_v32 = vadd.f32 %v716_v23, %v686_v22  ;;  %618 = vst [vmem:[%s1221_s6 + $0x68] sm:$0xff] %v529_v28  ;;  %v649_v33 = vadd.f32 %v648_v21, %v529_v28  ;;  %v687_v34 = vmul.f32 %v529_v28, %v529_v28  ;;  %634 = vst [vmem:[%s1221_s6 + $0xe8] sm:$0xff] %v593_v30 }
 0x125   : > { %v703_v17 = vmul.f32 %v593_v30, %v593_v30  ;;  %v705_v21 = vmul.f32 %v1290_v26, %v1290_v26 }
 0x126   : > { %v650_v36 = vadd.f32 %v985_v16, %v649_v33  ;;  %v718_v37 = vadd.f32 %v717_v32, %v687_v34 }
 0x128   : > { %v719_v39 = vadd.f32 %v718_v37, %v688_v35  ;;  %v651_v40 = vadd.f32 %v986_v24, %v650_v36 }
 0x12a   : > { %v652_v43 = vadd.f32 %v651_v40, %v1228_v27  ;;  %v720_v45 = vadd.f32 %v719_v39, %v689_v38  ;;  %v694_v27 = vmul.f32 %v1248_v44, %v1248_v44 }
 0x12c   : > { %v721_v46 = vadd.f32 %v720_v45, %v690_v41  ;;  %v653_v47 = vadd.f32 %v652_v43, %v1238_v31 }
 0x12e   : > { %v654_v52 = vadd.f32 %v1223_v25, %v653_v47  ;;  %v722_v53 = vadd.f32 %v721_v46, %v691_v48  ;;  %v696_v25 = vmul.f32 %v1243_v42, %v1243_v42 }
 0x130   : > { %v723_v55 = vadd.f32 %v722_v53, %v692_v50  ;;  %v655_v56 = vadd.f32 %v1233_v29, %v654_v52  ;;  %v697_v29 = vmul.f32 %v1253_v49, %v1253_v49 }
 0x132   : > { %v656_v57 = vadd.f32 %v655_v56, %v1248_v44  ;;  %v724_v58 = vadd.f32 %v723_v55, %v693_v54  ;;  %v698_v44 = vmul.f32 %v1268_v0, %v1268_v0 }
 0x134   : > { %v725_v59 = vadd.f32 %v724_v58, %v694_v27  ;;  %v657_v31 = vadd.f32 %v656_v57, %v1258_v51 }
 0x136   : > { %v658_v61 = vadd.f32 %v1243_v42, %v657_v31  ;;  %v726_v63 = vadd.f32 %v725_v59, %v695_v60  ;;  %v699_v42 = vmul.f32 %v1278_v7, %v1278_v7 }
 0x138   : > { %v727_v1 = vadd.f32 %v726_v63, %v696_v25  ;;  %v659_v2 = vadd.f32 %v1253_v49, %v658_v61  ;;  %v701_v49 = vmul.f32 %v1273_v5, %v1273_v5 }
 0x13a   : > { %v660_v3 = vadd.f32 %v659_v2, %v1268_v0  ;;  %v728_v4 = vadd.f32 %v727_v1, %v697_v29 }
 0x13c   : > { %v729_v6 = vadd.f32 %v728_v4, %v698_v44  ;;  %v661_v51 = vadd.f32 %v660_v3, %v1278_v7  ;;  %v704_v7 = vmul.f32 %v1283_v18, %v1283_v18 }
 0x13e   : > { %v662_v9 = vadd.f32 %v1263_v62, %v661_v51  ;;  %v730_v10 = vadd.f32 %v729_v6, %v699_v42 }
 0x140   : > { %v731_v11 = vadd.f32 %v730_v10, %v700_v8  ;;  %v663_v0 = vadd.f32 %v1273_v5, %v662_v9 }
 0x142   : > { %v664_v13 = vadd.f32 %v663_v0, %v590_v20  ;;  %v732_v14 = vadd.f32 %v731_v11, %v701_v49 }
 0x144   : > { %v733_v15 = vadd.f32 %v732_v14, %v702_v12  ;;  %v665_v16 = vadd.f32 %v664_v13, %v593_v30 }
 0x146   : > { %v666_v62 = vadd.f32 %v1283_v18, %v665_v16  ;;  %v734_v19 = vadd.f32 %v733_v15, %v703_v17 }
 0x148   : > { %v667_v22 = vadd.f32 %v1290_v26, %v666_v62  ;;  %v735_v23 = vadd.f32 %v734_v19, %v704_v7 }
 0x14a   : > { %v668_v5 = vrot.slane %v667_v22, 4  ;;  %v736_v20 = vadd.f32 %v735_v23, %v705_v21 }
 0x14c   : > { %v669_v24 = vadd.f32 %v668_v5, %v667_v22  ;;  %v737_v28 = vrot.slane %v736_v20, 4 }
 0x14e   : > { %v670_v30 = vrot.slane %v669_v24, 2  ;;  %v738_v32 = vadd.f32 %v737_v28, %v736_v20 }
 0x150   : > { %v671_v33 = vadd.f32 %v670_v30, %v669_v24  ;;  %v739_v34 = vrot.slane %v738_v32, 2 }
 0x152   : > { %v672_v35 = vrot.slane %v671_v33, 1  ;;  %v740_v18 = vadd.f32 %v739_v34, %v738_v32 }
 0x154   : > { %v741_v36 = vrot.slane %v740_v18, 1  ;;  %v673_v37 = vadd.f32 %v672_v35, %v671_v33 }
 0x156   : > { %v742_v38 = vadd.f32 %v741_v36, %v740_v18 }
 0x158   : > { %v744_v26 = vsel %vm743_vm0, %v673_v37, %v742_v38 }
 0x159   : > { %v746_v39 = vsel %vm745_vm1, %v744_v26, 0.0 }
 0x15a   : > { %747 = vst [vmem:[%s248_s12] sm:$0xff] %v746_v39 }
 0x15b PF: > { %s14_s16 = sadd.s32 1, %s1121_s16   ;;  %s1363_s12 = smov %s1113_s14 }
 0x15c   : > { %p11_p8 = scmp.ge.s32.totalorder %s14_s16, 10   ;;  %s1364_s13 = smov %s1117_s15 }
 0x15d   : > { %s1365_s14 = smov %s1368_s17  ;;  %s1366_s15 = smov %s1372_s18 }
 0x15e   :  { %13 = sbr.rel (!%p11_p8) target bundleno = 3 (0x3), region = 73 }

// kernel: forward.16
= control target key start
LH: loop header
LB: loop body
LE: loop exit
PB: predicated region body
PF: predicated region fallthrough
CT: control target
= control target key end

     0   :  { %s613_s12 = smov 0   ;;  %s900_s0 = inlined_call_operand.vmem [shape: f32[2048,128], index: 0, kind: input, shape index: {}]   ;;  %s901_s1 = inlined_call_operand.vmem [shape: f32[1,128], index: 1, kind: input, shape index: {}]   ;;  %s902_s2 = inlined_call_operand.vmem [shape: f32[1,128], index: 2, kind: input, shape index: {}]   ;;  %s903_s3 = inlined_call_operand.vmem [shape: f32[2048,128], index: 3, kind: output, shape index: {}]  }
   0x1 LB: > { %s564_s13 = sadd.s32 4294967295, %s591_s12   ;;  %p568_p0 = scmp.ge.s32.totalorder %s591_s12, 1  ;;  %s591_s12 = sphi %s613_s12, %s13_s12  }
   0x2   : > { %p138_p1 = scmp.lt.s32.totalorder %s591_s12, 5 }
   0x4   : > { %p139_p2 = pnand %p568_p0, %p138_p1 }
   0x5   : > { %s569_s14 = sshll.u32 (!%p139_p2), %s564_s13, 6  ;;  %v624_v0 = vld [vmem:[%s901_s1] ss:$0 sm:$0xff] (!%p139_p2) }
   0x6   : > { %142 = sbr.rel (%p139_p2) target bundleno = 70 (0x46), region = 32  ;;  %p163_p3 = scmp.lt.s32.totalorder (!%p139_p2), %s569_s14, 255  ;;  %v634_v1 = vld [vmem:[%s902_s2] ss:$0 sm:$0xff] (!%p139_p2) }
   0xd   : > { %s905_s14 = smov (!%p163_p3, %s569_s14), 255 }
   0xe   : > { %s570_s15 = sshll.u32 %s905_s14, 3 }
   0xf   : > { %s629_s20 = scalar_lea.vmem %s900_s0, %s570_s15  ;;  %s657_s25 = scalar_lea.vmem %s903_s3, %s570_s15 }
  0x10   : > { %v174_v2 = vld [vmem:[%s629_s20] sm:$0xff]  ;;  %v175_v3 = vld [vmem:[%s629_s20 + $0x8] sm:$0xff]  ;;  %v176_v4 = vld [vmem:[%s629_s20 + $0x10] sm:$0xff] }
  0x11   : > { %v245_v5 = vmul.f32 %v624_v0, %v174_v2  ;;  %v246_v6 = vmul.f32 %v624_v0, %v175_v3  ;;  %v247_v7 = vmul.f32 %v624_v0, %v176_v4  ;;  %v177_v8 = vld [vmem:[%s629_s20 + $0x18] sm:$0xff]  ;;  %v178_v9 = vld [vmem:[%s629_s20 + $0x20] sm:$0xff]  ;;  %v179_v10 = vld [vmem:[%s629_s20 + $0x28] sm:$0xff] }
  0x12   : > { %v248_v11 = vmul.f32 %v624_v0, %v177_v8  ;;  %v249_v12 = vmul.f32 %v624_v0, %v178_v9  ;;  %v250_v13 = vmul.f32 %v624_v0, %v179_v10  ;;  %v180_v14 = vld [vmem:[%s629_s20 + $0x30] sm:$0xff]  ;;  %v181_v15 = vld [vmem:[%s629_s20 + $0x38] sm:$0xff]  ;;  %v182_v24 = vld [vmem:[%s629_s20 + $0x40] sm:$0xff] }
  0x13   : > { %v316_v16 = vadd.f32 %v634_v1, %v245_v5  ;;  %v317_v17 = vadd.f32 %v634_v1, %v246_v6  ;;  %v318_v18 = vadd.f32 %v634_v1, %v247_v7  ;;  %v251_v19 = vmul.f32 %v624_v0, %v180_v14  ;;  %v183_v25 = vld [vmem:[%s629_s20 + $0x48] sm:$0xff]  ;;  %v184_v26 = vld [vmem:[%s629_s20 + $0x50] sm:$0xff]  ;;  %v185_v31 = vld [vmem:[%s629_s20 + $0x58] sm:$0xff] }
  0x14   : > { %v319_v20 = vadd.f32 %v634_v1, %v248_v11  ;;  %v320_v21 = vadd.f32 %v634_v1, %v249_v12  ;;  %v321_v22 = vadd.f32 %v634_v1, %v250_v13  ;;  %v252_v23 = vmul.f32 %v624_v0, %v181_v15  ;;  %v186_v32 = vld [vmem:[%s629_s20 + $0x60] sm:$0xff]  ;;  %v187_v33 = vld [vmem:[%s629_s20 + $0x68] sm:$0xff]  ;;  %v188_v38 = vld [vmem:[%s629_s20 + $0x70] sm:$0xff] }
  0x15   : > { %v380_v27 = vmax.f32 %v316_v16, 0.0  ;;  %v381_v28 = vmax.f32 %v317_v17, 0.0  ;;  %v382_v29 = vmax.f32 %v318_v18, 0.0  ;;  %v322_v30 = vadd.f32 %v634_v1, %v251_v19  ;;  %v189_v43 = vld [vmem:[%s629_s20 + $0x78] sm:$0xff]  ;;  %v190_v56 = vld [vmem:[%s629_s20 + $0x80] sm:$0xff]  ;;  %v191_v57 = vld [vmem:[%s629_s20 + $0x88] sm:$0xff] }
  0x16   : > { %v383_v34 = vmax.f32 %v319_v20, 0.0  ;;  %v384_v35 = vmax.f32 %v320_v21, 0.0  ;;  %v385_v36 = vmax.f32 %v321_v22, 0.0  ;;  %v323_v37 = vadd.f32 %v634_v1, %v252_v23  ;;  %v192_v58 = vld [vmem:[%s629_s20 + $0x90] sm:$0xff]  ;;  %v193_v63 = vld [vmem:[%s629_s20 + $0x98] sm:$0xff]  ;;  %v194_v2 = vld [vmem:[%s629_s20 + $0xa0] sm:$0xff] }
  0x17   : > { %444 = vst [vmem:[%s657_s25] sm:$0xff] %v380_v27  ;;  %445 = vst [vmem:[%s657_s25 + $0x8] sm:$0xff] %v381_v28  ;;  %v386_v39 = vmax.f32 %v322_v30, 0.0  ;;  %v253_v40 = vmul.f32 %v624_v0, %v182_v24  ;;  %v254_v41 = vmul.f32 %v624_v0, %v183_v25  ;;  %v255_v42 = vmul.f32 %v624_v0, %v184_v26  ;;  %v195_v3 = vld [vmem:[%s629_s20 + $0xa8] sm:$0xff]  ;;  %v196_v8 = vld [vmem:[%s629_s20 + $0xb0] sm:$0xff] }
  0x18   : > { %446 = vst [vmem:[%s657_s25 + $0x10] sm:$0xff] %v382_v29  ;;  %447 = vst [vmem:[%s657_s25 + $0x18] sm:$0xff] %v383_v34  ;;  %v387_v44 = vmax.f32 %v323_v37, 0.0  ;;  %v256_v45 = vmul.f32 %v624_v0, %v185_v31  ;;  %v257_v46 = vmul.f32 %v624_v0, %v186_v32  ;;  %v258_v47 = vmul.f32 %v624_v0, %v187_v33  ;;  %v197_v13 = vld [vmem:[%s629_s20 + $0xb8] sm:$0xff]  ;;  %v198_v26 = vld [vmem:[%s629_s20 + $0xc0] sm:$0xff] }
  0x19   : > { %448 = vst [vmem:[%s657_s25 + $0x20] sm:$0xff] %v384_v35  ;;  %449 = vst [vmem:[%s657_s25 + $0x28] sm:$0xff] %v385_v36  ;;  %v324_v48 = vadd.f32 %v634_v1, %v253_v40  ;;  %v325_v49 = vadd.f32 %v634_v1, %v254_v41  ;;  %v326_v50 = vadd.f32 %v634_v1, %v255_v42  ;;  %v199_v27 = vld [vmem:[%s629_s20 + $0xc8] sm:$0xff]  ;;  %v200_v28 = vld [vmem:[%s629_s20 + $0xd0] sm:$0xff] }
  0x1a   : > { %450 = vst [vmem:[%s657_s25 + $0x30] sm:$0xff] %v386_v39  ;;  %v259_v51 = vmul.f32 %v624_v0, %v188_v38  ;;  %451 = vst [vmem:[%s657_s25 + $0x38] sm:$0xff] %v387_v44  ;;  %v327_v52 = vadd.f32 %v634_v1, %v256_v45  ;;  %v328_v53 = vadd.f32 %v634_v1, %v257_v46  ;;  %v201_v33 = vld [vmem:[%s629_s20 + $0xd8] sm:$0xff]  ;;  %v202_v34 = vld [vmem:[%s629_s20 + $0xe0] sm:$0xff] }
  0x1b   : > { %v329_v54 = vadd.f32 %v634_v1, %v258_v47  ;;  %v260_v55 = vmul.f32 %v624_v0, %v189_v43  ;;  %v388_v59 = vmax.f32 %v324_v48, 0.0  ;;  %v389_v60 = vmax.f32 %v325_v49, 0.0  ;;  %v203_v35 = vld [vmem:[%s629_s20 + $0xe8] sm:$0xff]  ;;  %v204_v40 = vld [vmem:[%s629_s20 + $0xf0] sm:$0xff]  ;;  %v205_v45 = vld [vmem:[%s629_s20 + $0xf8] sm:$0xff] }
  0x1c   : > { %v390_v61 = vmax.f32 %v326_v50, 0.0  ;;  %v330_v62 = vadd.f32 %v634_v1, %v259_v51  ;;  %v391_v4 = vmax.f32 %v327_v52, 0.0  ;;  %v392_v5 = vmax.f32 %v328_v53, 0.0 }
  0x1d   : > { %v393_v6 = vmax.f32 %v329_v54, 0.0  ;;  %v331_v7 = vadd.f32 %v634_v1, %v260_v55  ;;  %452 = vst [vmem:[%s657_s25 + $0x40] sm:$0xff] %v388_v59  ;;  %453 = vst [vmem:[%s657_s25 + $0x48] sm:$0xff] %v389_v60  ;;  %v261_v10 = vmul.f32 %v624_v0, %v190_v56  ;;  %v262_v11 = vmul.f32 %v624_v0, %v191_v57  ;;  %v207_v59 = vld [vmem:[%s629_s20 + $0x108] sm:$0xff]  ;;  %v208_v60 = vld [vmem:[%s629_s20 + $0x110] sm:$0xff] }
  0x1e   : > { %454 = vst [vmem:[%s657_s25 + $0x50] sm:$0xff] %v390_v61  ;;  %v394_v9 = vmax.f32 %v330_v62, 0.0  ;;  %v263_v12 = vmul.f32 %v624_v0, %v192_v58  ;;  %455 = vst [vmem:[%s657_s25 + $0x58] sm:$0xff] %v391_v4  ;;  %v264_v15 = vmul.f32 %v624_v0, %v193_v63  ;;  %v265_v16 = vmul.f32 %v624_v0, %v194_v2  ;;  %v206_v58 = vld [vmem:[%s629_s20 + $0x100] sm:$0xff] }
  0x1f   : > { %456 = vst [vmem:[%s657_s25 + $0x60] sm:$0xff] %v392_v5  ;;  %457 = vst [vmem:[%s657_s25 + $0x68] sm:$0xff] %v393_v6  ;;  %v395_v14 = vmax.f32 %v331_v7, 0.0  ;;  %v266_v17 = vmul.f32 %v624_v0, %v195_v3  ;;  %v332_v18 = vadd.f32 %v634_v1, %v261_v10  ;;  %v333_v19 = vadd.f32 %v634_v1, %v262_v11  ;;  %v209_v3 = vld [vmem:[%s629_s20 + $0x118] sm:$0xff]  ;;  %v210_v4 = vld [vmem:[%s629_s20 + $0x120] sm:$0xff] }
  0x20   : > { %458 = vst [vmem:[%s657_s25 + $0x70] sm:$0xff] %v394_v9  ;;  %v334_v20 = vadd.f32 %v634_v1, %v263_v12  ;;  %v267_v21 = vmul.f32 %v624_v0, %v196_v8  ;;  %v335_v22 = vadd.f32 %v634_v1, %v264_v15  ;;  %v336_v23 = vadd.f32 %v634_v1, %v265_v16  ;;  %v211_v5 = vld [vmem:[%s629_s20 + $0x128] sm:$0xff]  ;;  %v212_v10 = vld [vmem:[%s629_s20 + $0x130] sm:$0xff]  ;;  %v213_v15 = vld [vmem:[%s629_s20 + $0x138] sm:$0xff] }
  0x21   : > { %459 = vst [vmem:[%s657_s25 + $0x78] sm:$0xff] %v395_v14  ;;  %v337_v24 = vadd.f32 %v634_v1, %v266_v17  ;;  %v268_v25 = vmul.f32 %v624_v0, %v197_v13  ;;  %v396_v29 = vmax.f32 %v332_v18, 0.0  ;;  %v397_v30 = vmax.f32 %v333_v19, 0.0 }
  0x22   : > { %v398_v31 = vmax.f32 %v334_v20, 0.0  ;;  %v338_v32 = vadd.f32 %v634_v1, %v267_v21  ;;  %v399_v36 = vmax.f32 %v335_v22, 0.0  ;;  %v400_v37 = vmax.f32 %v336_v23, 0.0 }
  0x23   : > { %v401_v38 = vmax.f32 %v337_v24, 0.0  ;;  %v339_v39 = vadd.f32 %v634_v1, %v268_v25  ;;  %460 = vst [vmem:[%s657_s25 + $0x80] sm:$0xff] %v396_v29  ;;  %461 = vst [vmem:[%s657_s25 + $0x88] sm:$0xff] %v397_v30  ;;  %v269_v42 = vmul.f32 %v624_v0, %v198_v26  ;;  %v270_v43 = vmul.f32 %v624_v0, %v199_v27  ;;  %v215_v29 = vld [vmem:[%s629_s20 + $0x148] sm:$0xff]  ;;  %v216_v30 = vld [vmem:[%s629_s20 + $0x150] sm:$0xff] }
  0x24   : > { %462 = vst [vmem:[%s657_s25 + $0x90] sm:$0xff] %v398_v31  ;;  %v402_v41 = vmax.f32 %v338_v32, 0.0  ;;  %v271_v44 = vmul.f32 %v624_v0, %v200_v28  ;;  %463 = vst [vmem:[%s657_s25 + $0x98] sm:$0xff] %v399_v36  ;;  %v272_v47 = vmul.f32 %v624_v0, %v201_v33  ;;  %v273_v48 = vmul.f32 %v624_v0, %v202_v34  ;;  %v214_v28 = vld [vmem:[%s629_s20 + $0x140] sm:$0xff] }
  0x25   : > { %464 = vst [vmem:[%s657_s25 + $0xa0] sm:$0xff] %v400_v37  ;;  %465 = vst [vmem:[%s657_s25 + $0xa8] sm:$0xff] %v401_v38  ;;  %v403_v46 = vmax.f32 %v339_v39, 0.0  ;;  %v274_v49 = vmul.f32 %v624_v0, %v203_v35  ;;  %v340_v50 = vadd.f32 %v634_v1, %v269_v42  ;;  %v341_v51 = vadd.f32 %v634_v1, %v270_v43  ;;  %v217_v35 = vld [vmem:[%s629_s20 + $0x158] sm:$0xff]  ;;  %v218_v36 = vld [vmem:[%s629_s20 + $0x160] sm:$0xff] }
  0x26   : > { %466 = vst [vmem:[%s657_s25 + $0xb0] sm:$0xff] %v402_v41  ;;  %v342_v52 = vadd.f32 %v634_v1, %v271_v44  ;;  %v275_v53 = vmul.f32 %v624_v0, %v204_v40  ;;  %v343_v54 = vadd.f32 %v634_v1, %v272_v47  ;;  %v344_v55 = vadd.f32 %v634_v1, %v273_v48  ;;  %v219_v37 = vld [vmem:[%s629_s20 + $0x168] sm:$0xff]  ;;  %v220_v42 = vld [vmem:[%s629_s20 + $0x170] sm:$0xff]  ;;  %v221_v47 = vld [vmem:[%s629_s20 + $0x178] sm:$0xff] }
  0x27   : > { %467 = vst [vmem:[%s657_s25 + $0xb8] sm:$0xff] %v403_v46  ;;  %v345_v56 = vadd.f32 %v634_v1, %v274_v49  ;;  %v276_v57 = vmul.f32 %v624_v0, %v205_v45  ;;  %v404_v61 = vmax.f32 %v340_v50, 0.0  ;;  %v405_v62 = vmax.f32 %v341_v51, 0.0 }
  0x28   : > { %v406_v63 = vmax.f32 %v342_v52, 0.0  ;;  %v346_v2 = vadd.f32 %v634_v1, %v275_v53  ;;  %v407_v6 = vmax.f32 %v343_v54, 0.0  ;;  %v408_v7 = vmax.f32 %v344_v55, 0.0 }
  0x29   : > { %v409_v8 = vmax.f32 %v345_v56, 0.0  ;;  %v347_v9 = vadd.f32 %v634_v1, %v276_v57  ;;  %468 = vst [vmem:[%s657_s25 + $0xc0] sm:$0xff] %v404_v61  ;;  %469 = vst [vmem:[%s657_s25 + $0xc8] sm:$0xff] %v405_v62  ;;  %v277_v12 = vmul.f32 %v624_v0, %v206_v58  ;;  %v278_v13 = vmul.f32 %v624_v0, %v207_v59  ;;  %v223_v61 = vld [vmem:[%s629_s20 + $0x188] sm:$0xff]  ;;  %v224_v62 = vld [vmem:[%s629_s20 + $0x190] sm:$0xff] }
  0x2a   : > { %470 = vst [vmem:[%s657_s25 + $0xd0] sm:$0xff] %v406_v63  ;;  %v410_v11 = vmax.f32 %v346_v2, 0.0  ;;  %v279_v14 = vmul.f32 %v624_v0, %v208_v60  ;;  %471 = vst [vmem:[%s657_s25 + $0xd8] sm:$0xff] %v407_v6  ;;  %v280_v17 = vmul.f32 %v624_v0, %v209_v3  ;;  %v281_v18 = vmul.f32 %v624_v0, %v210_v4  ;;  %v222_v60 = vld [vmem:[%s629_s20 + $0x180] sm:$0xff] }
  0x2b   : > { %472 = vst [vmem:[%s657_s25 + $0xe0] sm:$0xff] %v408_v7  ;;  %473 = vst [vmem:[%s657_s25 + $0xe8] sm:$0xff] %v409_v8  ;;  %v411_v16 = vmax.f32 %v347_v9, 0.0  ;;  %v282_v19 = vmul.f32 %v624_v0, %v211_v5  ;;  %v348_v20 = vadd.f32 %v634_v1, %v277_v12  ;;  %v349_v21 = vadd.f32 %v634_v1, %v278_v13  ;;  %v225_v5 = vld [vmem:[%s629_s20 + $0x198] sm:$0xff]  ;;  %v226_v6 = vld [vmem:[%s629_s20 + $0x1a0] sm:$0xff] }
  0x2c   : > { %474 = vst [vmem:[%s657_s25 + $0xf0] sm:$0xff] %v410_v11  ;;  %v350_v22 = vadd.f32 %v634_v1, %v279_v14  ;;  %v283_v23 = vmul.f32 %v624_v0, %v212_v10  ;;  %v351_v24 = vadd.f32 %v634_v1, %v280_v17  ;;  %v352_v25 = vadd.f32 %v634_v1, %v281_v18  ;;  %v227_v7 = vld [vmem:[%s629_s20 + $0x1a8] sm:$0xff]  ;;  %v228_v12 = vld [vmem:[%s629_s20 + $0x1b0] sm:$0xff]  ;;  %v229_v17 = vld [vmem:[%s629_s20 + $0x1b8] sm:$0xff] }
  0x2d   : > { %475 = vst [vmem:[%s657_s25 + $0xf8] sm:$0xff] %v411_v16  ;;  %v353_v26 = vadd.f32 %v634_v1, %v282_v19  ;;  %v284_v27 = vmul.f32 %v624_v0, %v213_v15  ;;  %v412_v31 = vmax.f32 %v348_v20, 0.0  ;;  %v413_v32 = vmax.f32 %v349_v21, 0.0 }
  0x2e   : > { %v414_v33 = vmax.f32 %v350_v22, 0.0  ;;  %v354_v34 = vadd.f32 %v634_v1, %v283_v23  ;;  %v415_v38 = vmax.f32 %v351_v24, 0.0  ;;  %v416_v39 = vmax.f32 %v352_v25, 0.0 }
  0x2f   : > { %v417_v40 = vmax.f32 %v353_v26, 0.0  ;;  %v355_v41 = vadd.f32 %v634_v1, %v284_v27  ;;  %476 = vst [vmem:[%s657_s25 + $0x100] sm:$0xff] %v412_v31  ;;  %477 = vst [vmem:[%s657_s25 + $0x108] sm:$0xff] %v413_v32  ;;  %v285_v44 = vmul.f32 %v624_v0, %v214_v28  ;;  %v286_v45 = vmul.f32 %v624_v0, %v215_v29  ;;  %v231_v31 = vld [vmem:[%s629_s20 + $0x1c8] sm:$0xff]  ;;  %v232_v32 = vld [vmem:[%s629_s20 + $0x1d0] sm:$0xff] }
  0x30   : > { %478 = vst [vmem:[%s657_s25 + $0x110] sm:$0xff] %v414_v33  ;;  %v418_v43 = vmax.f32 %v354_v34, 0.0  ;;  %v287_v46 = vmul.f32 %v624_v0, %v216_v30  ;;  %479 = vst [vmem:[%s657_s25 + $0x118] sm:$0xff] %v415_v38  ;;  %v288_v49 = vmul.f32 %v624_v0, %v217_v35  ;;  %v289_v50 = vmul.f32 %v624_v0, %v218_v36  ;;  %v230_v30 = vld [vmem:[%s629_s20 + $0x1c0] sm:$0xff] }
  0x31   : > { %480 = vst [vmem:[%s657_s25 + $0x120] sm:$0xff] %v416_v39  ;;  %481 = vst [vmem:[%s657_s25 + $0x128] sm:$0xff] %v417_v40  ;;  %v419_v48 = vmax.f32 %v355_v41, 0.0  ;;  %v290_v51 = vmul.f32 %v624_v0, %v219_v37  ;;  %v356_v52 = vadd.f32 %v634_v1, %v285_v44  ;;  %v357_v53 = vadd.f32 %v634_v1, %v286_v45  ;;  %v233_v37 = vld [vmem:[%s629_s20 + $0x1d8] sm:$0xff]  ;;  %v234_v38 = vld [vmem:[%s629_s20 + $0x1e0] sm:$0xff] }
  0x32   : > { %482 = vst [vmem:[%s657_s25 + $0x130] sm:$0xff] %v418_v43  ;;  %v358_v54 = vadd.f32 %v634_v1, %v287_v46  ;;  %v291_v55 = vmul.f32 %v624_v0, %v220_v42  ;;  %v359_v56 = vadd.f32 %v634_v1, %v288_v49  ;;  %v360_v57 = vadd.f32 %v634_v1, %v289_v50  ;;  %v235_v39 = vld [vmem:[%s629_s20 + $0x1e8] sm:$0xff]  ;;  %v236_v44 = vld [vmem:[%s629_s20 + $0x1f0] sm:$0xff]  ;;  %v237_v49 = vld [vmem:[%s629_s20 + $0x1f8] sm:$0xff] }
  0x33   : > { %483 = vst [vmem:[%s657_s25 + $0x138] sm:$0xff] %v419_v48  ;;  %v361_v58 = vadd.f32 %v634_v1, %v290_v51  ;;  %v292_v59 = vmul.f32 %v624_v0, %v221_v47  ;;  %v420_v63 = vmax.f32 %v356_v52, 0.0  ;;  %v421_v2 = vmax.f32 %v357_v53, 0.0 }
  0x34   : > { %v422_v3 = vmax.f32 %v358_v54, 0.0  ;;  %v362_v4 = vadd.f32 %v634_v1, %v291_v55  ;;  %v423_v8 = vmax.f32 %v359_v56, 0.0  ;;  %v424_v9 = vmax.f32 %v360_v57, 0.0 }
  0x35   : > { %v425_v10 = vmax.f32 %v361_v58, 0.0  ;;  %v363_v11 = vadd.f32 %v634_v1, %v292_v59  ;;  %484 = vst [vmem:[%s657_s25 + $0x140] sm:$0xff] %v420_v63  ;;  %485 = vst [vmem:[%s657_s25 + $0x148] sm:$0xff] %v421_v2  ;;  %v293_v14 = vmul.f32 %v624_v0, %v222_v60  ;;  %v294_v15 = vmul.f32 %v624_v0, %v223_v61 }
  0x36   : > { %486 = vst [vmem:[%s657_s25 + $0x150] sm:$0xff] %v422_v3  ;;  %v426_v13 = vmax.f32 %v362_v4, 0.0  ;;  %v295_v16 = vmul.f32 %v624_v0, %v224_v62  ;;  %487 = vst [vmem:[%s657_s25 + $0x158] sm:$0xff] %v423_v8  ;;  %v296_v19 = vmul.f32 %v624_v0, %v225_v5  ;;  %v297_v20 = vmul.f32 %v624_v0, %v226_v6 }
  0x37   : > { %488 = vst [vmem:[%s657_s25 + $0x160] sm:$0xff] %v424_v9  ;;  %489 = vst [vmem:[%s657_s25 + $0x168] sm:$0xff] %v425_v10  ;;  %v427_v18 = vmax.f32 %v363_v11, 0.0  ;;  %v298_v21 = vmul.f32 %v624_v0, %v227_v7  ;;  %v364_v22 = vadd.f32 %v634_v1, %v293_v14  ;;  %v365_v23 = vadd.f32 %v634_v1, %v294_v15 }
  0x38   : > { %490 = vst [vmem:[%s657_s25 + $0x170] sm:$0xff] %v426_v13  ;;  %v366_v24 = vadd.f32 %v634_v1, %v295_v16  ;;  %v299_v25 = vmul.f32 %v624_v0, %v228_v12  ;;  %v367_v26 = vadd.f32 %v634_v1, %v296_v19  ;;  %v368_v27 = vadd.f32 %v634_v1, %v297_v20 }
  0x39   : > { %491 = vst [vmem:[%s657_s25 + $0x178] sm:$0xff] %v427_v18  ;;  %v369_v28 = vadd.f32 %v634_v1, %v298_v21  ;;  %v300_v29 = vmul.f32 %v624_v0, %v229_v17  ;;  %v428_v33 = vmax.f32 %v364_v22, 0.0  ;;  %v429_v34 = vmax.f32 %v365_v23, 0.0 }
  0x3a   : > { %v430_v35 = vmax.f32 %v366_v24, 0.0  ;;  %v370_v36 = vadd.f32 %v634_v1, %v299_v25  ;;  %v431_v40 = vmax.f32 %v367_v26, 0.0  ;;  %v432_v41 = vmax.f32 %v368_v27, 0.0 }
  0x3b   : > { %v433_v42 = vmax.f32 %v369_v28, 0.0  ;;  %v371_v43 = vadd.f32 %v634_v1, %v300_v29  ;;  %492 = vst [vmem:[%s657_s25 + $0x180] sm:$0xff] %v428_v33  ;;  %493 = vst [vmem:[%s657_s25 + $0x188] sm:$0xff] %v429_v34  ;;  %v301_v46 = vmul.f32 %v624_v0, %v230_v30  ;;  %v302_v47 = vmul.f32 %v624_v0, %v231_v31 }
  0x3c   : > { %494 = vst [vmem:[%s657_s25 + $0x190] sm:$0xff] %v430_v35  ;;  %v434_v45 = vmax.f32 %v370_v36, 0.0  ;;  %v303_v48 = vmul.f32 %v624_v0, %v232_v32  ;;  %495 = vst [vmem:[%s657_s25 + $0x198] sm:$0xff] %v431_v40  ;;  %v304_v51 = vmul.f32 %v624_v0, %v233_v37  ;;  %v305_v52 = vmul.f32 %v624_v0, %v234_v38 }
  0x3d   : > { %496 = vst [vmem:[%s657_s25 + $0x1a0] sm:$0xff] %v432_v41  ;;  %497 = vst [vmem:[%s657_s25 + $0x1a8] sm:$0xff] %v433_v42  ;;  %v435_v50 = vmax.f32 %v371_v43, 0.0  ;;  %v306_v53 = vmul.f32 %v624_v0, %v235_v39  ;;  %v372_v54 = vadd.f32 %v634_v1, %v301_v46  ;;  %v373_v55 = vadd.f32 %v634_v1, %v302_v47 }
  0x3e   : > { %498 = vst [vmem:[%s657_s25 + $0x1b0] sm:$0xff] %v434_v45  ;;  %v374_v56 = vadd.f32 %v634_v1, %v303_v48  ;;  %v307_v57 = vmul.f32 %v624_v0, %v236_v44  ;;  %v375_v58 = vadd.f32 %v634_v1, %v304_v51  ;;  %v376_v59 = vadd.f32 %v634_v1, %v305_v52 }
  0x3f   : > { %499 = vst [vmem:[%s657_s25 + $0x1b8] sm:$0xff] %v435_v50  ;;  %v377_v60 = vadd.f32 %v634_v1, %v306_v53  ;;  %v308_v61 = vmul.f32 %v624_v0, %v237_v49  ;;  %v436_v62 = vmax.f32 %v372_v54, 0.0  ;;  %v437_v63 = vmax.f32 %v373_v55, 0.0 }
  0x40   : > { %v438_v2 = vmax.f32 %v374_v56, 0.0  ;;  %v378_v3 = vadd.f32 %v634_v1, %v307_v57  ;;  %v439_v4 = vmax.f32 %v375_v58, 0.0  ;;  %v440_v5 = vmax.f32 %v376_v59, 0.0 }
  0x41   : > { %v441_v6 = vmax.f32 %v377_v60, 0.0  ;;  %v379_v7 = vadd.f32 %v634_v1, %v308_v61  ;;  %500 = vst [vmem:[%s657_s25 + $0x1c0] sm:$0xff] %v436_v62  ;;  %501 = vst [vmem:[%s657_s25 + $0x1c8] sm:$0xff] %v437_v63 }
  0x42   : > { %502 = vst [vmem:[%s657_s25 + $0x1d0] sm:$0xff] %v438_v2  ;;  %v442_v8 = vmax.f32 %v378_v3, 0.0  ;;  %503 = vst [vmem:[%s657_s25 + $0x1d8] sm:$0xff] %v439_v4 }
  0x43   : > { %504 = vst [vmem:[%s657_s25 + $0x1e0] sm:$0xff] %v440_v5  ;;  %505 = vst [vmem:[%s657_s25 + $0x1e8] sm:$0xff] %v441_v6  ;;  %v443_v0 = vmax.f32 %v379_v7, 0.0 }
  0x44   : > { %506 = vst [vmem:[%s657_s25 + $0x1f0] sm:$0xff] %v442_v8 }
  0x45   : > { %507 = vst [vmem:[%s657_s25 + $0x1f8] sm:$0xff] %v443_v0 }
  0x46 PF: > { %s13_s12 = sadd.s32 1, %s591_s12  }
  0x47   : > { %p10_p4 = scmp.ge.s32.totalorder %s13_s12, 6  }
  0x49   :  { %12 = sbr.rel (!%p10_p4) target bundleno = 1 (0x1), region = 62 }

// kernel: forward.17
= control target key start
LH: loop header
LB: loop body
LE: loop exit
PB: predicated region body
PF: predicated region fallthrough
CT: control target
= control target key end

     0   :  { %s1538_s12 = smov 0   ;;  %s1540_s13 = smov 0   ;;  %s1775_s0 = inlined_call_operand.vmem [shape: bf16[4,2048,128], index: 0, kind: input, shape index: {}]   ;;  %s1776_s1 = inlined_call_operand.vmem [shape: bf16[4,128,128], index: 1, kind: input, shape index: {}]   ;;  %s1777_s2 = inlined_call_operand.vmem [shape: f32[1,128], index: 2, kind: input, shape index: {}]   ;;  %s1778_s3 = inlined_call_operand.vmem [shape: f32[4,2048,128], index: 3, kind: output, shape index: {}]  }
   0x1   :  { %s1542_s14 = smov 0   ;;  %s1544_s15 = smov 0  }
   0x2   :  { %s1546_s16 = smov 0  }
   0x3 LB: > { %s22_s17 = sadd.s32 1, %s1508_s14  ;;  %s25_s18 = sadd.s32 1, %s1512_s15  ;;  %s1516_s16 = sphi %s1546_s16, %s13_s16   ;;  %s1512_s15 = sphi %s1544_s15, %s1782_s15   ;;  %s1508_s14 = sphi %s1542_s14, %s1781_s14   ;;  %s1504_s13 = sphi %s1540_s13, %s1780_s13   ;;  %s1500_s12 = sphi %s1538_s12, %s1779_s12  }
   0x4   : > { %p23_p0 = scmp.ge.s32.totalorder %s22_s17, 4  ;;  %p1081_p1 = scmp.ge.s32.totalorder %s1516_s16, 1 }
   0x5   : > { %p168_p2 = scmp.lt.s32.totalorder %s1516_s16, 17 }
   0x6   : > { %s1784_s17 = smov (%p23_p0, %s22_s17), 0  ;;  %s1786_s18 = smov (!%p23_p0, %s25_s18), %s1512_s15 }
   0x7   : > { %p169_p3 = pnand %p1081_p1, %p168_p2  ;;  %p27_p4 = scmp.ge.s32.totalorder %s1786_s18, 4 }
   0x8   : > { %s1082_s19 = sshll.u32 (!%p169_p3), %s1500_s12, 6  ;;  %p206_p5 = scmp.lt.s32.totalorder (!%p169_p3), %s1504_s13, 3  ;;  %v1624_v40 = vld [vmem:[%s1777_s2] ss:$0 sm:$0xff] (!%p169_p3) }
   0x9   : > { %s1788_s18 = smov (%p27_p4, %s1786_s18), 0  ;;  %172 = sbr.rel (%p169_p3) target bundleno = 344 (0x158), region = 32 }
   0xa   : > { %p208_p6 = scmp.lt.s32.totalorder (!%p169_p3), %s1082_s19, 255 }
  0x10   : > { %s1790_s13 = smov (!%p206_p5, %s1504_s13), 3  ;;  %s1792_s19 = smov (!%p208_p6, %s1082_s19), 255 }
  0x11   : > { %s1083_s20 = sshll.u32 %s1790_s13, 8  ;;  %s1133_s21 = sshll.u32 %s1790_s13, 6 }
  0x12   : > { %s1571_s24 = scalar_lea.vmem %s1776_s1, %s1133_s21  ;;  %s1573_s25 = sadd.s32 %s1083_s20, %s1792_s19 }
  0x13   : > { %v1310_v0 = vld [vmem:[%s1571_s24] sm:$0xff]   ;;  %v1311_v1 = vld [vmem:[%s1571_s24 + $0x8] sm:$0xff]   ;;  %s1084_s26 = sshll.u32 %s1573_s25, 2  ;;  %v1312_v2 = vld [vmem:[%s1571_s24 + $0x10] sm:$0xff]   ;;  %s1089_s5 = sshll.u32 %s1573_s25, 3 }
  0x14   : > { %1174 = vmatprep.subr.bf16.mxu0 %v1310_v0  ;;  %1254 = vmatprep.subr.bf16.mxu1 %v1310_v0  ;;  %s1582_s29 = scalar_lea.vmem %s1775_s0, %s1084_s26  ;;  %v1313_v3 = vld [vmem:[%s1571_s24 + $0x18] sm:$0xff]   ;;  %v1314_v6 = vld [vmem:[%s1571_s24 + $0x20] sm:$0xff]   ;;  %v1315_v7 = vld [vmem:[%s1571_s24 + $0x28] sm:$0xff]   ;;  %s1642_s8 = scalar_lea.vmem %s1778_s3, %s1089_s5 }
  0x15   : > { %1175 = vmatpush3.bf16.msra.mxu0 %v1310_v0  ;;  %1262 = vmatpush3.bf16.msra.mxu1 %v1310_v0  ;;  %v1318_v4 = vld [vmem:[%s1582_s29] sm:$0xff]   ;;  %v1316_v8 = vld [vmem:[%s1571_s24 + $0x30] sm:$0xff]   ;;  %v1317_v9 = vld [vmem:[%s1571_s24 + $0x38] sm:$0xff]  }
  0x16   : > { %1176 = vmatprep.subr.bf16.mxu0 %v1311_v1  ;;  %1255 = vmatprep.subr.bf16.mxu1 %v1311_v1  ;;  %v1319_v5 = vld [vmem:[%s1582_s29 + $0x80] sm:$0xff]   ;;  %v1320_v10 = vld [vmem:[%s1582_s29 + $0x8] sm:$0xff]   ;;  %v1322_v12 = vld [vmem:[%s1582_s29 + $0x10] sm:$0xff]  }
  0x17   : > { %1190 = vmatprep.mubr.bf16.mxu0 %v1318_v4  ;;  %1222 = vmatprep.mubr.bf16.mxu1 %v1319_v5  ;;  %v1321_v11 = vld [vmem:[%s1582_s29 + $0x88] sm:$0xff]   ;;  %v1323_v13 = vld [vmem:[%s1582_s29 + $0x90] sm:$0xff]   ;;  %v1324_v14 = vld [vmem:[%s1582_s29 + $0x18] sm:$0xff]  }
  0x18   : > { %v1325_v15 = vld [vmem:[%s1582_s29 + $0x98] sm:$0xff]   ;;  %v1326_v16 = vld [vmem:[%s1582_s29 + $0x20] sm:$0xff]   ;;  %v1328_v18 = vld [vmem:[%s1582_s29 + $0x28] sm:$0xff]  }
  0x19   : > { %1177 = vmatpush3.bf16.msra.mxu0 %v1311_v1  ;;  %1263 = vmatpush3.bf16.msra.mxu1 %v1311_v1  ;;  %v1327_v17 = vld [vmem:[%s1582_s29 + $0xa0] sm:$0xff]   ;;  %v1329_v19 = vld [vmem:[%s1582_s29 + $0xa8] sm:$0xff]   ;;  %v1330_v20 = vld [vmem:[%s1582_s29 + $0x30] sm:$0xff]  }
  0x1a   : > { %1178 = vmatprep.subr.bf16.mxu0 %v1312_v2  ;;  %1256 = vmatprep.subr.bf16.mxu1 %v1312_v2  ;;  %v1331_v21 = vld [vmem:[%s1582_s29 + $0xb0] sm:$0xff]   ;;  %v1332_v22 = vld [vmem:[%s1582_s29 + $0x38] sm:$0xff]   ;;  %v1334_v24 = vld [vmem:[%s1582_s29 + $0x40] sm:$0xff]  }
  0x1b   : > { %v1333_v23 = vld [vmem:[%s1582_s29 + $0xb8] sm:$0xff]   ;;  %v1335_v25 = vld [vmem:[%s1582_s29 + $0xc0] sm:$0xff]   ;;  %v1336_v26 = vld [vmem:[%s1582_s29 + $0x48] sm:$0xff]  }
  0x1c   : > { %v1337_v27 = vld [vmem:[%s1582_s29 + $0xc8] sm:$0xff]   ;;  %v1338_v28 = vld [vmem:[%s1582_s29 + $0x50] sm:$0xff]   ;;  %v1340_v30 = vld [vmem:[%s1582_s29 + $0x58] sm:$0xff]  }
  0x1d   : > { %1179 = vmatpush3.bf16.msra.mxu0 %v1312_v2  ;;  %1264 = vmatpush3.bf16.msra.mxu1 %v1312_v2  ;;  %v1339_v29 = vld [vmem:[%s1582_s29 + $0xd0] sm:$0xff]   ;;  %v1341_v31 = vld [vmem:[%s1582_s29 + $0xd8] sm:$0xff]   ;;  %v1342_v32 = vld [vmem:[%s1582_s29 + $0x60] sm:$0xff]  }
  0x1e   : > { %1180 = vmatprep.subr.bf16.mxu0 %v1313_v3  ;;  %1257 = vmatprep.subr.bf16.mxu1 %v1313_v3  ;;  %v1343_v33 = vld [vmem:[%s1582_s29 + $0xe0] sm:$0xff]   ;;  %v1344_v34 = vld [vmem:[%s1582_s29 + $0x68] sm:$0xff]   ;;  %v1346_v36 = vld [vmem:[%s1582_s29 + $0x70] sm:$0xff]  }
  0x1f   : > { %v1345_v35 = vld [vmem:[%s1582_s29 + $0xe8] sm:$0xff]   ;;  %v1347_v37 = vld [vmem:[%s1582_s29 + $0xf0] sm:$0xff]   ;;  %v1348_v38 = vld [vmem:[%s1582_s29 + $0x78] sm:$0xff]  }
  0x20   : > { %v1349_v39 = vld [vmem:[%s1582_s29 + $0xf8] sm:$0xff]  }
  0x21   : > { %1181 = vmatpush3.bf16.msra.mxu0 %v1313_v3  ;;  %1265 = vmatpush3.bf16.msra.mxu1 %v1313_v3 }
  0x22   : > { %1182 = vmatprep.subr.bf16.mxu0 %v1314_v6  ;;  %1258 = vmatprep.subr.bf16.mxu1 %v1314_v6 }
  0x25   : > { %1183 = vmatpush3.bf16.msra.mxu0 %v1314_v6  ;;  %1266 = vmatpush3.bf16.msra.mxu1 %v1314_v6 }
  0x26   : > { %1184 = vmatprep.subr.bf16.mxu0 %v1315_v7  ;;  %1259 = vmatprep.subr.bf16.mxu1 %v1315_v7 }
  0x29   : > { %1185 = vmatpush3.bf16.msra.mxu0 %v1315_v7  ;;  %1267 = vmatpush3.bf16.msra.mxu1 %v1315_v7 }
  0x2a   : > { %1186 = vmatprep.subr.bf16.mxu0 %v1316_v8  ;;  %1260 = vmatprep.subr.bf16.mxu1 %v1316_v8 }
  0x2d   : > { %1187 = vmatpush3.bf16.msra.mxu0 %v1316_v8  ;;  %1268 = vmatpush3.bf16.msra.mxu1 %v1316_v8 }
  0x2e   : > { %1188 = vmatprep.subr.bf16.mxu0 %v1317_v9  ;;  %1261 = vmatprep.subr.bf16.mxu1 %v1317_v9 }
  0x31   : > { %1189 = vmatpush3.bf16.msra.mxu0 %v1317_v9  ;;  %1269 = vmatpush3.bf16.msra.mxu1 %v1317_v9 }
  0x34   : > { %1191 = vmatmul.mubr.bf16.vlgmr.msra.gmra.mrb[0].mxu0 %v1320_v10  ;;  %1223 = vmatmul.mubr.bf16.vlgmr.msra.gmra.mrb[0].mxu1 %v1321_v11 }
  0x35   : > { %1194 = vmatprep.mubr.bf16.mxu0 %v1322_v12  ;;  %1226 = vmatprep.mubr.bf16.mxu1 %v1323_v13 }
  0x3c   : > { %1195 = vmatmul.mubr.bf16.gmra.mrb[4].mxu0 %v1324_v14  ;;  %1227 = vmatmul.mubr.bf16.gmra.mrb[4].mxu1 %v1325_v15 }
  0x3d   : > { %1198 = vmatprep.mubr.bf16.mxu0 %v1326_v16  ;;  %1230 = vmatprep.mubr.bf16.mxu1 %v1327_v17 }
  0x44   : > { %1199 = vmatmul.mubr.bf16.gmra.mrb[8].mxu0 %v1328_v18  ;;  %1231 = vmatmul.mubr.bf16.gmra.mrb[8].mxu1 %v1329_v19 }
  0x45   : > { %1202 = vmatprep.mubr.bf16.mxu0 %v1330_v20  ;;  %1234 = vmatprep.mubr.bf16.mxu1 %v1331_v21 }
  0x4c   : > { %1203 = vmatmul.mubr.bf16.gmra.mrb[12].mxu0 %v1332_v22  ;;  %1235 = vmatmul.mubr.bf16.gmra.mrb[12].mxu1 %v1333_v23 }
  0x4d   : > { %1206 = vmatprep.mubr.bf16.mxu0 %v1334_v24  ;;  %1238 = vmatprep.mubr.bf16.mxu1 %v1335_v25 }
  0x54   : > { %1207 = vmatmul.mubr.bf16.gmra.mrb[16].mxu0 %v1336_v26  ;;  %1239 = vmatmul.mubr.bf16.gmra.mrb[16].mxu1 %v1337_v27 }
  0x55   : > { %1210 = vmatprep.mubr.bf16.mxu0 %v1338_v28  ;;  %1242 = vmatprep.mubr.bf16.mxu1 %v1339_v29 }
  0x5c   : > { %1211 = vmatmul.mubr.bf16.gmra.mrb[20].mxu0 %v1340_v30  ;;  %1243 = vmatmul.mubr.bf16.gmra.mrb[20].mxu1 %v1341_v31 }
  0x5d   : > { %1214 = vmatprep.mubr.bf16.mxu0 %v1342_v32  ;;  %1246 = vmatprep.mubr.bf16.mxu1 %v1343_v33 }
  0x64   : > { %1215 = vmatmul.mubr.bf16.gmra.mrb[24].mxu0 %v1344_v34  ;;  %1247 = vmatmul.mubr.bf16.gmra.mrb[24].mxu1 %v1345_v35 }
  0x65   : > { %1218 = vmatprep.mubr.bf16.mxu0 %v1346_v36  ;;  %1250 = vmatprep.mubr.bf16.mxu1 %v1347_v37 }
  0x6c   : > { %1219 = vmatmul.mubr.bf16.gmra.mrb[28].mxu0 %v1348_v38  ;;  %1251 = vmatmul.mubr.bf16.gmra.mrb[28].mxu1 %v1349_v39 }
 0x107   : > { %v1192_v41 = vpop.f32.mrb[0].mxu0  ;;  %v1224_v42 = vpop.f32.mrb[0].mxu1 }
 0x108   : > { %v601_v43 = vadd.f32 %v1192_v41, %v1624_v40  ;;  %v729_v44 = vadd.f32 %v1224_v42, %v1624_v40  ;;  %v592_v45 = vpop.f32.mrb[1].mxu0  ;;  %v720_v46 = vpop.f32.mrb[1].mxu1 }
 0x109   : > { %v593_v47 = vadd.f32 %v1624_v40, %v592_v45  ;;  %v721_v48 = vadd.f32 %v1624_v40, %v720_v46  ;;  %v1193_v49 = vpop.f32.mrb[2].mxu0  ;;  %v1225_v50 = vpop.f32.mrb[2].mxu1 }
 0x10a   : > { %1350 = vtanh.f32 %v601_v43  ;;  %v604_v51 = vadd.f32 %v1193_v49, %v1624_v40  ;;  %v595_v52 = vpop.f32.mrb[3].mxu0  ;;  %v723_v53 = vpop.f32.mrb[3].mxu1  ;;  %v732_v54 = vadd.f32 %v1225_v50, %v1624_v40 }
 0x10b   : > { %1352 = vtanh.f32 %v729_v44  ;;  %v596_v55 = vadd.f32 %v1624_v40, %v595_v52  ;;  %v724_v56 = vadd.f32 %v1624_v40, %v723_v53 }
 0x10c   : > { %1354 = vtanh.f32 %v593_v47 }
 0x10d   : > { %1356 = vtanh.f32 %v721_v48 }
 0x10e   : > { %1358 = vtanh.f32 %v604_v51 }
 0x10f   : > { %1360 = vtanh.f32 %v732_v54  ;;  %v1196_v57 = vpop.f32.mrb[4].mxu0  ;;  %v1228_v58 = vpop.f32.mrb[4].mxu1 }
 0x110   : > { %1362 = vtanh.f32 %v596_v55  ;;  %v617_v59 = vadd.f32 %v1196_v57, %v1624_v40  ;;  %v745_v60 = vadd.f32 %v1228_v58, %v1624_v40  ;;  %v608_v61 = vpop.f32.mrb[5].mxu0  ;;  %v736_v62 = vpop.f32.mrb[5].mxu1 }
 0x111   : > { %1364 = vtanh.f32 %v724_v56  ;;  %v609_v63 = vadd.f32 %v1624_v40, %v608_v61  ;;  %v737_v0 = vadd.f32 %v1624_v40, %v736_v62  ;;  %v1197_v1 = vpop.f32.mrb[6].mxu0  ;;  %v1229_v2 = vpop.f32.mrb[6].mxu1 }
 0x112   : > { %1366 = vtanh.f32 %v617_v59  ;;  %v620_v3 = vadd.f32 %v1197_v1, %v1624_v40  ;;  %v611_v4 = vpop.f32.mrb[7].mxu0  ;;  %v739_v5 = vpop.f32.mrb[7].mxu1  ;;  %v748_v6 = vadd.f32 %v1229_v2, %v1624_v40 }
 0x113   : > { %1368 = vtanh.f32 %v745_v60  ;;  %v612_v8 = vadd.f32 %v1624_v40, %v611_v4  ;;  %v740_v10 = vadd.f32 %v1624_v40, %v739_v5 }
 0x114   : > { %v1351_v7 = vpop.eup %1350  ;;  %1370 = vtanh.f32 %v609_v63 }
 0x115   : > { %v1353_v9 = vpop.eup %1352  ;;  %913 = vst [vmem:[%s1642_s8 + $0x10] sm:$0xff] %v1351_v7  ;;  %1372 = vtanh.f32 %v737_v0 }
 0x116   : > { %v1355_v11 = vpop.eup %1354  ;;  %945 = vst [vmem:[%s1642_s8 + $0x110] sm:$0xff] %v1353_v9  ;;  %1374 = vtanh.f32 %v620_v3 }
 0x117   : > { %v1357_v12 = vpop.eup %1356  ;;  %911 = vst [vmem:[%s1642_s8] sm:$0xff] %v1355_v11  ;;  %1376 = vtanh.f32 %v748_v6  ;;  %v1200_v13 = vpop.f32.mrb[8].mxu0 }
 0x118   : > { %v1232_v14 = vpop.f32.mrb[8].mxu1  ;;  %v1359_v15 = vpop.eup %1358  ;;  %943 = vst [vmem:[%s1642_s8 + $0x100] sm:$0xff] %v1357_v12  ;;  %1378 = vtanh.f32 %v612_v8  ;;  %v633_v16 = vadd.f32 %v1200_v13, %v1624_v40 }
 0x119   : > { %v761_v17 = vadd.f32 %v1232_v14, %v1624_v40  ;;  %v624_v18 = vpop.f32.mrb[9].mxu0  ;;  %v752_v19 = vpop.f32.mrb[9].mxu1  ;;  %914 = vst [vmem:[%s1642_s8 + $0x18] sm:$0xff] %v1359_v15  ;;  %1380 = vtanh.f32 %v740_v10 }
 0x11a   : > { %v1361_v20 = vpop.eup %1360  ;;  %v625_v21 = vadd.f32 %v1624_v40, %v624_v18  ;;  %v753_v22 = vadd.f32 %v1624_v40, %v752_v19  ;;  %v1201_v23 = vpop.f32.mrb[10].mxu0  ;;  %1382 = vtanh.f32 %v633_v16 }
 0x11b   : > { %v1233_v24 = vpop.f32.mrb[10].mxu1  ;;  %v1363_v25 = vpop.eup %1362  ;;  %946 = vst [vmem:[%s1642_s8 + $0x118] sm:$0xff] %v1361_v20  ;;  %v636_v26 = vadd.f32 %v1201_v23, %v1624_v40  ;;  %1384 = vtanh.f32 %v761_v17 }
 0x11c   : > { %v627_v27 = vpop.f32.mrb[11].mxu0  ;;  %v755_v28 = vpop.f32.mrb[11].mxu1  ;;  %912 = vst [vmem:[%s1642_s8 + $0x8] sm:$0xff] %v1363_v25  ;;  %v764_v30 = vadd.f32 %v1233_v24, %v1624_v40  ;;  %1386 = vtanh.f32 %v625_v21 }
 0x11d   : > { %v1365_v29 = vpop.eup %1364  ;;  %v628_v32 = vadd.f32 %v1624_v40, %v627_v27  ;;  %1388 = vtanh.f32 %v753_v22  ;;  %v756_v34 = vadd.f32 %v1624_v40, %v755_v28 }
 0x11e   : > { %v1367_v31 = vpop.eup %1366  ;;  %944 = vst [vmem:[%s1642_s8 + $0x108] sm:$0xff] %v1365_v29  ;;  %1390 = vtanh.f32 %v636_v26 }
 0x11f   : > { %v1369_v33 = vpop.eup %1368  ;;  %917 = vst [vmem:[%s1642_s8 + $0x30] sm:$0xff] %v1367_v31  ;;  %1392 = vtanh.f32 %v764_v30  ;;  %v1204_v37 = vpop.f32.mrb[12].mxu0 }
 0x120   : > { %v1371_v35 = vpop.eup %1370  ;;  %949 = vst [vmem:[%s1642_s8 + $0x130] sm:$0xff] %v1369_v33  ;;  %v1236_v38 = vpop.f32.mrb[12].mxu1  ;;  %1394 = vtanh.f32 %v628_v32  ;;  %v649_v41 = vadd.f32 %v1204_v37, %v1624_v40 }
 0x121   : > { %v1373_v36 = vpop.eup %1372  ;;  %915 = vst [vmem:[%s1642_s8 + $0x20] sm:$0xff] %v1371_v35  ;;  %v777_v42 = vadd.f32 %v1236_v38, %v1624_v40  ;;  %v640_v43 = vpop.f32.mrb[13].mxu0  ;;  %1396 = vtanh.f32 %v756_v34 }
 0x122   : > { %v1375_v39 = vpop.eup %1374  ;;  %947 = vst [vmem:[%s1642_s8 + $0x120] sm:$0xff] %v1373_v36  ;;  %v768_v44 = vpop.f32.mrb[13].mxu1  ;;  %v641_v46 = vadd.f32 %v1624_v40, %v640_v43  ;;  %1398 = vtanh.f32 %v649_v41 }
 0x123   : > { %v1377_v45 = vpop.eup %1376  ;;  %918 = vst [vmem:[%s1642_s8 + $0x38] sm:$0xff] %v1375_v39  ;;  %v769_v47 = vadd.f32 %v1624_v40, %v768_v44  ;;  %v1205_v48 = vpop.f32.mrb[14].mxu0  ;;  %1400 = vtanh.f32 %v777_v42 }
 0x124   : > { %v1237_v49 = vpop.f32.mrb[14].mxu1  ;;  %v1379_v50 = vpop.eup %1378  ;;  %950 = vst [vmem:[%s1642_s8 + $0x138] sm:$0xff] %v1377_v45  ;;  %v652_v51 = vadd.f32 %v1205_v48, %v1624_v40  ;;  %1402 = vtanh.f32 %v641_v46 }
 0x125   : > { %v643_v52 = vpop.f32.mrb[15].mxu0  ;;  %v771_v53 = vpop.f32.mrb[15].mxu1  ;;  %916 = vst [vmem:[%s1642_s8 + $0x28] sm:$0xff] %v1379_v50  ;;  %v780_v55 = vadd.f32 %v1237_v49, %v1624_v40  ;;  %1404 = vtanh.f32 %v769_v47 }
 0x126   : > { %v1381_v54 = vpop.eup %1380  ;;  %v644_v57 = vadd.f32 %v1624_v40, %v643_v52  ;;  %v772_v59 = vadd.f32 %v1624_v40, %v771_v53  ;;  %1406 = vtanh.f32 %v652_v51 }
 0x127   : > { %v1383_v56 = vpop.eup %1382  ;;  %948 = vst [vmem:[%s1642_s8 + $0x128] sm:$0xff] %v1381_v54  ;;  %1408 = vtanh.f32 %v780_v55  ;;  %v1208_v62 = vpop.f32.mrb[16].mxu0 }
 0x128   : > { %v1385_v58 = vpop.eup %1384  ;;  %921 = vst [vmem:[%s1642_s8 + $0x50] sm:$0xff] %v1383_v56  ;;  %v1240_v63 = vpop.f32.mrb[16].mxu1  ;;  %1410 = vtanh.f32 %v644_v57  ;;  %v665_v1 = vadd.f32 %v1208_v62, %v1624_v40 }
 0x129   : > { %v1387_v60 = vpop.eup %1386  ;;  %953 = vst [vmem:[%s1642_s8 + $0x150] sm:$0xff] %v1385_v58  ;;  %v793_v2 = vadd.f32 %v1240_v63, %v1624_v40  ;;  %v656_v3 = vpop.f32.mrb[17].mxu0  ;;  %1412 = vtanh.f32 %v772_v59 }
 0x12a   : > { %v1389_v61 = vpop.eup %1388  ;;  %919 = vst [vmem:[%s1642_s8 + $0x40] sm:$0xff] %v1387_v60  ;;  %v784_v4 = vpop.f32.mrb[17].mxu1  ;;  %v657_v6 = vadd.f32 %v1624_v40, %v656_v3  ;;  %1414 = vtanh.f32 %v665_v1 }
 0x12b   : > { %v1391_v0 = vpop.eup %1390  ;;  %951 = vst [vmem:[%s1642_s8 + $0x140] sm:$0xff] %v1389_v61  ;;  %v785_v7 = vadd.f32 %v1624_v40, %v784_v4  ;;  %v1209_v8 = vpop.f32.mrb[18].mxu0  ;;  %1416 = vtanh.f32 %v793_v2 }
 0x12c   : > { %v1393_v5 = vpop.eup %1392  ;;  %922 = vst [vmem:[%s1642_s8 + $0x58] sm:$0xff] %v1391_v0  ;;  %v1241_v9 = vpop.f32.mrb[18].mxu1  ;;  %v668_v11 = vadd.f32 %v1209_v8, %v1624_v40  ;;  %1418 = vtanh.f32 %v657_v6 }
 0x12d   : > { %v1395_v10 = vpop.eup %1394  ;;  %954 = vst [vmem:[%s1642_s8 + $0x158] sm:$0xff] %v1393_v5  ;;  %v659_v12 = vpop.f32.mrb[19].mxu0  ;;  %v796_v15 = vadd.f32 %v1241_v9, %v1624_v40  ;;  %1420 = vtanh.f32 %v785_v7 }
 0x12e   : > { %v787_v13 = vpop.f32.mrb[19].mxu1  ;;  %v1397_v14 = vpop.eup %1396  ;;  %920 = vst [vmem:[%s1642_s8 + $0x48] sm:$0xff] %v1395_v10  ;;  %v660_v17 = vadd.f32 %v1624_v40, %v659_v12  ;;  %1422 = vtanh.f32 %v668_v11 }
 0x12f   : > { %v1399_v16 = vpop.eup %1398  ;;  %952 = vst [vmem:[%s1642_s8 + $0x148] sm:$0xff] %v1397_v14  ;;  %v788_v19 = vadd.f32 %v1624_v40, %v787_v13  ;;  %1424 = vtanh.f32 %v796_v15  ;;  %v1212_v22 = vpop.f32.mrb[20].mxu0 }
 0x130   : > { %v1401_v18 = vpop.eup %1400  ;;  %925 = vst [vmem:[%s1642_s8 + $0x70] sm:$0xff] %v1399_v16  ;;  %v1244_v23 = vpop.f32.mrb[20].mxu1  ;;  %1426 = vtanh.f32 %v660_v17  ;;  %v681_v25 = vadd.f32 %v1212_v22, %v1624_v40 }
 0x131   : > { %v1403_v20 = vpop.eup %1402  ;;  %957 = vst [vmem:[%s1642_s8 + $0x170] sm:$0xff] %v1401_v18  ;;  %v809_v26 = vadd.f32 %v1244_v23, %v1624_v40  ;;  %v672_v27 = vpop.f32.mrb[21].mxu0  ;;  %1428 = vtanh.f32 %v788_v19 }
 0x132   : > { %v1405_v21 = vpop.eup %1404  ;;  %923 = vst [vmem:[%s1642_s8 + $0x60] sm:$0xff] %v1403_v20  ;;  %v800_v28 = vpop.f32.mrb[21].mxu1  ;;  %v673_v30 = vadd.f32 %v1624_v40, %v672_v27  ;;  %1430 = vtanh.f32 %v681_v25 }
 0x133   : > { %v1407_v24 = vpop.eup %1406  ;;  %955 = vst [vmem:[%s1642_s8 + $0x160] sm:$0xff] %v1405_v21  ;;  %v801_v31 = vadd.f32 %v1624_v40, %v800_v28  ;;  %v1213_v32 = vpop.f32.mrb[22].mxu0  ;;  %1432 = vtanh.f32 %v809_v26 }
 0x134   : > { %v1409_v29 = vpop.eup %1408  ;;  %926 = vst [vmem:[%s1642_s8 + $0x78] sm:$0xff] %v1407_v24  ;;  %v1245_v33 = vpop.f32.mrb[22].mxu1  ;;  %v684_v35 = vadd.f32 %v1213_v32, %v1624_v40  ;;  %1434 = vtanh.f32 %v673_v30 }
 0x135   : > { %v1411_v34 = vpop.eup %1410  ;;  %958 = vst [vmem:[%s1642_s8 + $0x178] sm:$0xff] %v1409_v29  ;;  %v675_v36 = vpop.f32.mrb[23].mxu0  ;;  %v812_v39 = vadd.f32 %v1245_v33, %v1624_v40  ;;  %1436 = vtanh.f32 %v801_v31 }
 0x136   : > { %v803_v37 = vpop.f32.mrb[23].mxu1  ;;  %v1413_v38 = vpop.eup %1412  ;;  %924 = vst [vmem:[%s1642_s8 + $0x68] sm:$0xff] %v1411_v34  ;;  %v676_v42 = vadd.f32 %v1624_v40, %v675_v36  ;;  %1438 = vtanh.f32 %v684_v35 }
 0x137   : > { %v1415_v41 = vpop.eup %1414  ;;  %956 = vst [vmem:[%s1642_s8 + $0x168] sm:$0xff] %v1413_v38  ;;  %v804_v44 = vadd.f32 %v1624_v40, %v803_v37  ;;  %1440 = vtanh.f32 %v812_v39  ;;  %v1216_v47 = vpop.f32.mrb[24].mxu0 }
 0x138   : > { %v1417_v43 = vpop.eup %1416  ;;  %929 = vst [vmem:[%s1642_s8 + $0x90] sm:$0xff] %v1415_v41  ;;  %v1248_v48 = vpop.f32.mrb[24].mxu1  ;;  %1442 = vtanh.f32 %v676_v42  ;;  %v697_v50 = vadd.f32 %v1216_v47, %v1624_v40 }
 0x139   : > { %v1419_v45 = vpop.eup %1418  ;;  %961 = vst [vmem:[%s1642_s8 + $0x190] sm:$0xff] %v1417_v43  ;;  %v825_v51 = vadd.f32 %v1248_v48, %v1624_v40  ;;  %v688_v52 = vpop.f32.mrb[25].mxu0  ;;  %1444 = vtanh.f32 %v804_v44 }
 0x13a   : > { %v1421_v46 = vpop.eup %1420  ;;  %927 = vst [vmem:[%s1642_s8 + $0x80] sm:$0xff] %v1419_v45  ;;  %v816_v53 = vpop.f32.mrb[25].mxu1  ;;  %v689_v55 = vadd.f32 %v1624_v40, %v688_v52  ;;  %1446 = vtanh.f32 %v697_v50 }
 0x13b   : > { %v1423_v49 = vpop.eup %1422  ;;  %959 = vst [vmem:[%s1642_s8 + $0x180] sm:$0xff] %v1421_v46  ;;  %v817_v56 = vadd.f32 %v1624_v40, %v816_v53  ;;  %v1217_v57 = vpop.f32.mrb[26].mxu0  ;;  %1448 = vtanh.f32 %v825_v51 }
 0x13c   : > { %v1425_v54 = vpop.eup %1424  ;;  %930 = vst [vmem:[%s1642_s8 + $0x98] sm:$0xff] %v1423_v49  ;;  %v1249_v58 = vpop.f32.mrb[26].mxu1  ;;  %v700_v60 = vadd.f32 %v1217_v57, %v1624_v40  ;;  %1450 = vtanh.f32 %v689_v55 }
 0x13d   : > { %v1427_v59 = vpop.eup %1426  ;;  %962 = vst [vmem:[%s1642_s8 + $0x198] sm:$0xff] %v1425_v54  ;;  %v691_v61 = vpop.f32.mrb[27].mxu0  ;;  %v828_v0 = vadd.f32 %v1249_v58, %v1624_v40  ;;  %1452 = vtanh.f32 %v817_v56 }
 0x13e   : > { %v819_v62 = vpop.f32.mrb[27].mxu1  ;;  %v1429_v63 = vpop.eup %1428  ;;  %928 = vst [vmem:[%s1642_s8 + $0x88] sm:$0xff] %v1427_v59  ;;  %v692_v2 = vadd.f32 %v1624_v40, %v691_v61  ;;  %1454 = vtanh.f32 %v700_v60 }
 0x13f   : > { %v1431_v1 = vpop.eup %1430  ;;  %960 = vst [vmem:[%s1642_s8 + $0x188] sm:$0xff] %v1429_v63  ;;  %v820_v4 = vadd.f32 %v1624_v40, %v819_v62  ;;  %1456 = vtanh.f32 %v828_v0  ;;  %v1220_v7 = vpop.f32.mrb[28].mxu0 }
 0x140   : > { %v1433_v3 = vpop.eup %1432  ;;  %933 = vst [vmem:[%s1642_s8 + $0xb0] sm:$0xff] %v1431_v1  ;;  %v1252_v8 = vpop.f32.mrb[28].mxu1  ;;  %1458 = vtanh.f32 %v692_v2  ;;  %v713_v10 = vadd.f32 %v1220_v7, %v1624_v40 }
 0x141   : > { %v1435_v5 = vpop.eup %1434  ;;  %965 = vst [vmem:[%s1642_s8 + $0x1b0] sm:$0xff] %v1433_v3  ;;  %v841_v11 = vadd.f32 %v1252_v8, %v1624_v40  ;;  %v704_v12 = vpop.f32.mrb[29].mxu0  ;;  %1460 = vtanh.f32 %v820_v4 }
 0x142   : > { %v1437_v6 = vpop.eup %1436  ;;  %931 = vst [vmem:[%s1642_s8 + $0xa0] sm:$0xff] %v1435_v5  ;;  %v832_v13 = vpop.f32.mrb[29].mxu1  ;;  %v705_v15 = vadd.f32 %v1624_v40, %v704_v12  ;;  %1462 = vtanh.f32 %v713_v10 }
 0x143   : > { %v1439_v9 = vpop.eup %1438  ;;  %963 = vst [vmem:[%s1642_s8 + $0x1a0] sm:$0xff] %v1437_v6  ;;  %v833_v16 = vadd.f32 %v1624_v40, %v832_v13  ;;  %v1221_v17 = vpop.f32.mrb[30].mxu0  ;;  %1464 = vtanh.f32 %v841_v11 }
 0x144   : > { %v1441_v14 = vpop.eup %1440  ;;  %934 = vst [vmem:[%s1642_s8 + $0xb8] sm:$0xff] %v1439_v9  ;;  %v1253_v18 = vpop.f32.mrb[30].mxu1  ;;  %v716_v20 = vadd.f32 %v1221_v17, %v1624_v40  ;;  %1466 = vtanh.f32 %v705_v15 }
 0x145   : > { %v1443_v19 = vpop.eup %1442  ;;  %966 = vst [vmem:[%s1642_s8 + $0x1b8] sm:$0xff] %v1441_v14  ;;  %v707_v21 = vpop.f32.mrb[31].mxu0  ;;  %v844_v24 = vadd.f32 %v1253_v18, %v1624_v40  ;;  %1468 = vtanh.f32 %v833_v16 }
 0x146   : > { %v835_v22 = vpop.f32.mrb[31].mxu1  ;;  %v1445_v23 = vpop.eup %1444  ;;  %932 = vst [vmem:[%s1642_s8 + $0xa8] sm:$0xff] %v1443_v19  ;;  %v708_v26 = vadd.f32 %v1624_v40, %v707_v21  ;;  %1470 = vtanh.f32 %v716_v20 }
 0x147   : > { %v1447_v25 = vpop.eup %1446  ;;  %964 = vst [vmem:[%s1642_s8 + $0x1a8] sm:$0xff] %v1445_v23  ;;  %v836_v28 = vadd.f32 %v1624_v40, %v835_v22  ;;  %1472 = vtanh.f32 %v844_v24 }
 0x148   : > { %v1449_v27 = vpop.eup %1448  ;;  %937 = vst [vmem:[%s1642_s8 + $0xd0] sm:$0xff] %v1447_v25  ;;  %1474 = vtanh.f32 %v708_v26 }
 0x149   : > { %v1451_v29 = vpop.eup %1450  ;;  %969 = vst [vmem:[%s1642_s8 + $0x1d0] sm:$0xff] %v1449_v27  ;;  %1476 = vtanh.f32 %v836_v28 }
 0x14a   : > { %v1453_v30 = vpop.eup %1452  ;;  %935 = vst [vmem:[%s1642_s8 + $0xc0] sm:$0xff] %v1451_v29 }
 0x14b   : > { %v1455_v31 = vpop.eup %1454  ;;  %967 = vst [vmem:[%s1642_s8 + $0x1c0] sm:$0xff] %v1453_v30 }
 0x14c   : > { %v1457_v32 = vpop.eup %1456  ;;  %938 = vst [vmem:[%s1642_s8 + $0xd8] sm:$0xff] %v1455_v31 }
 0x14d   : > { %v1459_v40 = vpop.eup %1458  ;;  %970 = vst [vmem:[%s1642_s8 + $0x1d8] sm:$0xff] %v1457_v32 }
 0x14e   : > { %v1461_v33 = vpop.eup %1460  ;;  %936 = vst [vmem:[%s1642_s8 + $0xc8] sm:$0xff] %v1459_v40 }
 0x14f   : > { %v1463_v34 = vpop.eup %1462  ;;  %968 = vst [vmem:[%s1642_s8 + $0x1c8] sm:$0xff] %v1461_v33 }
 0x150   : > { %v1465_v35 = vpop.eup %1464  ;;  %941 = vst [vmem:[%s1642_s8 + $0xf0] sm:$0xff] %v1463_v34 }
 0x151   : > { %v1467_v36 = vpop.eup %1466  ;;  %973 = vst [vmem:[%s1642_s8 + $0x1f0] sm:$0xff] %v1465_v35 }
 0x152   : > { %v1469_v37 = vpop.eup %1468  ;;  %939 = vst [vmem:[%s1642_s8 + $0xe0] sm:$0xff] %v1467_v36 }
 0x153   : > { %v1471_v38 = vpop.eup %1470  ;;  %971 = vst [vmem:[%s1642_s8 + $0x1e0] sm:$0xff] %v1469_v37 }
 0x154   : > { %v1473_v39 = vpop.eup %1472  ;;  %942 = vst [vmem:[%s1642_s8 + $0xf8] sm:$0xff] %v1471_v38 }
 0x155   : > { %v1475_v41 = vpop.eup %1474  ;;  %974 = vst [vmem:[%s1642_s8 + $0x1f8] sm:$0xff] %v1473_v39 }
 0x156   : > { %v1477_v42 = vpop.eup %1476  ;;  %940 = vst [vmem:[%s1642_s8 + $0xe8] sm:$0xff] %v1475_v41 }
 0x157   : > { %972 = vst [vmem:[%s1642_s8 + $0x1e8] sm:$0xff] %v1477_v42 }
 0x158 PF: > { %s13_s16 = sadd.s32 1, %s1516_s16   ;;  %s1779_s12 = smov %s1508_s14 }
 0x159   : > { %p10_p7 = scmp.ge.s32.totalorder %s13_s16, 18   ;;  %s1780_s13 = smov %s1512_s15 }
 0x15a   : > { %s1781_s14 = smov %s1784_s17  ;;  %s1782_s15 = smov %s1788_s18 }
 0x15b   :  { %12 = sbr.rel (!%p10_p7) target bundleno = 3 (0x3), region = 65 }

</bundles_post_ra>
